<compile_context>
chip_gen: v6e
topology: v6e:2x2x1
jax: 0.10.0
libtpu: 0.0.40
codegen_flags: <defaults>
</compile_context>

<pallas_src>
import math
import numpy as np
import jax
import jax.numpy as jnp
from jax import lax
from jax.experimental import pallas as pl
from jax.experimental.pallas import tpu as pltpu


# ----------------------------- config ------------------------------
class Cfg:
    vocab_size = 50
    block_size = 16
    n_layer = 2
    n_head = 4
    n_embd = 32
    dropout = 0.0
    bias = True
    input_dim = 4
    cnn_1_dim = 32           # must equal n_embd (transformer runs on cnn output)
    cnn_1_kernel_size = 3
    cnn_1_stride = 2


CFG = Cfg()
GEM_KERNEL = 6               # GeM(kernel_size=6) inside Encoder.cnn1
VOCAB_PAD = 128              # lane-dense padded vocab for the tied lm_head
GELU_C = math.sqrt(2.0 / math.pi)
NEG = -1e9                   # additive mask bias (finite; exp underflows to exactly 0)


# --------------------------- fused kernel ---------------------------
def make_gpt_kernel(cfg):
    """Fused GPT forward kernel; batch folded into rows, everything resident in VMEM."""
    C = cfg.n_embd
    nl = cfg.n_layer
    C3 = 3 * C
    C4 = 4 * C

    # index helpers into the packed parameter stacks
    enc_ln1 = lambda li: 2 * li
    enc_ln2 = lambda li: 2 * li + 1
    enc_lnf = 2 * nl
    dec_ln1 = lambda li: 2 * nl + 1 + 2 * li
    dec_ln2 = lambda li: 2 * nl + 2 + 2 * li
    dec_lnf = 4 * nl + 1
    enc_att = lambda li: li
    dec_att_self = lambda li: nl + 2 * li
    dec_att_cross = lambda li: nl + 2 * li + 1
    enc_mlp = lambda li: li
    dec_mlp = lambda li: nl + li

    def kernel(patches_ref, conv_wt_ref, pool_mat_ref, dec_in_ref, lmh_ref,
               att_w_ref, att_b_ref, mlp_w1_ref, mlp_b1_ref, mlp_w2_ref,
               mlp_b2_ref, ln_w_ref, ln_b_ref, misc_ref,
               rrep_e_ref, kvmask_e_ref, segones_e_ref,
               rrep_d_ref, kvmask_d_ref, segones_d_ref,
               mask_enc_ref, mask_dself_ref, mask_cross_ref, out_ref):
        f32 = jnp.float32

        def layer_norm(x, i):
            mu = jnp.mean(x, axis=-1, keepdims=True)
            var = jnp.mean(jnp.square(x - mu), axis=-1, keepdims=True)
            return (x - mu) * lax.rsqrt(var + 1e-5) * ln_w_ref[i] + ln_b_ref[i]

        def attention(xq, xkv, i, rrep, kvmask, segones, mask_bias):
            # packed weight columns: [ q * 1/sqrt(Dh) | k | v | out_proj ]  -> [C, 4C]
            w = att_w_ref[i]
            b = att_b_ref[i]
            if xkv is None:
                # self-attention: one fused QKV projection [T,C] @ [C,3C]
                qkv = jnp.dot(xq, w[:, :C3], preferred_element_type=f32) + b[:, :C3]
                q, kv = qkv[:, :C], qkv[:, C:C3]
            else:
                # cross-attention: Q from decoder rows, fused K|V from encoder rows
                q = jnp.dot(xq, w[:, :C], preferred_element_type=f32) + b[:, :C]
                kv = jnp.dot(xkv, w[:, C:C3], preferred_element_type=f32) + b[:, C:C3]
            # block-diagonal K/V: kvbd[h*Tk+t, c] = kv[t, c] * (c in head h)  -> [H*Tk, 2C]
            kvbd = jnp.dot(rrep, kv, preferred_element_type=f32) * kvmask
            # scores over all heads at once: [Tq, H*Tk]; scale already baked into Wq;
            # additive causal + batch-block mask precomputed on the host.
            s = lax.dot_general(q, kvbd[:, :C], (((1,), (1,)), ((), ())),
                                preferred_element_type=f32) + mask_bias
            m = jnp.max(s, axis=-1, keepdims=True)          # global row max (softmax-invariant per segment)
            e = jnp.exp(s - m)
            denom = jnp.dot(e, segones, preferred_element_type=f32)   # per-head segment sums
            p = e * pl.reciprocal(denom, approx=True)
            y = jnp.dot(p, kvbd[:, C:], preferred_element_type=f32)   # head-concatenated [Tq, C]
            return jnp.dot(y, w[:, C3:], preferred_element_type=f32) + b[:, C3:]

        def mlp(x, i):
            h = jnp.dot(x, mlp_w1_ref[i], preferred_element_type=f32) + mlp_b1_ref[i]
            h = 0.5 * h * (1.0 + jnp.tanh(GELU_C * (h + 0.044715 * h * h * h)))
            return jnp.dot(h, mlp_w2_ref[i], preferred_element_type=f32) + mlp_b2_ref[i]

        # ------------------------- encoder -------------------------
        # Conv1d (im2col patches formed in the wrapper)  -> [B*Lc, C]
        conv = jnp.dot(patches_ref[...], conv_wt_ref[...],
                       preferred_element_type=f32) + misc_ref[0]
        # GeM(kernel=6): clamp(eps).pow(p) -> avg_pool1d (host-precomputed pooling matmul)
        # -> pow(1/p) with host-precomputed 1/p.
        xp = jnp.exp(misc_ref[4] * jnp.log(jnp.maximum(conv, 1e-6)))
        pooled = jnp.dot(pool_mat_ref[...], xp, preferred_element_type=f32)   # [B*Te, C]
        g = jnp.exp(misc_ref[5] * jnp.log(pooled))
        g = g * misc_ref[1] + misc_ref[2]           # BatchNorm1d (running stats, folded)
        g = g * jax.nn.sigmoid(g)                   # SiLU
        x = g + misc_ref[3]                         # + sinusoid positional row

        rrep_e, kvmask_e = rrep_e_ref[...], kvmask_e_ref[...]
        segones_e, mask_enc = segones_e_ref[...], mask_enc_ref[...]
        for li in range(nl):
            xn = layer_norm(x, enc_ln1(li))
            x = x + attention(xn, None, enc_att(li), rrep_e, kvmask_e, segones_e, mask_enc)
            x = x + mlp(layer_norm(x, enc_ln2(li)), enc_mlp(li))
        enc_out = layer_norm(x, enc_lnf)            # [B*Te, C]

        # ------------------------- decoder -------------------------
        rrep_d, kvmask_d = rrep_d_ref[...], kvmask_d_ref[...]
        segones_d, mask_ds = segones_d_ref[...], mask_dself_ref[...]
        mask_x = mask_cross_ref[...]
        x = dec_in_ref[...]                         # tok_emb + pos_emb, folded [B*Td, C]
        for li in range(nl):
            xn = layer_norm(x, dec_ln1(li))
            x = x + attention(xn, None, dec_att_self(li), rrep_d, kvmask_d, segones_d, mask_ds)
            xn = layer_norm(x, dec_ln1(li))         # ln_1 is reused for cross-attention (as in reference)
            x = x + attention(xn, enc_out, dec_att_cross(li), rrep_e, kvmask_e, segones_e, mask_x)
            x = x + mlp(layer_norm(x, dec_ln2(li)), dec_mlp(li))
        x = layer_norm(x, dec_lnf)
        out_ref[...] = jnp.dot(x, lmh_ref[...], preferred_element_type=f32)

    return kernel


# --------------------------- forward glue ---------------------------
def gpt_forward(idx, targets, packed, cfg=CFG):
    B, cin, L = idx.shape
    C = cfg.n_embd
    H = cfg.n_head
    K, S = cfg.cnn_1_kernel_size, cfg.cnn_1_stride
    Lc = (L - K) // S + 1
    T_enc = Lc // GEM_KERNEL
    tokens = targets[:, :-1].astype(jnp.int32)
    T_dec = tokens.shape[1]
    BTe, BTd = B * T_enc, B * T_dec

    # Small XLA glue: Conv1d im2col (static strided slices) + decoder token/pos embedding.
    cols = [idx[:, :, k:k + S * (Lc - 1) + 1:S] for k in range(K)]   # K x [B, Cin, Lc]
    patches = jnp.stack(cols, axis=-1)                               # [B, Cin, Lc, K]
    patches = patches.transpose(0, 2, 1, 3).reshape(B * Lc, cin * K).astype(jnp.float32)
    tok_emb = jnp.take(packed['wte'], tokens, axis=0)                # [B, Td, C]
    dec_in = (tok_emb + packed['wpe'][:T_dec][None]).reshape(BTd, C).astype(jnp.float32)

    NA, NM, NL = 3 * cfg.n_layer, 2 * cfg.n_layer, 4 * cfg.n_layer + 2
    c2 = lambda i: (0, 0)
    c3 = lambda i: (0, 0, 0)

    kernel = make_gpt_kernel(cfg)
    logits = pl.pallas_call(
        kernel,
        out_shape=jax.ShapeDtypeStruct((BTd, VOCAB_PAD), jnp.float32),
        grid=(1,),                                                   # single fused step
        in_specs=[
            pl.BlockSpec((B * Lc, cin * K), c2),     # conv patches (batch folded into rows)
            pl.BlockSpec((cin * K, C), c2),          # conv weight^T
            pl.BlockSpec((BTe, B * Lc), c2),         # GeM pooling matrix (const)
            pl.BlockSpec((BTd, C), c2),              # decoder tok+pos embedding
            pl.BlockSpec((C, VOCAB_PAD), c2),        # lm_head = wte^T (lane-dense, padded)
            pl.BlockSpec((NA, C, 4 * C), c3),        # packed attn weights
            pl.BlockSpec((NA, 1, 4 * C), c3),        # packed attn biases
            pl.BlockSpec((NM, C, 4 * C), c3),        # mlp c_fc^T
            pl.BlockSpec((NM, 1, 4 * C), c3),        # mlp c_fc bias
            pl.BlockSpec((NM, 4 * C, C), c3),        # mlp c_proj^T
            pl.BlockSpec((NM, 1, C), c3),            # mlp c_proj bias
            pl.BlockSpec((NL, 1, C), c3),            # layernorm weights
            pl.BlockSpec((NL, 1, C), c3),            # layernorm biases
            pl.BlockSpec((6, 1, C), c3),             # conv_b / bn scale / bn shift / enc pos / p / 1/p
            pl.BlockSpec((H * BTe, BTe), c2),        # head replication matrix (enc keys)
            pl.BlockSpec((H * BTe, 2 * C), c2),      # head-select mask for K|V (enc keys)
            pl.BlockSpec((H * BTe, H * BTe), c2),    # segment-ones (softmax denom, enc keys)
            pl.BlockSpec((H * BTd, BTd), c2),        # head replication matrix (dec keys)
            pl.BlockSpec((H * BTd, 2 * C), c2),      # head-select mask for K|V (dec keys)
            pl.BlockSpec((H * BTd, H * BTd), c2),    # segment-ones (dec keys)
            pl.BlockSpec((BTe, H * BTe), c2),        # encoder self-attn mask bias
            pl.BlockSpec((BTd, H * BTd), c2),        # decoder self-attn mask bias
            pl.BlockSpec((BTd, H * BTe), c2),        # decoder cross-attn mask bias
        ],
        out_specs=pl.BlockSpec((BTd, VOCAB_PAD), c2),
        compiler_params=pltpu.CompilerParams(
            dimension_semantics=("arbitrary",),
            vmem_limit_bytes=32 * 1024 * 1024),
    )(patches, packed['conv_wt'], packed['pool_mat'], dec_in, packed['lm_head'],
      packed['att_w'], packed['att_b'], packed['mlp_w1'], packed['mlp_b1'],
      packed['mlp_w2'], packed['mlp_b2'], packed['ln_w'], packed['ln_b'],
      packed['misc'], packed['rrep_e'], packed['kvmask_e'], packed['segones_e'],
      packed['rrep_d'], packed['kvmask_d'], packed['segones_d'],
      packed['mask_enc'], packed['mask_dself'], packed['mask_cross'])

    return logits.reshape(B, T_dec, VOCAB_PAD)[:, :, :cfg.vocab_size]


# ------------------------ parameter handling ------------------------
def sinusoids_np(channels, max_timescale=10000):
    assert channels % 2 == 0
    emb = []
    for length in range(1, 200):
        log_ts = np.log(max_timescale) / (channels // 2 - 1)
        inv = np.exp(-log_ts * np.arange(channels // 2))
        scaled = np.arange(length)[:, None] * inv[None, :]
        emb.append(np.concatenate([np.sin(scaled), np.cos(scaled)], axis=1))
    return np.concatenate(emb, axis=0).astype(np.float32)


def init_params(cfg, key):
    assert cfg.cnn_1_dim == cfg.n_embd
    std = 0.02
    proj_std = 0.02 / math.sqrt(2 * cfg.n_layer)
    keys = iter(jax.random.split(key, 512))

    def nrm(shape, s=std):
        return s * jax.random.normal(next(keys), shape, dtype=jnp.float32)

    def zeros(shape):
        return jnp.zeros(shape, jnp.float32)

    def ones(shape):
        return jnp.ones(shape, jnp.float32)

    C = cfg.n_embd

    def attn_p():
        return dict(wq=nrm((C, C)), bq=zeros((C,)),
                    wk=nrm((C, C)), bk=zeros((C,)),
                    wv=nrm((C, C)), bv=zeros((C,)),
                    wo=nrm((C, C), proj_std), bo=zeros((C,)))

    def block_p():
        return dict(ln1_w=ones((C,)), ln1_b=zeros((C,)),
                    ln2_w=ones((C,)), ln2_b=zeros((C,)),
                    self_attn=attn_p(), cross_attn=attn_p(),
                    mlp_w1=nrm((4 * C, C)), mlp_b1=zeros((4 * C,)),
                    mlp_w2=nrm((C, 4 * C), proj_std), mlp_b2=zeros((C,)))

    encoder = dict(
        conv_w=nrm((cfg.cnn_1_dim, cfg.input_dim, cfg.cnn_1_kernel_size)),
        conv_b=zeros((cfg.cnn_1_dim,)),
        gem_p=jnp.array([3.0], jnp.float32),
        bn_g=ones((cfg.cnn_1_dim,)), bn_b=zeros((cfg.cnn_1_dim,)),
        bn_rm=zeros((cfg.cnn_1_dim,)), bn_rv=ones((cfg.cnn_1_dim,)),
        blocks=[block_p() for _ in range(cfg.n_layer)],
        lnf_w=ones((C,)), lnf_b=zeros((C,)),
    )
    decoder = dict(
        wte=nrm((cfg.vocab_size, C)),           # shared with lm_head (tied weights)
        wpe=nrm((cfg.block_size, C)),
        blocks=[block_p() for _ in range(cfg.n_layer)],
        lnf_w=ones((C,)), lnf_b=zeros((C,)),
    )
    return dict(encoder=encoder, decoder=decoder)


def pack_params(params, cfg, batch, t_enc, t_dec, lc, sin_table):
    """One-time packing: transposes, QKV+proj fusion, scale baking, BN folding,
    and host precomputation of all attention / pooling constant matrices."""
    C = cfg.n_embd
    H = cfg.n_head
    Dh = C // H
    scale = 1.0 / math.sqrt(Dh)
    nl = cfg.n_layer
    B = batch

    def attn_pack(p):
        w = jnp.concatenate([p['wq'].T * scale, p['wk'].T, p['wv'].T, p['wo'].T], axis=1)
        b = jnp.concatenate([p['bq'] * scale, p['bk'], p['bv'], p['bo']], axis=0)
        return w.astype(jnp.float32), b.astype(jnp.float32)

    enc, dec = params['encoder'], params['decoder']

    att_w, att_b = [], []
    for li in range(nl):                                   # encoder self-attn -> index li
        w, b = attn_pack(enc['blocks'][li]['self_attn']); att_w.append(w); att_b.append(b)
    for li in range(nl):                                   # decoder self / cross interleaved
        w, b = attn_pack(dec['blocks'][li]['self_attn']); att_w.append(w); att_b.append(b)
        w, b = attn_pack(dec['blocks'][li]['cross_attn']); att_w.append(w); att_b.append(b)

    mlp_w1, mlp_b1, mlp_w2, mlp_b2 = [], [], [], []
    for blocks in (enc['blocks'], dec['blocks']):
        for bp in blocks:
            mlp_w1.append(bp['mlp_w1'].T); mlp_b1.append(bp['mlp_b1'])
            mlp_w2.append(bp['mlp_w2'].T); mlp_b2.append(bp['mlp_b2'])

    ln_w, ln_b = [], []
    for li in range(nl):
        ln_w += [enc['blocks'][li]['ln1_w'], enc['blocks'][li]['ln2_w']]
        ln_b += [enc['blocks'][li]['ln1_b'], enc['blocks'][li]['ln2_b']]
    ln_w.append(enc['lnf_w']); ln_b.append(enc['lnf_b'])
    for li in range(nl):
        ln_w += [dec['blocks'][li]['ln1_w'], dec['blocks'][li]['ln2_w']]
        ln_b += [dec['blocks'][li]['ln1_b'], dec['blocks'][li]['ln2_b']]
    ln_w.append(dec['lnf_w']); ln_b.append(dec['lnf_b'])

    # BatchNorm1d folded to scale/shift (inference / running statistics).
    bn_scale = enc['bn_g'] * lax.rsqrt(enc['bn_rv'] + 1e-5)
    bn_shift = enc['bn_b'] - enc['bn_rm'] * bn_scale
    p_val = float(np.asarray(enc['gem_p'])[0])
    pos_row = jnp.asarray(sin_table[t_enc], jnp.float32)        # reference indexes flat row T_enc
    misc = jnp.stack([enc['conv_b'], bn_scale, bn_shift, pos_row,
                      jnp.full((C,), p_val, jnp.float32),
                      jnp.full((C,), 1.0 / p_val, jnp.float32)], axis=0)

    # tied lm_head, padded to 128 lanes so the kernel's only store is a dense (T,128) tile
    wte_pad = jnp.zeros((VOCAB_PAD, C), jnp.float32).at[:cfg.vocab_size].set(dec['wte'])
    K = cfg.cnn_1_kernel_size
    conv_wt = enc['conv_w'].reshape(cfg.cnn_1_dim, cfg.input_dim * K).T

    # ----- host-precomputed constant matrices for the lane-packed attention -----
    def head_constants(btk):
        rrep = np.zeros((H * btk, btk), np.float32)       # row replication per head block
        kvmask = np.zeros((H * btk, 2 * C), np.float32)   # head-select on the K|V lanes
        segones = np.zeros((H * btk, H * btk), np.float32)  # block-diag ones (segment sums)
        for h in range(H):
            rrep[h * btk:(h + 1) * btk, :] = np.eye(btk, dtype=np.float32)
            kvmask[h * btk:(h + 1) * btk, h * Dh:(h + 1) * Dh] = 1.0
            kvmask[h * btk:(h + 1) * btk, C + h * Dh:C + (h + 1) * Dh] = 1.0
            segones[h * btk:(h + 1) * btk, h * btk:(h + 1) * btk] = 1.0
        return rrep, kvmask, segones

    def mask_bias(tq, tk):
        # additive bias [B*tq, H*B*tk]: 0 where (same batch AND key_pos <= query_pos), else -1e9.
        base = np.full((B * tq, B * tk), NEG, np.float32)
        ii = np.arange(tq)[:, None]
        jj = np.arange(tk)[None, :]
        tri = np.where(jj <= ii, 0.0, NEG).astype(np.float32)
        for b in range(B):
            base[b * tq:(b + 1) * tq, b * tk:(b + 1) * tk] = tri
        return np.tile(base, (1, H))

    bte, btd = B * t_enc, B * t_dec
    rrep_e, kvmask_e, segones_e = head_constants(bte)
    rrep_d, kvmask_d, segones_d = head_constants(btd)
    mask_enc = mask_bias(t_enc, t_enc)       # encoder self-attn (causal, as in reference)
    mask_dself = mask_bias(t_dec, t_dec)     # decoder self-attn
    mask_cross = mask_bias(t_dec, t_enc)     # decoder cross-attn (reference applies tril here too)

    # GeM average-pooling as a matmul over the batch-folded conv rows
    pool_mat = np.zeros((B * t_enc, B * lc), np.float32)
    for b in range(B):
        for t in range(t_enc):
            s0 = b * lc + t * GEM_KERNEL
            pool_mat[b * t_enc + t, s0:s0 + GEM_KERNEL] = 1.0 / GEM_KERNEL

    return dict(
        conv_wt=conv_wt.astype(jnp.float32),
        pool_mat=jnp.asarray(pool_mat),
        wte=dec['wte'].astype(jnp.float32),           # raw table (wrapper gather)
        wpe=dec['wpe'].astype(jnp.float32),
        lm_head=wte_pad.T,
        att_w=jnp.stack(att_w), att_b=jnp.stack(att_b)[:, None, :],
        mlp_w1=jnp.stack(mlp_w1), mlp_b1=jnp.stack(mlp_b1)[:, None, :],
        mlp_w2=jnp.stack(mlp_w2), mlp_b2=jnp.stack(mlp_b2)[:, None, :],
        ln_w=jnp.stack(ln_w)[:, None, :], ln_b=jnp.stack(ln_b)[:, None, :],
        misc=misc[:, None, :],
        rrep_e=jnp.asarray(rrep_e), kvmask_e=jnp.asarray(kvmask_e),
        segones_e=jnp.asarray(segones_e),
        rrep_d=jnp.asarray(rrep_d), kvmask_d=jnp.asarray(kvmask_d),
        segones_d=jnp.asarray(segones_d),
        mask_enc=jnp.asarray(mask_enc), mask_dself=jnp.asarray(mask_dself),
        mask_cross=jnp.asarray(mask_cross),
    )


# ------------------------------ main --------------------------------
if __name__ == "__main__":
    cfg = CFG
    key = jax.random.PRNGKey(0)
    kp, kx, kt = jax.random.split(key, 3)

    params = init_params(cfg, kp)
    sin_table = sinusoids_np(cfg.cnn_1_dim)

    # Encoder input: continuous signal [B, input_dim, L]; L=97 -> conv len 48 -> GeM len 8.
    B, L = 2, 97
    Lc = (L - cfg.cnn_1_kernel_size) // cfg.cnn_1_stride + 1
    T_enc = Lc // GEM_KERNEL                       # 8
    T_dec = 8
    idx = jax.random.normal(kx, (B, cfg.input_dim, L), dtype=jnp.float32)
    # Decoder targets: [B, 9] token ids; decoder consumes targets[:, :-1] (T_dec = 8).
    targets = jax.random.randint(kt, (B, T_dec + 1), 0, cfg.vocab_size)

    packed = pack_params(params, cfg, B, T_enc, T_dec, Lc, sin_table)
    fwd = jax.jit(gpt_forward)
    logits = fwd(idx, targets, packed)
    logits = jax.block_until_ready(logits)

    assert logits.shape == (B, T_dec, cfg.vocab_size), logits.shape
    assert bool(jnp.all(jnp.isfinite(logits)))
    print("KERNEL_OK")
</pallas_src>

<mosaic_0001>
module attributes {stable_mosaic.version = 11 : i64} {
  func.func @kernel(%arg0: i32, %arg1: memref<96x12xf32, #tpu.memory_space<vmem>>, %arg2: memref<12x32xf32, #tpu.memory_space<vmem>>, %arg3: memref<16x96xf32, #tpu.memory_space<vmem>>, %arg4: memref<16x32xf32, #tpu.memory_space<vmem>>, %arg5: memref<32x128xf32, #tpu.memory_space<vmem>>, %arg6: memref<6x32x128xf32, #tpu.memory_space<vmem>>, %arg7: memref<6x1x128xf32, #tpu.memory_space<vmem>>, %arg8: memref<4x32x128xf32, #tpu.memory_space<vmem>>, %arg9: memref<4x1x128xf32, #tpu.memory_space<vmem>>, %arg10: memref<4x128x32xf32, #tpu.memory_space<vmem>>, %arg11: memref<4x1x32xf32, #tpu.memory_space<vmem>>, %arg12: memref<10x1x32xf32, #tpu.memory_space<vmem>>, %arg13: memref<10x1x32xf32, #tpu.memory_space<vmem>>, %arg14: memref<6x1x32xf32, #tpu.memory_space<vmem>>, %arg15: memref<64x16xf32, #tpu.memory_space<vmem>>, %arg16: memref<64x64xf32, #tpu.memory_space<vmem>>, %arg17: memref<64x64xf32, #tpu.memory_space<vmem>>, %arg18: memref<64x16xf32, #tpu.memory_space<vmem>>, %arg19: memref<64x64xf32, #tpu.memory_space<vmem>>, %arg20: memref<64x64xf32, #tpu.memory_space<vmem>>, %arg21: memref<16x64xf32, #tpu.memory_space<vmem>>, %arg22: memref<16x64xf32, #tpu.memory_space<vmem>>, %arg23: memref<16x64xf32, #tpu.memory_space<vmem>>, %arg24: memref<16x128xf32, #tpu.memory_space<vmem>>) attributes {dimension_semantics = [#tpu.dimension_semantics<arbitrary>], iteration_bounds = array<i64: 1>, scalar_prefetch = 0 : i64, scratch_operands = 0 : i64, tpu.core_type = #tpu.core_type<tc>, window_params = [{pipeline_mode = #tpu.pipeline_mode<synchronous>, transform_indices = @transform_0, window_bounds = array<i64: 96, 12>}, {pipeline_mode = #tpu.pipeline_mode<synchronous>, transform_indices = @transform_1, window_bounds = array<i64: 12, 32>}, {pipeline_mode = #tpu.pipeline_mode<synchronous>, transform_indices = @transform_2, window_bounds = array<i64: 16, 96>}, {pipeline_mode = #tpu.pipeline_mode<synchronous>, transform_indices = @transform_3, window_bounds = array<i64: 16, 32>}, {pipeline_mode = #tpu.pipeline_mode<synchronous>, transform_indices = @transform_4, window_bounds = array<i64: 32, 128>}, {pipeline_mode = #tpu.pipeline_mode<synchronous>, transform_indices = @transform_5, window_bounds = array<i64: 6, 32, 128>}, {pipeline_mode = #tpu.pipeline_mode<synchronous>, transform_indices = @transform_6, window_bounds = array<i64: 6, 1, 128>}, {pipeline_mode = #tpu.pipeline_mode<synchronous>, transform_indices = @transform_7, window_bounds = array<i64: 4, 32, 128>}, {pipeline_mode = #tpu.pipeline_mode<synchronous>, transform_indices = @transform_8, window_bounds = array<i64: 4, 1, 128>}, {pipeline_mode = #tpu.pipeline_mode<synchronous>, transform_indices = @transform_9, window_bounds = array<i64: 4, 128, 32>}, {pipeline_mode = #tpu.pipeline_mode<synchronous>, transform_indices = @transform_10, window_bounds = array<i64: 4, 1, 32>}, {pipeline_mode = #tpu.pipeline_mode<synchronous>, transform_indices = @transform_11, window_bounds = array<i64: 10, 1, 32>}, {pipeline_mode = #tpu.pipeline_mode<synchronous>, transform_indices = @transform_12, window_bounds = array<i64: 10, 1, 32>}, {pipeline_mode = #tpu.pipeline_mode<synchronous>, transform_indices = @transform_13, window_bounds = array<i64: 6, 1, 32>}, {pipeline_mode = #tpu.pipeline_mode<synchronous>, transform_indices = @transform_14, window_bounds = array<i64: 64, 16>}, {pipeline_mode = #tpu.pipeline_mode<synchronous>, transform_indices = @transform_15, window_bounds = array<i64: 64, 64>}, {pipeline_mode = #tpu.pipeline_mode<synchronous>, transform_indices = @transform_16, window_bounds = array<i64: 64, 64>}, {pipeline_mode = #tpu.pipeline_mode<synchronous>, transform_indices = @transform_17, window_bounds = array<i64: 64, 16>}, {pipeline_mode = #tpu.pipeline_mode<synchronous>, transform_indices = @transform_18, window_bounds = array<i64: 64, 64>}, {pipeline_mode = #tpu.pipeline_mode<synchronous>, transform_indices = @transform_19, window_bounds = array<i64: 64, 64>}, {pipeline_mode = #tpu.pipeline_mode<synchronous>, transform_indices = @transform_20, window_bounds = array<i64: 16, 64>}, {pipeline_mode = #tpu.pipeline_mode<synchronous>, transform_indices = @transform_21, window_bounds = array<i64: 16, 64>}, {pipeline_mode = #tpu.pipeline_mode<synchronous>, transform_indices = @transform_22, window_bounds = array<i64: 16, 64>}, {pipeline_mode = #tpu.pipeline_mode<synchronous>, transform_indices = @transform_23, window_bounds = array<i64: 16, 128>}]} {
    %c0 = arith.constant 0 : index
    %c0_0 = arith.constant 0 : index
    %0 = vector.load %arg1[%c0, %c0_0] : memref<96x12xf32, #tpu.memory_space<vmem>>, vector<96x12xf32>
    %c0_1 = arith.constant 0 : index
    %c0_2 = arith.constant 0 : index
    %1 = vector.load %arg2[%c0_1, %c0_2] : memref<12x32xf32, #tpu.memory_space<vmem>>, vector<12x32xf32>
    %cst = arith.constant dense<0.000000e+00> : vector<96x32xf32>
    %2 = tpu.matmul %0, %1, %cst {dimension_numbers = #tpu.dot_dimension_numbers<[1], [0], [0], [1], [0, 0, 1, 1], [], []>} : vector<96x12xf32>, vector<12x32xf32>, vector<96x32xf32> -> vector<96x32xf32>
    %c0_3 = arith.constant 0 : index
    %c0_4 = arith.constant 0 : index
    %c0_5 = arith.constant 0 : index
    %3 = vector.load %arg14[%c0_3, %c0_4, %c0_5] : memref<6x1x32xf32, #tpu.memory_space<vmem>>, vector<1x1x32xf32>
    %4 = vector.shape_cast %3 : vector<1x1x32xf32> to vector<1x32xf32>
    %5 = vector.broadcast %4 : vector<1x32xf32> to vector<96x32xf32>
    %6 = arith.addf %2, %5 : vector<96x32xf32>
    %c4 = arith.constant 4 : index
    %c0_6 = arith.constant 0 : index
    %c0_7 = arith.constant 0 : index
    %7 = vector.load %arg14[%c4, %c0_6, %c0_7] : memref<6x1x32xf32, #tpu.memory_space<vmem>>, vector<1x1x32xf32>
    %8 = vector.shape_cast %7 : vector<1x1x32xf32> to vector<1x32xf32>
    %cst_8 = arith.constant 9.99999997E-7 : f32
    %9 = vector.broadcast %cst_8 : f32 to vector<96x32xf32>
    %10 = arith.maximumf %6, %9 : vector<96x32xf32>
    %11 = math.log %10 : vector<96x32xf32>
    %12 = vector.broadcast %8 : vector<1x32xf32> to vector<96x32xf32>
    %13 = arith.mulf %12, %11 : vector<96x32xf32>
    %14 = math.exp %13 : vector<96x32xf32>
    %c0_9 = arith.constant 0 : index
    %c0_10 = arith.constant 0 : index
    %15 = vector.load %arg3[%c0_9, %c0_10] : memref<16x96xf32, #tpu.memory_space<vmem>>, vector<16x96xf32>
    %cst_11 = arith.constant dense<0.000000e+00> : vector<16x32xf32>
    %16 = tpu.matmul %15, %14, %cst_11 {dimension_numbers = #tpu.dot_dimension_numbers<[1], [0], [0], [1], [0, 0, 1, 1], [], []>} : vector<16x96xf32>, vector<96x32xf32>, vector<16x32xf32> -> vector<16x32xf32>
    %c5 = arith.constant 5 : index
    %c0_12 = arith.constant 0 : index
    %c0_13 = arith.constant 0 : index
    %17 = vector.load %arg14[%c5, %c0_12, %c0_13] : memref<6x1x32xf32, #tpu.memory_space<vmem>>, vector<1x1x32xf32>
    %18 = vector.shape_cast %17 : vector<1x1x32xf32> to vector<1x32xf32>
    %19 = math.log %16 : vector<16x32xf32>
    %20 = vector.broadcast %18 : vector<1x32xf32> to vector<16x32xf32>
    %21 = arith.mulf %20, %19 : vector<16x32xf32>
    %22 = math.exp %21 : vector<16x32xf32>
    %c1 = arith.constant 1 : index
    %c0_14 = arith.constant 0 : index
    %c0_15 = arith.constant 0 : index
    %23 = vector.load %arg14[%c1, %c0_14, %c0_15] : memref<6x1x32xf32, #tpu.memory_space<vmem>>, vector<1x1x32xf32>
    %24 = vector.shape_cast %23 : vector<1x1x32xf32> to vector<1x32xf32>
    %25 = vector.broadcast %24 : vector<1x32xf32> to vector<16x32xf32>
    %26 = arith.mulf %22, %25 : vector<16x32xf32>
    %c2 = arith.constant 2 : index
    %c0_16 = arith.constant 0 : index
    %c0_17 = arith.constant 0 : index
    %27 = vector.load %arg14[%c2, %c0_16, %c0_17] : memref<6x1x32xf32, #tpu.memory_space<vmem>>, vector<1x1x32xf32>
    %28 = vector.shape_cast %27 : vector<1x1x32xf32> to vector<1x32xf32>
    %29 = vector.broadcast %28 : vector<1x32xf32> to vector<16x32xf32>
    %30 = arith.addf %26, %29 : vector<16x32xf32>
    %31 = arith.negf %30 : vector<16x32xf32>
    %32 = math.exp %31 : vector<16x32xf32>
    %cst_18 = arith.constant 1.000000e+00 : f32
    %33 = vector.broadcast %cst_18 : f32 to vector<16x32xf32>
    %34 = arith.addf %33, %32 : vector<16x32xf32>
    %35 = arith.divf %33, %34 : vector<16x32xf32>
    %36 = arith.mulf %30, %35 : vector<16x32xf32>
    %c3 = arith.constant 3 : index
    %c0_19 = arith.constant 0 : index
    %c0_20 = arith.constant 0 : index
    %37 = vector.load %arg14[%c3, %c0_19, %c0_20] : memref<6x1x32xf32, #tpu.memory_space<vmem>>, vector<1x1x32xf32>
    %38 = vector.shape_cast %37 : vector<1x1x32xf32> to vector<1x32xf32>
    %39 = vector.broadcast %38 : vector<1x32xf32> to vector<16x32xf32>
    %40 = arith.addf %36, %39 : vector<16x32xf32>
    %c0_21 = arith.constant 0 : index
    %c0_22 = arith.constant 0 : index
    %41 = vector.load %arg15[%c0_21, %c0_22] : memref<64x16xf32, #tpu.memory_space<vmem>>, vector<64x16xf32>
    %c0_23 = arith.constant 0 : index
    %c0_24 = arith.constant 0 : index
    %42 = vector.load %arg16[%c0_23, %c0_24] : memref<64x64xf32, #tpu.memory_space<vmem>>, vector<64x64xf32>
    %c0_25 = arith.constant 0 : index
    %c0_26 = arith.constant 0 : index
    %43 = vector.load %arg17[%c0_25, %c0_26] : memref<64x64xf32, #tpu.memory_space<vmem>>, vector<64x64xf32>
    %c0_27 = arith.constant 0 : index
    %c0_28 = arith.constant 0 : index
    %44 = vector.load %arg21[%c0_27, %c0_28] : memref<16x64xf32, #tpu.memory_space<vmem>>, vector<16x64xf32>
    %cst_29 = arith.constant dense<0.000000e+00> : vector<16xf32>
    %45 = vector.multi_reduction <add>, %40, %cst_29 [1] : vector<16x32xf32> to vector<16xf32>
    %46 = vector.shape_cast %45 : vector<16xf32> to vector<16x1xf32>
    %cst_30 = arith.constant 3.200000e+01 : f32
    %47 = vector.broadcast %cst_30 : f32 to vector<16x1xf32>
    %48 = arith.divf %46, %47 : vector<16x1xf32>
    %49 = vector.broadcast %48 : vector<16x1xf32> to vector<16x32xf32>
    %50 = arith.subf %40, %49 : vector<16x32xf32>
    %51 = arith.mulf %50, %50 : vector<16x32xf32>
    %cst_31 = arith.constant dense<0.000000e+00> : vector<16xf32>
    %52 = vector.multi_reduction <add>, %51, %cst_31 [1] : vector<16x32xf32> to vector<16xf32>
    %53 = vector.shape_cast %52 : vector<16xf32> to vector<16x1xf32>
    %cst_32 = arith.constant 3.200000e+01 : f32
    %54 = vector.broadcast %cst_32 : f32 to vector<16x1xf32>
    %55 = arith.divf %53, %54 : vector<16x1xf32>
    %56 = vector.broadcast %48 : vector<16x1xf32> to vector<16x32xf32>
    %57 = arith.subf %40, %56 : vector<16x32xf32>
    %cst_33 = arith.constant 9.99999974E-6 : f32
    %58 = vector.broadcast %cst_33 : f32 to vector<16x1xf32>
    %59 = arith.addf %55, %58 : vector<16x1xf32>
    %60 = math.rsqrt %59 : vector<16x1xf32>
    %61 = vector.broadcast %60 : vector<16x1xf32> to vector<16x32xf32>
    %62 = arith.mulf %57, %61 : vector<16x32xf32>
    %c0_34 = arith.constant 0 : index
    %c0_35 = arith.constant 0 : index
    %c0_36 = arith.constant 0 : index
    %63 = vector.load %arg12[%c0_34, %c0_35, %c0_36] : memref<10x1x32xf32, #tpu.memory_space<vmem>>, vector<1x1x32xf32>
    %64 = vector.shape_cast %63 : vector<1x1x32xf32> to vector<1x32xf32>
    %65 = vector.broadcast %64 : vector<1x32xf32> to vector<16x32xf32>
    %66 = arith.mulf %62, %65 : vector<16x32xf32>
    %c0_37 = arith.constant 0 : index
    %c0_38 = arith.constant 0 : index
    %c0_39 = arith.constant 0 : index
    %67 = vector.load %arg13[%c0_37, %c0_38, %c0_39] : memref<10x1x32xf32, #tpu.memory_space<vmem>>, vector<1x1x32xf32>
    %68 = vector.shape_cast %67 : vector<1x1x32xf32> to vector<1x32xf32>
    %69 = vector.broadcast %68 : vector<1x32xf32> to vector<16x32xf32>
    %70 = arith.addf %66, %69 : vector<16x32xf32>
    %c0_40 = arith.constant 0 : index
    %c0_41 = arith.constant 0 : index
    %c0_42 = arith.constant 0 : index
    %71 = vector.load %arg6[%c0_40, %c0_41, %c0_42] : memref<6x32x128xf32, #tpu.memory_space<vmem>>, vector<1x32x128xf32>
    %72 = vector.shape_cast %71 : vector<1x32x128xf32> to vector<32x128xf32>
    %c0_43 = arith.constant 0 : index
    %c0_44 = arith.constant 0 : index
    %c0_45 = arith.constant 0 : index
    %73 = vector.load %arg7[%c0_43, %c0_44, %c0_45] : memref<6x1x128xf32, #tpu.memory_space<vmem>>, vector<1x1x128xf32>
    %74 = vector.shape_cast %73 : vector<1x1x128xf32> to vector<1x128xf32>
    %75 = vector.extract_strided_slice %72 {offsets = [0, 0], sizes = [32, 96], strides = [1, 1]} : vector<32x128xf32> to vector<32x96xf32>
    %cst_46 = arith.constant dense<0.000000e+00> : vector<16x96xf32>
    %76 = tpu.matmul %70, %75, %cst_46 {dimension_numbers = #tpu.dot_dimension_numbers<[1], [0], [0], [1], [0, 0, 1, 1], [], []>} : vector<16x32xf32>, vector<32x96xf32>, vector<16x96xf32> -> vector<16x96xf32>
    %77 = vector.extract_strided_slice %74 {offsets = [0, 0], sizes = [1, 96], strides = [1, 1]} : vector<1x128xf32> to vector<1x96xf32>
    %78 = vector.broadcast %77 : vector<1x96xf32> to vector<16x96xf32>
    %79 = arith.addf %76, %78 : vector<16x96xf32>
    %80 = vector.extract_strided_slice %79 {offsets = [0, 0], sizes = [16, 32], strides = [1, 1]} : vector<16x96xf32> to vector<16x32xf32>
    %81 = vector.extract_strided_slice %79 {offsets = [0, 32], sizes = [16, 64], strides = [1, 1]} : vector<16x96xf32> to vector<16x64xf32>
    %cst_47 = arith.constant dense<0.000000e+00> : vector<64x64xf32>
    %82 = tpu.matmul %41, %81, %cst_47 {dimension_numbers = #tpu.dot_dimension_numbers<[1], [0], [0], [1], [0, 0, 1, 1], [], []>} : vector<64x16xf32>, vector<16x64xf32>, vector<64x64xf32> -> vector<64x64xf32>
    %83 = arith.mulf %82, %42 : vector<64x64xf32>
    %84 = vector.extract_strided_slice %83 {offsets = [0, 0], sizes = [64, 32], strides = [1, 1]} : vector<64x64xf32> to vector<64x32xf32>
    %cst_48 = arith.constant dense<0.000000e+00> : vector<16x64xf32>
    %85 = tpu.matmul %80, %84, %cst_48 {dimension_numbers = #tpu.dot_dimension_numbers<[1], [1], [0], [0], [0, 0, 1, 0], [], []>} : vector<16x32xf32>, vector<64x32xf32>, vector<16x64xf32> -> vector<16x64xf32>
    %86 = arith.addf %85, %44 : vector<16x64xf32>
    %cst_49 = arith.constant dense<0xFF800000> : vector<16xf32>
    %87 = vector.multi_reduction <maximumf>, %86, %cst_49 [1] : vector<16x64xf32> to vector<16xf32>
    %88 = vector.shape_cast %87 : vector<16xf32> to vector<16x1xf32>
    %89 = vector.broadcast %88 : vector<16x1xf32> to vector<16x64xf32>
    %90 = arith.subf %86, %89 : vector<16x64xf32>
    %91 = math.exp %90 : vector<16x64xf32>
    %cst_50 = arith.constant dense<0.000000e+00> : vector<16x64xf32>
    %92 = tpu.matmul %91, %43, %cst_50 {dimension_numbers = #tpu.dot_dimension_numbers<[1], [0], [0], [1], [0, 0, 1, 1], [], []>} : vector<16x64xf32>, vector<64x64xf32>, vector<16x64xf32> -> vector<16x64xf32>
    %93 = tpu.reciprocal %92 {approx = true} : vector<16x64xf32> -> vector<16x64xf32>
    %94 = arith.mulf %91, %93 : vector<16x64xf32>
    %95 = vector.extract_strided_slice %83 {offsets = [0, 32], sizes = [64, 32], strides = [1, 1]} : vector<64x64xf32> to vector<64x32xf32>
    %cst_51 = arith.constant dense<0.000000e+00> : vector<16x32xf32>
    %96 = tpu.matmul %94, %95, %cst_51 {dimension_numbers = #tpu.dot_dimension_numbers<[1], [0], [0], [1], [0, 0, 1, 1], [], []>} : vector<16x64xf32>, vector<64x32xf32>, vector<16x32xf32> -> vector<16x32xf32>
    %97 = vector.extract_strided_slice %72 {offsets = [0, 96], sizes = [32, 32], strides = [1, 1]} : vector<32x128xf32> to vector<32x32xf32>
    %cst_52 = arith.constant dense<0.000000e+00> : vector<16x32xf32>
    %98 = tpu.matmul %96, %97, %cst_52 {dimension_numbers = #tpu.dot_dimension_numbers<[1], [0], [0], [1], [0, 0, 1, 1], [], []>} : vector<16x32xf32>, vector<32x32xf32>, vector<16x32xf32> -> vector<16x32xf32>
    %99 = vector.extract_strided_slice %74 {offsets = [0, 96], sizes = [1, 32], strides = [1, 1]} : vector<1x128xf32> to vector<1x32xf32>
    %100 = vector.broadcast %99 : vector<1x32xf32> to vector<16x32xf32>
    %101 = arith.addf %98, %100 : vector<16x32xf32>
    %102 = arith.addf %40, %101 : vector<16x32xf32>
    %cst_53 = arith.constant dense<0.000000e+00> : vector<16xf32>
    %103 = vector.multi_reduction <add>, %102, %cst_53 [1] : vector<16x32xf32> to vector<16xf32>
    %104 = vector.shape_cast %103 : vector<16xf32> to vector<16x1xf32>
    %cst_54 = arith.constant 3.200000e+01 : f32
    %105 = vector.broadcast %cst_54 : f32 to vector<16x1xf32>
    %106 = arith.divf %104, %105 : vector<16x1xf32>
    %107 = vector.broadcast %106 : vector<16x1xf32> to vector<16x32xf32>
    %108 = arith.subf %102, %107 : vector<16x32xf32>
    %109 = arith.mulf %108, %108 : vector<16x32xf32>
    %cst_55 = arith.constant dense<0.000000e+00> : vector<16xf32>
    %110 = vector.multi_reduction <add>, %109, %cst_55 [1] : vector<16x32xf32> to vector<16xf32>
    %111 = vector.shape_cast %110 : vector<16xf32> to vector<16x1xf32>
    %cst_56 = arith.constant 3.200000e+01 : f32
    %112 = vector.broadcast %cst_56 : f32 to vector<16x1xf32>
    %113 = arith.divf %111, %112 : vector<16x1xf32>
    %114 = vector.broadcast %106 : vector<16x1xf32> to vector<16x32xf32>
    %115 = arith.subf %102, %114 : vector<16x32xf32>
    %cst_57 = arith.constant 9.99999974E-6 : f32
    %116 = vector.broadcast %cst_57 : f32 to vector<16x1xf32>
    %117 = arith.addf %113, %116 : vector<16x1xf32>
    %118 = math.rsqrt %117 : vector<16x1xf32>
    %119 = vector.broadcast %118 : vector<16x1xf32> to vector<16x32xf32>
    %120 = arith.mulf %115, %119 : vector<16x32xf32>
    %c1_58 = arith.constant 1 : index
    %c0_59 = arith.constant 0 : index
    %c0_60 = arith.constant 0 : index
    %121 = vector.load %arg12[%c1_58, %c0_59, %c0_60] : memref<10x1x32xf32, #tpu.memory_space<vmem>>, vector<1x1x32xf32>
    %122 = vector.shape_cast %121 : vector<1x1x32xf32> to vector<1x32xf32>
    %123 = vector.broadcast %122 : vector<1x32xf32> to vector<16x32xf32>
    %124 = arith.mulf %120, %123 : vector<16x32xf32>
    %c1_61 = arith.constant 1 : index
    %c0_62 = arith.constant 0 : index
    %c0_63 = arith.constant 0 : index
    %125 = vector.load %arg13[%c1_61, %c0_62, %c0_63] : memref<10x1x32xf32, #tpu.memory_space<vmem>>, vector<1x1x32xf32>
    %126 = vector.shape_cast %125 : vector<1x1x32xf32> to vector<1x32xf32>
    %127 = vector.broadcast %126 : vector<1x32xf32> to vector<16x32xf32>
    %128 = arith.addf %124, %127 : vector<16x32xf32>
    %c0_64 = arith.constant 0 : index
    %c0_65 = arith.constant 0 : index
    %c0_66 = arith.constant 0 : index
    %129 = vector.load %arg8[%c0_64, %c0_65, %c0_66] : memref<4x32x128xf32, #tpu.memory_space<vmem>>, vector<1x32x128xf32>
    %130 = vector.shape_cast %129 : vector<1x32x128xf32> to vector<32x128xf32>
    %cst_67 = arith.constant dense<0.000000e+00> : vector<16x128xf32>
    %131 = tpu.matmul %128, %130, %cst_67 {dimension_numbers = #tpu.dot_dimension_numbers<[1], [0], [0], [1], [0, 0, 1, 1], [], []>} : vector<16x32xf32>, vector<32x128xf32>, vector<16x128xf32> -> vector<16x128xf32>
    %c0_68 = arith.constant 0 : index
    %c0_69 = arith.constant 0 : index
    %c0_70 = arith.constant 0 : index
    %132 = vector.load %arg9[%c0_68, %c0_69, %c0_70] : memref<4x1x128xf32, #tpu.memory_space<vmem>>, vector<1x1x128xf32>
    %133 = vector.shape_cast %132 : vector<1x1x128xf32> to vector<1x128xf32>
    %134 = vector.broadcast %133 : vector<1x128xf32> to vector<16x128xf32>
    %135 = arith.addf %131, %134 : vector<16x128xf32>
    %cst_71 = arith.constant 5.000000e-01 : f32
    %136 = vector.broadcast %cst_71 : f32 to vector<16x128xf32>
    %137 = arith.mulf %136, %135 : vector<16x128xf32>
    %cst_72 = arith.constant 4.471500e-02 : f32
    %138 = vector.broadcast %cst_72 : f32 to vector<16x128xf32>
    %139 = arith.mulf %138, %135 : vector<16x128xf32>
    %140 = arith.mulf %139, %135 : vector<16x128xf32>
    %141 = arith.mulf %140, %135 : vector<16x128xf32>
    %142 = arith.addf %135, %141 : vector<16x128xf32>
    %cst_73 = arith.constant 0.797884583 : f32
    %143 = vector.broadcast %cst_73 : f32 to vector<16x128xf32>
    %144 = arith.mulf %143, %142 : vector<16x128xf32>
    %145 = math.tanh %144 : vector<16x128xf32>
    %cst_74 = arith.constant 1.000000e+00 : f32
    %146 = vector.broadcast %cst_74 : f32 to vector<16x128xf32>
    %147 = arith.addf %146, %145 : vector<16x128xf32>
    %148 = arith.mulf %137, %147 : vector<16x128xf32>
    %c0_75 = arith.constant 0 : index
    %c0_76 = arith.constant 0 : index
    %c0_77 = arith.constant 0 : index
    %149 = vector.load %arg10[%c0_75, %c0_76, %c0_77] : memref<4x128x32xf32, #tpu.memory_space<vmem>>, vector<1x128x32xf32>
    %150 = vector.shape_cast %149 : vector<1x128x32xf32> to vector<128x32xf32>
    %cst_78 = arith.constant dense<0.000000e+00> : vector<16x32xf32>
    %151 = tpu.matmul %148, %150, %cst_78 {dimension_numbers = #tpu.dot_dimension_numbers<[1], [0], [0], [1], [0, 0, 1, 1], [], []>} : vector<16x128xf32>, vector<128x32xf32>, vector<16x32xf32> -> vector<16x32xf32>
    %c0_79 = arith.constant 0 : index
    %c0_80 = arith.constant 0 : index
    %c0_81 = arith.constant 0 : index
    %152 = vector.load %arg11[%c0_79, %c0_80, %c0_81] : memref<4x1x32xf32, #tpu.memory_space<vmem>>, vector<1x1x32xf32>
    %153 = vector.shape_cast %152 : vector<1x1x32xf32> to vector<1x32xf32>
    %154 = vector.broadcast %153 : vector<1x32xf32> to vector<16x32xf32>
    %155 = arith.addf %151, %154 : vector<16x32xf32>
    %156 = arith.addf %102, %155 : vector<16x32xf32>
    %cst_82 = arith.constant dense<0.000000e+00> : vector<16xf32>
    %157 = vector.multi_reduction <add>, %156, %cst_82 [1] : vector<16x32xf32> to vector<16xf32>
    %158 = vector.shape_cast %157 : vector<16xf32> to vector<16x1xf32>
    %cst_83 = arith.constant 3.200000e+01 : f32
    %159 = vector.broadcast %cst_83 : f32 to vector<16x1xf32>
    %160 = arith.divf %158, %159 : vector<16x1xf32>
    %161 = vector.broadcast %160 : vector<16x1xf32> to vector<16x32xf32>
    %162 = arith.subf %156, %161 : vector<16x32xf32>
    %163 = arith.mulf %162, %162 : vector<16x32xf32>
    %cst_84 = arith.constant dense<0.000000e+00> : vector<16xf32>
    %164 = vector.multi_reduction <add>, %163, %cst_84 [1] : vector<16x32xf32> to vector<16xf32>
    %165 = vector.shape_cast %164 : vector<16xf32> to vector<16x1xf32>
    %cst_85 = arith.constant 3.200000e+01 : f32
    %166 = vector.broadcast %cst_85 : f32 to vector<16x1xf32>
    %167 = arith.divf %165, %166 : vector<16x1xf32>
    %168 = vector.broadcast %160 : vector<16x1xf32> to vector<16x32xf32>
    %169 = arith.subf %156, %168 : vector<16x32xf32>
    %cst_86 = arith.constant 9.99999974E-6 : f32
    %170 = vector.broadcast %cst_86 : f32 to vector<16x1xf32>
    %171 = arith.addf %167, %170 : vector<16x1xf32>
    %172 = math.rsqrt %171 : vector<16x1xf32>
    %173 = vector.broadcast %172 : vector<16x1xf32> to vector<16x32xf32>
    %174 = arith.mulf %169, %173 : vector<16x32xf32>
    %c2_87 = arith.constant 2 : index
    %c0_88 = arith.constant 0 : index
    %c0_89 = arith.constant 0 : index
    %175 = vector.load %arg12[%c2_87, %c0_88, %c0_89] : memref<10x1x32xf32, #tpu.memory_space<vmem>>, vector<1x1x32xf32>
    %176 = vector.shape_cast %175 : vector<1x1x32xf32> to vector<1x32xf32>
    %177 = vector.broadcast %176 : vector<1x32xf32> to vector<16x32xf32>
    %178 = arith.mulf %174, %177 : vector<16x32xf32>
    %c2_90 = arith.constant 2 : index
    %c0_91 = arith.constant 0 : index
    %c0_92 = arith.constant 0 : index
    %179 = vector.load %arg13[%c2_90, %c0_91, %c0_92] : memref<10x1x32xf32, #tpu.memory_space<vmem>>, vector<1x1x32xf32>
    %180 = vector.shape_cast %179 : vector<1x1x32xf32> to vector<1x32xf32>
    %181 = vector.broadcast %180 : vector<1x32xf32> to vector<16x32xf32>
    %182 = arith.addf %178, %181 : vector<16x32xf32>
    %c1_93 = arith.constant 1 : index
    %c0_94 = arith.constant 0 : index
    %c0_95 = arith.constant 0 : index
    %183 = vector.load %arg6[%c1_93, %c0_94, %c0_95] : memref<6x32x128xf32, #tpu.memory_space<vmem>>, vector<1x32x128xf32>
    %184 = vector.shape_cast %183 : vector<1x32x128xf32> to vector<32x128xf32>
    %c1_96 = arith.constant 1 : index
    %c0_97 = arith.constant 0 : index
    %c0_98 = arith.constant 0 : index
    %185 = vector.load %arg7[%c1_96, %c0_97, %c0_98] : memref<6x1x128xf32, #tpu.memory_space<vmem>>, vector<1x1x128xf32>
    %186 = vector.shape_cast %185 : vector<1x1x128xf32> to vector<1x128xf32>
    %187 = vector.extract_strided_slice %184 {offsets = [0, 0], sizes = [32, 96], strides = [1, 1]} : vector<32x128xf32> to vector<32x96xf32>
    %cst_99 = arith.constant dense<0.000000e+00> : vector<16x96xf32>
    %188 = tpu.matmul %182, %187, %cst_99 {dimension_numbers = #tpu.dot_dimension_numbers<[1], [0], [0], [1], [0, 0, 1, 1], [], []>} : vector<16x32xf32>, vector<32x96xf32>, vector<16x96xf32> -> vector<16x96xf32>
    %189 = vector.extract_strided_slice %186 {offsets = [0, 0], sizes = [1, 96], strides = [1, 1]} : vector<1x128xf32> to vector<1x96xf32>
    %190 = vector.broadcast %189 : vector<1x96xf32> to vector<16x96xf32>
    %191 = arith.addf %188, %190 : vector<16x96xf32>
    %192 = vector.extract_strided_slice %191 {offsets = [0, 0], sizes = [16, 32], strides = [1, 1]} : vector<16x96xf32> to vector<16x32xf32>
    %193 = vector.extract_strided_slice %191 {offsets = [0, 32], sizes = [16, 64], strides = [1, 1]} : vector<16x96xf32> to vector<16x64xf32>
    %cst_100 = arith.constant dense<0.000000e+00> : vector<64x64xf32>
    %194 = tpu.matmul %41, %193, %cst_100 {dimension_numbers = #tpu.dot_dimension_numbers<[1], [0], [0], [1], [0, 0, 1, 1], [], []>} : vector<64x16xf32>, vector<16x64xf32>, vector<64x64xf32> -> vector<64x64xf32>
    %195 = arith.mulf %194, %42 : vector<64x64xf32>
    %196 = vector.extract_strided_slice %195 {offsets = [0, 0], sizes = [64, 32], strides = [1, 1]} : vector<64x64xf32> to vector<64x32xf32>
    %cst_101 = arith.constant dense<0.000000e+00> : vector<16x64xf32>
    %197 = tpu.matmul %192, %196, %cst_101 {dimension_numbers = #tpu.dot_dimension_numbers<[1], [1], [0], [0], [0, 0, 1, 0], [], []>} : vector<16x32xf32>, vector<64x32xf32>, vector<16x64xf32> -> vector<16x64xf32>
    %198 = arith.addf %197, %44 : vector<16x64xf32>
    %cst_102 = arith.constant dense<0xFF800000> : vector<16xf32>
    %199 = vector.multi_reduction <maximumf>, %198, %cst_102 [1] : vector<16x64xf32> to vector<16xf32>
    %200 = vector.shape_cast %199 : vector<16xf32> to vector<16x1xf32>
    %201 = vector.broadcast %200 : vector<16x1xf32> to vector<16x64xf32>
    %202 = arith.subf %198, %201 : vector<16x64xf32>
    %203 = math.exp %202 : vector<16x64xf32>
    %cst_103 = arith.constant dense<0.000000e+00> : vector<16x64xf32>
    %204 = tpu.matmul %203, %43, %cst_103 {dimension_numbers = #tpu.dot_dimension_numbers<[1], [0], [0], [1], [0, 0, 1, 1], [], []>} : vector<16x64xf32>, vector<64x64xf32>, vector<16x64xf32> -> vector<16x64xf32>
    %205 = tpu.reciprocal %204 {approx = true} : vector<16x64xf32> -> vector<16x64xf32>
    %206 = arith.mulf %203, %205 : vector<16x64xf32>
    %207 = vector.extract_strided_slice %195 {offsets = [0, 32], sizes = [64, 32], strides = [1, 1]} : vector<64x64xf32> to vector<64x32xf32>
    %cst_104 = arith.constant dense<0.000000e+00> : vector<16x32xf32>
    %208 = tpu.matmul %206, %207, %cst_104 {dimension_numbers = #tpu.dot_dimension_numbers<[1], [0], [0], [1], [0, 0, 1, 1], [], []>} : vector<16x64xf32>, vector<64x32xf32>, vector<16x32xf32> -> vector<16x32xf32>
    %209 = vector.extract_strided_slice %184 {offsets = [0, 96], sizes = [32, 32], strides = [1, 1]} : vector<32x128xf32> to vector<32x32xf32>
    %cst_105 = arith.constant dense<0.000000e+00> : vector<16x32xf32>
    %210 = tpu.matmul %208, %209, %cst_105 {dimension_numbers = #tpu.dot_dimension_numbers<[1], [0], [0], [1], [0, 0, 1, 1], [], []>} : vector<16x32xf32>, vector<32x32xf32>, vector<16x32xf32> -> vector<16x32xf32>
    %211 = vector.extract_strided_slice %186 {offsets = [0, 96], sizes = [1, 32], strides = [1, 1]} : vector<1x128xf32> to vector<1x32xf32>
    %212 = vector.broadcast %211 : vector<1x32xf32> to vector<16x32xf32>
    %213 = arith.addf %210, %212 : vector<16x32xf32>
    %214 = arith.addf %156, %213 : vector<16x32xf32>
    %cst_106 = arith.constant dense<0.000000e+00> : vector<16xf32>
    %215 = vector.multi_reduction <add>, %214, %cst_106 [1] : vector<16x32xf32> to vector<16xf32>
    %216 = vector.shape_cast %215 : vector<16xf32> to vector<16x1xf32>
    %cst_107 = arith.constant 3.200000e+01 : f32
    %217 = vector.broadcast %cst_107 : f32 to vector<16x1xf32>
    %218 = arith.divf %216, %217 : vector<16x1xf32>
    %219 = vector.broadcast %218 : vector<16x1xf32> to vector<16x32xf32>
    %220 = arith.subf %214, %219 : vector<16x32xf32>
    %221 = arith.mulf %220, %220 : vector<16x32xf32>
    %cst_108 = arith.constant dense<0.000000e+00> : vector<16xf32>
    %222 = vector.multi_reduction <add>, %221, %cst_108 [1] : vector<16x32xf32> to vector<16xf32>
    %223 = vector.shape_cast %222 : vector<16xf32> to vector<16x1xf32>
    %cst_109 = arith.constant 3.200000e+01 : f32
    %224 = vector.broadcast %cst_109 : f32 to vector<16x1xf32>
    %225 = arith.divf %223, %224 : vector<16x1xf32>
    %226 = vector.broadcast %218 : vector<16x1xf32> to vector<16x32xf32>
    %227 = arith.subf %214, %226 : vector<16x32xf32>
    %cst_110 = arith.constant 9.99999974E-6 : f32
    %228 = vector.broadcast %cst_110 : f32 to vector<16x1xf32>
    %229 = arith.addf %225, %228 : vector<16x1xf32>
    %230 = math.rsqrt %229 : vector<16x1xf32>
    %231 = vector.broadcast %230 : vector<16x1xf32> to vector<16x32xf32>
    %232 = arith.mulf %227, %231 : vector<16x32xf32>
    %c3_111 = arith.constant 3 : index
    %c0_112 = arith.constant 0 : index
    %c0_113 = arith.constant 0 : index
    %233 = vector.load %arg12[%c3_111, %c0_112, %c0_113] : memref<10x1x32xf32, #tpu.memory_space<vmem>>, vector<1x1x32xf32>
    %234 = vector.shape_cast %233 : vector<1x1x32xf32> to vector<1x32xf32>
    %235 = vector.broadcast %234 : vector<1x32xf32> to vector<16x32xf32>
    %236 = arith.mulf %232, %235 : vector<16x32xf32>
    %c3_114 = arith.constant 3 : index
    %c0_115 = arith.constant 0 : index
    %c0_116 = arith.constant 0 : index
    %237 = vector.load %arg13[%c3_114, %c0_115, %c0_116] : memref<10x1x32xf32, #tpu.memory_space<vmem>>, vector<1x1x32xf32>
    %238 = vector.shape_cast %237 : vector<1x1x32xf32> to vector<1x32xf32>
    %239 = vector.broadcast %238 : vector<1x32xf32> to vector<16x32xf32>
    %240 = arith.addf %236, %239 : vector<16x32xf32>
    %c1_117 = arith.constant 1 : index
    %c0_118 = arith.constant 0 : index
    %c0_119 = arith.constant 0 : index
    %241 = vector.load %arg8[%c1_117, %c0_118, %c0_119] : memref<4x32x128xf32, #tpu.memory_space<vmem>>, vector<1x32x128xf32>
    %242 = vector.shape_cast %241 : vector<1x32x128xf32> to vector<32x128xf32>
    %cst_120 = arith.constant dense<0.000000e+00> : vector<16x128xf32>
    %243 = tpu.matmul %240, %242, %cst_120 {dimension_numbers = #tpu.dot_dimension_numbers<[1], [0], [0], [1], [0, 0, 1, 1], [], []>} : vector<16x32xf32>, vector<32x128xf32>, vector<16x128xf32> -> vector<16x128xf32>
    %c1_121 = arith.constant 1 : index
    %c0_122 = arith.constant 0 : index
    %c0_123 = arith.constant 0 : index
    %244 = vector.load %arg9[%c1_121, %c0_122, %c0_123] : memref<4x1x128xf32, #tpu.memory_space<vmem>>, vector<1x1x128xf32>
    %245 = vector.shape_cast %244 : vector<1x1x128xf32> to vector<1x128xf32>
    %246 = vector.broadcast %245 : vector<1x128xf32> to vector<16x128xf32>
    %247 = arith.addf %243, %246 : vector<16x128xf32>
    %cst_124 = arith.constant 5.000000e-01 : f32
    %248 = vector.broadcast %cst_124 : f32 to vector<16x128xf32>
    %249 = arith.mulf %248, %247 : vector<16x128xf32>
    %cst_125 = arith.constant 4.471500e-02 : f32
    %250 = vector.broadcast %cst_125 : f32 to vector<16x128xf32>
    %251 = arith.mulf %250, %247 : vector<16x128xf32>
    %252 = arith.mulf %251, %247 : vector<16x128xf32>
    %253 = arith.mulf %252, %247 : vector<16x128xf32>
    %254 = arith.addf %247, %253 : vector<16x128xf32>
    %cst_126 = arith.constant 0.797884583 : f32
    %255 = vector.broadcast %cst_126 : f32 to vector<16x128xf32>
    %256 = arith.mulf %255, %254 : vector<16x128xf32>
    %257 = math.tanh %256 : vector<16x128xf32>
    %cst_127 = arith.constant 1.000000e+00 : f32
    %258 = vector.broadcast %cst_127 : f32 to vector<16x128xf32>
    %259 = arith.addf %258, %257 : vector<16x128xf32>
    %260 = arith.mulf %249, %259 : vector<16x128xf32>
    %c1_128 = arith.constant 1 : index
    %c0_129 = arith.constant 0 : index
    %c0_130 = arith.constant 0 : index
    %261 = vector.load %arg10[%c1_128, %c0_129, %c0_130] : memref<4x128x32xf32, #tpu.memory_space<vmem>>, vector<1x128x32xf32>
    %262 = vector.shape_cast %261 : vector<1x128x32xf32> to vector<128x32xf32>
    %cst_131 = arith.constant dense<0.000000e+00> : vector<16x32xf32>
    %263 = tpu.matmul %260, %262, %cst_131 {dimension_numbers = #tpu.dot_dimension_numbers<[1], [0], [0], [1], [0, 0, 1, 1], [], []>} : vector<16x128xf32>, vector<128x32xf32>, vector<16x32xf32> -> vector<16x32xf32>
    %c1_132 = arith.constant 1 : index
    %c0_133 = arith.constant 0 : index
    %c0_134 = arith.constant 0 : index
    %264 = vector.load %arg11[%c1_132, %c0_133, %c0_134] : memref<4x1x32xf32, #tpu.memory_space<vmem>>, vector<1x1x32xf32>
    %265 = vector.shape_cast %264 : vector<1x1x32xf32> to vector<1x32xf32>
    %266 = vector.broadcast %265 : vector<1x32xf32> to vector<16x32xf32>
    %267 = arith.addf %263, %266 : vector<16x32xf32>
    %268 = arith.addf %214, %267 : vector<16x32xf32>
    %cst_135 = arith.constant dense<0.000000e+00> : vector<16xf32>
    %269 = vector.multi_reduction <add>, %268, %cst_135 [1] : vector<16x32xf32> to vector<16xf32>
    %270 = vector.shape_cast %269 : vector<16xf32> to vector<16x1xf32>
    %cst_136 = arith.constant 3.200000e+01 : f32
    %271 = vector.broadcast %cst_136 : f32 to vector<16x1xf32>
    %272 = arith.divf %270, %271 : vector<16x1xf32>
    %273 = vector.broadcast %272 : vector<16x1xf32> to vector<16x32xf32>
    %274 = arith.subf %268, %273 : vector<16x32xf32>
    %275 = arith.mulf %274, %274 : vector<16x32xf32>
    %cst_137 = arith.constant dense<0.000000e+00> : vector<16xf32>
    %276 = vector.multi_reduction <add>, %275, %cst_137 [1] : vector<16x32xf32> to vector<16xf32>
    %277 = vector.shape_cast %276 : vector<16xf32> to vector<16x1xf32>
    %cst_138 = arith.constant 3.200000e+01 : f32
    %278 = vector.broadcast %cst_138 : f32 to vector<16x1xf32>
    %279 = arith.divf %277, %278 : vector<16x1xf32>
    %280 = vector.broadcast %272 : vector<16x1xf32> to vector<16x32xf32>
    %281 = arith.subf %268, %280 : vector<16x32xf32>
    %cst_139 = arith.constant 9.99999974E-6 : f32
    %282 = vector.broadcast %cst_139 : f32 to vector<16x1xf32>
    %283 = arith.addf %279, %282 : vector<16x1xf32>
    %284 = math.rsqrt %283 : vector<16x1xf32>
    %285 = vector.broadcast %284 : vector<16x1xf32> to vector<16x32xf32>
    %286 = arith.mulf %281, %285 : vector<16x32xf32>
    %c4_140 = arith.constant 4 : index
    %c0_141 = arith.constant 0 : index
    %c0_142 = arith.constant 0 : index
    %287 = vector.load %arg12[%c4_140, %c0_141, %c0_142] : memref<10x1x32xf32, #tpu.memory_space<vmem>>, vector<1x1x32xf32>
    %288 = vector.shape_cast %287 : vector<1x1x32xf32> to vector<1x32xf32>
    %289 = vector.broadcast %288 : vector<1x32xf32> to vector<16x32xf32>
    %290 = arith.mulf %286, %289 : vector<16x32xf32>
    %c4_143 = arith.constant 4 : index
    %c0_144 = arith.constant 0 : index
    %c0_145 = arith.constant 0 : index
    %291 = vector.load %arg13[%c4_143, %c0_144, %c0_145] : memref<10x1x32xf32, #tpu.memory_space<vmem>>, vector<1x1x32xf32>
    %292 = vector.shape_cast %291 : vector<1x1x32xf32> to vector<1x32xf32>
    %293 = vector.broadcast %292 : vector<1x32xf32> to vector<16x32xf32>
    %294 = arith.addf %290, %293 : vector<16x32xf32>
    %c0_146 = arith.constant 0 : index
    %c0_147 = arith.constant 0 : index
    %295 = vector.load %arg18[%c0_146, %c0_147] : memref<64x16xf32, #tpu.memory_space<vmem>>, vector<64x16xf32>
    %c0_148 = arith.constant 0 : index
    %c0_149 = arith.constant 0 : index
    %296 = vector.load %arg19[%c0_148, %c0_149] : memref<64x64xf32, #tpu.memory_space<vmem>>, vector<64x64xf32>
    %c0_150 = arith.constant 0 : index
    %c0_151 = arith.constant 0 : index
    %297 = vector.load %arg20[%c0_150, %c0_151] : memref<64x64xf32, #tpu.memory_space<vmem>>, vector<64x64xf32>
    %c0_152 = arith.constant 0 : index
    %c0_153 = arith.constant 0 : index
    %298 = vector.load %arg22[%c0_152, %c0_153] : memref<16x64xf32, #tpu.memory_space<vmem>>, vector<16x64xf32>
    %c0_154 = arith.constant 0 : index
    %c0_155 = arith.constant 0 : index
    %299 = vector.load %arg23[%c0_154, %c0_155] : memref<16x64xf32, #tpu.memory_space<vmem>>, vector<16x64xf32>
    %c0_156 = arith.constant 0 : index
    %c0_157 = arith.constant 0 : index
    %300 = vector.load %arg4[%c0_156, %c0_157] : memref<16x32xf32, #tpu.memory_space<vmem>>, vector<16x32xf32>
    %cst_158 = arith.constant dense<0.000000e+00> : vector<16xf32>
    %301 = vector.multi_reduction <add>, %300, %cst_158 [1] : vector<16x32xf32> to vector<16xf32>
    %302 = vector.shape_cast %301 : vector<16xf32> to vector<16x1xf32>
    %cst_159 = arith.constant 3.200000e+01 : f32
    %303 = vector.broadcast %cst_159 : f32 to vector<16x1xf32>
    %304 = arith.divf %302, %303 : vector<16x1xf32>
    %305 = vector.broadcast %304 : vector<16x1xf32> to vector<16x32xf32>
    %306 = arith.subf %300, %305 : vector<16x32xf32>
    %307 = arith.mulf %306, %306 : vector<16x32xf32>
    %cst_160 = arith.constant dense<0.000000e+00> : vector<16xf32>
    %308 = vector.multi_reduction <add>, %307, %cst_160 [1] : vector<16x32xf32> to vector<16xf32>
    %309 = vector.shape_cast %308 : vector<16xf32> to vector<16x1xf32>
    %cst_161 = arith.constant 3.200000e+01 : f32
    %310 = vector.broadcast %cst_161 : f32 to vector<16x1xf32>
    %311 = arith.divf %309, %310 : vector<16x1xf32>
    %312 = vector.broadcast %304 : vector<16x1xf32> to vector<16x32xf32>
    %313 = arith.subf %300, %312 : vector<16x32xf32>
    %cst_162 = arith.constant 9.99999974E-6 : f32
    %314 = vector.broadcast %cst_162 : f32 to vector<16x1xf32>
    %315 = arith.addf %311, %314 : vector<16x1xf32>
    %316 = math.rsqrt %315 : vector<16x1xf32>
    %317 = vector.broadcast %316 : vector<16x1xf32> to vector<16x32xf32>
    %318 = arith.mulf %313, %317 : vector<16x32xf32>
    %c5_163 = arith.constant 5 : index
    %c0_164 = arith.constant 0 : index
    %c0_165 = arith.constant 0 : index
    %319 = vector.load %arg12[%c5_163, %c0_164, %c0_165] : memref<10x1x32xf32, #tpu.memory_space<vmem>>, vector<1x1x32xf32>
    %320 = vector.shape_cast %319 : vector<1x1x32xf32> to vector<1x32xf32>
    %321 = vector.broadcast %320 : vector<1x32xf32> to vector<16x32xf32>
    %322 = arith.mulf %318, %321 : vector<16x32xf32>
    %c5_166 = arith.constant 5 : index
    %c0_167 = arith.constant 0 : index
    %c0_168 = arith.constant 0 : index
    %323 = vector.load %arg13[%c5_166, %c0_167, %c0_168] : memref<10x1x32xf32, #tpu.memory_space<vmem>>, vector<1x1x32xf32>
    %324 = vector.shape_cast %323 : vector<1x1x32xf32> to vector<1x32xf32>
    %325 = vector.broadcast %324 : vector<1x32xf32> to vector<16x32xf32>
    %326 = arith.addf %322, %325 : vector<16x32xf32>
    %c2_169 = arith.constant 2 : index
    %c0_170 = arith.constant 0 : index
    %c0_171 = arith.constant 0 : index
    %327 = vector.load %arg6[%c2_169, %c0_170, %c0_171] : memref<6x32x128xf32, #tpu.memory_space<vmem>>, vector<1x32x128xf32>
    %328 = vector.shape_cast %327 : vector<1x32x128xf32> to vector<32x128xf32>
    %c2_172 = arith.constant 2 : index
    %c0_173 = arith.constant 0 : index
    %c0_174 = arith.constant 0 : index
    %329 = vector.load %arg7[%c2_172, %c0_173, %c0_174] : memref<6x1x128xf32, #tpu.memory_space<vmem>>, vector<1x1x128xf32>
    %330 = vector.shape_cast %329 : vector<1x1x128xf32> to vector<1x128xf32>
    %331 = vector.extract_strided_slice %328 {offsets = [0, 0], sizes = [32, 96], strides = [1, 1]} : vector<32x128xf32> to vector<32x96xf32>
    %cst_175 = arith.constant dense<0.000000e+00> : vector<16x96xf32>
    %332 = tpu.matmul %326, %331, %cst_175 {dimension_numbers = #tpu.dot_dimension_numbers<[1], [0], [0], [1], [0, 0, 1, 1], [], []>} : vector<16x32xf32>, vector<32x96xf32>, vector<16x96xf32> -> vector<16x96xf32>
    %333 = vector.extract_strided_slice %330 {offsets = [0, 0], sizes = [1, 96], strides = [1, 1]} : vector<1x128xf32> to vector<1x96xf32>
    %334 = vector.broadcast %333 : vector<1x96xf32> to vector<16x96xf32>
    %335 = arith.addf %332, %334 : vector<16x96xf32>
    %336 = vector.extract_strided_slice %335 {offsets = [0, 0], sizes = [16, 32], strides = [1, 1]} : vector<16x96xf32> to vector<16x32xf32>
    %337 = vector.extract_strided_slice %335 {offsets = [0, 32], sizes = [16, 64], strides = [1, 1]} : vector<16x96xf32> to vector<16x64xf32>
    %cst_176 = arith.constant dense<0.000000e+00> : vector<64x64xf32>
    %338 = tpu.matmul %295, %337, %cst_176 {dimension_numbers = #tpu.dot_dimension_numbers<[1], [0], [0], [1], [0, 0, 1, 1], [], []>} : vector<64x16xf32>, vector<16x64xf32>, vector<64x64xf32> -> vector<64x64xf32>
    %339 = arith.mulf %338, %296 : vector<64x64xf32>
    %340 = vector.extract_strided_slice %339 {offsets = [0, 0], sizes = [64, 32], strides = [1, 1]} : vector<64x64xf32> to vector<64x32xf32>
    %cst_177 = arith.constant dense<0.000000e+00> : vector<16x64xf32>
    %341 = tpu.matmul %336, %340, %cst_177 {dimension_numbers = #tpu.dot_dimension_numbers<[1], [1], [0], [0], [0, 0, 1, 0], [], []>} : vector<16x32xf32>, vector<64x32xf32>, vector<16x64xf32> -> vector<16x64xf32>
    %342 = arith.addf %341, %298 : vector<16x64xf32>
    %cst_178 = arith.constant dense<0xFF800000> : vector<16xf32>
    %343 = vector.multi_reduction <maximumf>, %342, %cst_178 [1] : vector<16x64xf32> to vector<16xf32>
    %344 = vector.shape_cast %343 : vector<16xf32> to vector<16x1xf32>
    %345 = vector.broadcast %344 : vector<16x1xf32> to vector<16x64xf32>
    %346 = arith.subf %342, %345 : vector<16x64xf32>
    %347 = math.exp %346 : vector<16x64xf32>
    %cst_179 = arith.constant dense<0.000000e+00> : vector<16x64xf32>
    %348 = tpu.matmul %347, %297, %cst_179 {dimension_numbers = #tpu.dot_dimension_numbers<[1], [0], [0], [1], [0, 0, 1, 1], [], []>} : vector<16x64xf32>, vector<64x64xf32>, vector<16x64xf32> -> vector<16x64xf32>
    %349 = tpu.reciprocal %348 {approx = true} : vector<16x64xf32> -> vector<16x64xf32>
    %350 = arith.mulf %347, %349 : vector<16x64xf32>
    %351 = vector.extract_strided_slice %339 {offsets = [0, 32], sizes = [64, 32], strides = [1, 1]} : vector<64x64xf32> to vector<64x32xf32>
    %cst_180 = arith.constant dense<0.000000e+00> : vector<16x32xf32>
    %352 = tpu.matmul %350, %351, %cst_180 {dimension_numbers = #tpu.dot_dimension_numbers<[1], [0], [0], [1], [0, 0, 1, 1], [], []>} : vector<16x64xf32>, vector<64x32xf32>, vector<16x32xf32> -> vector<16x32xf32>
    %353 = vector.extract_strided_slice %328 {offsets = [0, 96], sizes = [32, 32], strides = [1, 1]} : vector<32x128xf32> to vector<32x32xf32>
    %cst_181 = arith.constant dense<0.000000e+00> : vector<16x32xf32>
    %354 = tpu.matmul %352, %353, %cst_181 {dimension_numbers = #tpu.dot_dimension_numbers<[1], [0], [0], [1], [0, 0, 1, 1], [], []>} : vector<16x32xf32>, vector<32x32xf32>, vector<16x32xf32> -> vector<16x32xf32>
    %355 = vector.extract_strided_slice %330 {offsets = [0, 96], sizes = [1, 32], strides = [1, 1]} : vector<1x128xf32> to vector<1x32xf32>
    %356 = vector.broadcast %355 : vector<1x32xf32> to vector<16x32xf32>
    %357 = arith.addf %354, %356 : vector<16x32xf32>
    %358 = arith.addf %300, %357 : vector<16x32xf32>
    %cst_182 = arith.constant dense<0.000000e+00> : vector<16xf32>
    %359 = vector.multi_reduction <add>, %358, %cst_182 [1] : vector<16x32xf32> to vector<16xf32>
    %360 = vector.shape_cast %359 : vector<16xf32> to vector<16x1xf32>
    %cst_183 = arith.constant 3.200000e+01 : f32
    %361 = vector.broadcast %cst_183 : f32 to vector<16x1xf32>
    %362 = arith.divf %360, %361 : vector<16x1xf32>
    %363 = vector.broadcast %362 : vector<16x1xf32> to vector<16x32xf32>
    %364 = arith.subf %358, %363 : vector<16x32xf32>
    %365 = arith.mulf %364, %364 : vector<16x32xf32>
    %cst_184 = arith.constant dense<0.000000e+00> : vector<16xf32>
    %366 = vector.multi_reduction <add>, %365, %cst_184 [1] : vector<16x32xf32> to vector<16xf32>
    %367 = vector.shape_cast %366 : vector<16xf32> to vector<16x1xf32>
    %cst_185 = arith.constant 3.200000e+01 : f32
    %368 = vector.broadcast %cst_185 : f32 to vector<16x1xf32>
    %369 = arith.divf %367, %368 : vector<16x1xf32>
    %370 = vector.broadcast %362 : vector<16x1xf32> to vector<16x32xf32>
    %371 = arith.subf %358, %370 : vector<16x32xf32>
    %cst_186 = arith.constant 9.99999974E-6 : f32
    %372 = vector.broadcast %cst_186 : f32 to vector<16x1xf32>
    %373 = arith.addf %369, %372 : vector<16x1xf32>
    %374 = math.rsqrt %373 : vector<16x1xf32>
    %375 = vector.broadcast %374 : vector<16x1xf32> to vector<16x32xf32>
    %376 = arith.mulf %371, %375 : vector<16x32xf32>
    %c5_187 = arith.constant 5 : index
    %c0_188 = arith.constant 0 : index
    %c0_189 = arith.constant 0 : index
    %377 = vector.load %arg12[%c5_187, %c0_188, %c0_189] : memref<10x1x32xf32, #tpu.memory_space<vmem>>, vector<1x1x32xf32>
    %378 = vector.shape_cast %377 : vector<1x1x32xf32> to vector<1x32xf32>
    %379 = vector.broadcast %378 : vector<1x32xf32> to vector<16x32xf32>
    %380 = arith.mulf %376, %379 : vector<16x32xf32>
    %c5_190 = arith.constant 5 : index
    %c0_191 = arith.constant 0 : index
    %c0_192 = arith.constant 0 : index
    %381 = vector.load %arg13[%c5_190, %c0_191, %c0_192] : memref<10x1x32xf32, #tpu.memory_space<vmem>>, vector<1x1x32xf32>
    %382 = vector.shape_cast %381 : vector<1x1x32xf32> to vector<1x32xf32>
    %383 = vector.broadcast %382 : vector<1x32xf32> to vector<16x32xf32>
    %384 = arith.addf %380, %383 : vector<16x32xf32>
    %c3_193 = arith.constant 3 : index
    %c0_194 = arith.constant 0 : index
    %c0_195 = arith.constant 0 : index
    %385 = vector.load %arg6[%c3_193, %c0_194, %c0_195] : memref<6x32x128xf32, #tpu.memory_space<vmem>>, vector<1x32x128xf32>
    %386 = vector.shape_cast %385 : vector<1x32x128xf32> to vector<32x128xf32>
    %c3_196 = arith.constant 3 : index
    %c0_197 = arith.constant 0 : index
    %c0_198 = arith.constant 0 : index
    %387 = vector.load %arg7[%c3_196, %c0_197, %c0_198] : memref<6x1x128xf32, #tpu.memory_space<vmem>>, vector<1x1x128xf32>
    %388 = vector.shape_cast %387 : vector<1x1x128xf32> to vector<1x128xf32>
    %389 = vector.extract_strided_slice %386 {offsets = [0, 0], sizes = [32, 32], strides = [1, 1]} : vector<32x128xf32> to vector<32x32xf32>
    %cst_199 = arith.constant dense<0.000000e+00> : vector<16x32xf32>
    %390 = tpu.matmul %384, %389, %cst_199 {dimension_numbers = #tpu.dot_dimension_numbers<[1], [0], [0], [1], [0, 0, 1, 1], [], []>} : vector<16x32xf32>, vector<32x32xf32>, vector<16x32xf32> -> vector<16x32xf32>
    %391 = vector.extract_strided_slice %388 {offsets = [0, 0], sizes = [1, 32], strides = [1, 1]} : vector<1x128xf32> to vector<1x32xf32>
    %392 = vector.broadcast %391 : vector<1x32xf32> to vector<16x32xf32>
    %393 = arith.addf %390, %392 : vector<16x32xf32>
    %394 = vector.extract_strided_slice %386 {offsets = [0, 32], sizes = [32, 64], strides = [1, 1]} : vector<32x128xf32> to vector<32x64xf32>
    %cst_200 = arith.constant dense<0.000000e+00> : vector<16x64xf32>
    %395 = tpu.matmul %294, %394, %cst_200 {dimension_numbers = #tpu.dot_dimension_numbers<[1], [0], [0], [1], [0, 0, 1, 1], [], []>} : vector<16x32xf32>, vector<32x64xf32>, vector<16x64xf32> -> vector<16x64xf32>
    %396 = vector.extract_strided_slice %388 {offsets = [0, 32], sizes = [1, 64], strides = [1, 1]} : vector<1x128xf32> to vector<1x64xf32>
    %397 = vector.broadcast %396 : vector<1x64xf32> to vector<16x64xf32>
    %398 = arith.addf %395, %397 : vector<16x64xf32>
    %cst_201 = arith.constant dense<0.000000e+00> : vector<64x64xf32>
    %399 = tpu.matmul %41, %398, %cst_201 {dimension_numbers = #tpu.dot_dimension_numbers<[1], [0], [0], [1], [0, 0, 1, 1], [], []>} : vector<64x16xf32>, vector<16x64xf32>, vector<64x64xf32> -> vector<64x64xf32>
    %400 = arith.mulf %399, %42 : vector<64x64xf32>
    %401 = vector.extract_strided_slice %400 {offsets = [0, 0], sizes = [64, 32], strides = [1, 1]} : vector<64x64xf32> to vector<64x32xf32>
    %cst_202 = arith.constant dense<0.000000e+00> : vector<16x64xf32>
    %402 = tpu.matmul %393, %401, %cst_202 {dimension_numbers = #tpu.dot_dimension_numbers<[1], [1], [0], [0], [0, 0, 1, 0], [], []>} : vector<16x32xf32>, vector<64x32xf32>, vector<16x64xf32> -> vector<16x64xf32>
    %403 = arith.addf %402, %299 : vector<16x64xf32>
    %cst_203 = arith.constant dense<0xFF800000> : vector<16xf32>
    %404 = vector.multi_reduction <maximumf>, %403, %cst_203 [1] : vector<16x64xf32> to vector<16xf32>
    %405 = vector.shape_cast %404 : vector<16xf32> to vector<16x1xf32>
    %406 = vector.broadcast %405 : vector<16x1xf32> to vector<16x64xf32>
    %407 = arith.subf %403, %406 : vector<16x64xf32>
    %408 = math.exp %407 : vector<16x64xf32>
    %cst_204 = arith.constant dense<0.000000e+00> : vector<16x64xf32>
    %409 = tpu.matmul %408, %43, %cst_204 {dimension_numbers = #tpu.dot_dimension_numbers<[1], [0], [0], [1], [0, 0, 1, 1], [], []>} : vector<16x64xf32>, vector<64x64xf32>, vector<16x64xf32> -> vector<16x64xf32>
    %410 = tpu.reciprocal %409 {approx = true} : vector<16x64xf32> -> vector<16x64xf32>
    %411 = arith.mulf %408, %410 : vector<16x64xf32>
    %412 = vector.extract_strided_slice %400 {offsets = [0, 32], sizes = [64, 32], strides = [1, 1]} : vector<64x64xf32> to vector<64x32xf32>
    %cst_205 = arith.constant dense<0.000000e+00> : vector<16x32xf32>
    %413 = tpu.matmul %411, %412, %cst_205 {dimension_numbers = #tpu.dot_dimension_numbers<[1], [0], [0], [1], [0, 0, 1, 1], [], []>} : vector<16x64xf32>, vector<64x32xf32>, vector<16x32xf32> -> vector<16x32xf32>
    %414 = vector.extract_strided_slice %386 {offsets = [0, 96], sizes = [32, 32], strides = [1, 1]} : vector<32x128xf32> to vector<32x32xf32>
    %cst_206 = arith.constant dense<0.000000e+00> : vector<16x32xf32>
    %415 = tpu.matmul %413, %414, %cst_206 {dimension_numbers = #tpu.dot_dimension_numbers<[1], [0], [0], [1], [0, 0, 1, 1], [], []>} : vector<16x32xf32>, vector<32x32xf32>, vector<16x32xf32> -> vector<16x32xf32>
    %416 = vector.extract_strided_slice %388 {offsets = [0, 96], sizes = [1, 32], strides = [1, 1]} : vector<1x128xf32> to vector<1x32xf32>
    %417 = vector.broadcast %416 : vector<1x32xf32> to vector<16x32xf32>
    %418 = arith.addf %415, %417 : vector<16x32xf32>
    %419 = arith.addf %358, %418 : vector<16x32xf32>
    %cst_207 = arith.constant dense<0.000000e+00> : vector<16xf32>
    %420 = vector.multi_reduction <add>, %419, %cst_207 [1] : vector<16x32xf32> to vector<16xf32>
    %421 = vector.shape_cast %420 : vector<16xf32> to vector<16x1xf32>
    %cst_208 = arith.constant 3.200000e+01 : f32
    %422 = vector.broadcast %cst_208 : f32 to vector<16x1xf32>
    %423 = arith.divf %421, %422 : vector<16x1xf32>
    %424 = vector.broadcast %423 : vector<16x1xf32> to vector<16x32xf32>
    %425 = arith.subf %419, %424 : vector<16x32xf32>
    %426 = arith.mulf %425, %425 : vector<16x32xf32>
    %cst_209 = arith.constant dense<0.000000e+00> : vector<16xf32>
    %427 = vector.multi_reduction <add>, %426, %cst_209 [1] : vector<16x32xf32> to vector<16xf32>
    %428 = vector.shape_cast %427 : vector<16xf32> to vector<16x1xf32>
    %cst_210 = arith.constant 3.200000e+01 : f32
    %429 = vector.broadcast %cst_210 : f32 to vector<16x1xf32>
    %430 = arith.divf %428, %429 : vector<16x1xf32>
    %431 = vector.broadcast %423 : vector<16x1xf32> to vector<16x32xf32>
    %432 = arith.subf %419, %431 : vector<16x32xf32>
    %cst_211 = arith.constant 9.99999974E-6 : f32
    %433 = vector.broadcast %cst_211 : f32 to vector<16x1xf32>
    %434 = arith.addf %430, %433 : vector<16x1xf32>
    %435 = math.rsqrt %434 : vector<16x1xf32>
    %436 = vector.broadcast %435 : vector<16x1xf32> to vector<16x32xf32>
    %437 = arith.mulf %432, %436 : vector<16x32xf32>
    %c6 = arith.constant 6 : index
    %c0_212 = arith.constant 0 : index
    %c0_213 = arith.constant 0 : index
    %438 = vector.load %arg12[%c6, %c0_212, %c0_213] : memref<10x1x32xf32, #tpu.memory_space<vmem>>, vector<1x1x32xf32>
    %439 = vector.shape_cast %438 : vector<1x1x32xf32> to vector<1x32xf32>
    %440 = vector.broadcast %439 : vector<1x32xf32> to vector<16x32xf32>
    %441 = arith.mulf %437, %440 : vector<16x32xf32>
    %c6_214 = arith.constant 6 : index
    %c0_215 = arith.constant 0 : index
    %c0_216 = arith.constant 0 : index
    %442 = vector.load %arg13[%c6_214, %c0_215, %c0_216] : memref<10x1x32xf32, #tpu.memory_space<vmem>>, vector<1x1x32xf32>
    %443 = vector.shape_cast %442 : vector<1x1x32xf32> to vector<1x32xf32>
    %444 = vector.broadcast %443 : vector<1x32xf32> to vector<16x32xf32>
    %445 = arith.addf %441, %444 : vector<16x32xf32>
    %c2_217 = arith.constant 2 : index
    %c0_218 = arith.constant 0 : index
    %c0_219 = arith.constant 0 : index
    %446 = vector.load %arg8[%c2_217, %c0_218, %c0_219] : memref<4x32x128xf32, #tpu.memory_space<vmem>>, vector<1x32x128xf32>
    %447 = vector.shape_cast %446 : vector<1x32x128xf32> to vector<32x128xf32>
    %cst_220 = arith.constant dense<0.000000e+00> : vector<16x128xf32>
    %448 = tpu.matmul %445, %447, %cst_220 {dimension_numbers = #tpu.dot_dimension_numbers<[1], [0], [0], [1], [0, 0, 1, 1], [], []>} : vector<16x32xf32>, vector<32x128xf32>, vector<16x128xf32> -> vector<16x128xf32>
    %c2_221 = arith.constant 2 : index
    %c0_222 = arith.constant 0 : index
    %c0_223 = arith.constant 0 : index
    %449 = vector.load %arg9[%c2_221, %c0_222, %c0_223] : memref<4x1x128xf32, #tpu.memory_space<vmem>>, vector<1x1x128xf32>
    %450 = vector.shape_cast %449 : vector<1x1x128xf32> to vector<1x128xf32>
    %451 = vector.broadcast %450 : vector<1x128xf32> to vector<16x128xf32>
    %452 = arith.addf %448, %451 : vector<16x128xf32>
    %cst_224 = arith.constant 5.000000e-01 : f32
    %453 = vector.broadcast %cst_224 : f32 to vector<16x128xf32>
    %454 = arith.mulf %453, %452 : vector<16x128xf32>
    %cst_225 = arith.constant 4.471500e-02 : f32
    %455 = vector.broadcast %cst_225 : f32 to vector<16x128xf32>
    %456 = arith.mulf %455, %452 : vector<16x128xf32>
    %457 = arith.mulf %456, %452 : vector<16x128xf32>
    %458 = arith.mulf %457, %452 : vector<16x128xf32>
    %459 = arith.addf %452, %458 : vector<16x128xf32>
    %cst_226 = arith.constant 0.797884583 : f32
    %460 = vector.broadcast %cst_226 : f32 to vector<16x128xf32>
    %461 = arith.mulf %460, %459 : vector<16x128xf32>
    %462 = math.tanh %461 : vector<16x128xf32>
    %cst_227 = arith.constant 1.000000e+00 : f32
    %463 = vector.broadcast %cst_227 : f32 to vector<16x128xf32>
    %464 = arith.addf %463, %462 : vector<16x128xf32>
    %465 = arith.mulf %454, %464 : vector<16x128xf32>
    %c2_228 = arith.constant 2 : index
    %c0_229 = arith.constant 0 : index
    %c0_230 = arith.constant 0 : index
    %466 = vector.load %arg10[%c2_228, %c0_229, %c0_230] : memref<4x128x32xf32, #tpu.memory_space<vmem>>, vector<1x128x32xf32>
    %467 = vector.shape_cast %466 : vector<1x128x32xf32> to vector<128x32xf32>
    %cst_231 = arith.constant dense<0.000000e+00> : vector<16x32xf32>
    %468 = tpu.matmul %465, %467, %cst_231 {dimension_numbers = #tpu.dot_dimension_numbers<[1], [0], [0], [1], [0, 0, 1, 1], [], []>} : vector<16x128xf32>, vector<128x32xf32>, vector<16x32xf32> -> vector<16x32xf32>
    %c2_232 = arith.constant 2 : index
    %c0_233 = arith.constant 0 : index
    %c0_234 = arith.constant 0 : index
    %469 = vector.load %arg11[%c2_232, %c0_233, %c0_234] : memref<4x1x32xf32, #tpu.memory_space<vmem>>, vector<1x1x32xf32>
    %470 = vector.shape_cast %469 : vector<1x1x32xf32> to vector<1x32xf32>
    %471 = vector.broadcast %470 : vector<1x32xf32> to vector<16x32xf32>
    %472 = arith.addf %468, %471 : vector<16x32xf32>
    %473 = arith.addf %419, %472 : vector<16x32xf32>
    %cst_235 = arith.constant dense<0.000000e+00> : vector<16xf32>
    %474 = vector.multi_reduction <add>, %473, %cst_235 [1] : vector<16x32xf32> to vector<16xf32>
    %475 = vector.shape_cast %474 : vector<16xf32> to vector<16x1xf32>
    %cst_236 = arith.constant 3.200000e+01 : f32
    %476 = vector.broadcast %cst_236 : f32 to vector<16x1xf32>
    %477 = arith.divf %475, %476 : vector<16x1xf32>
    %478 = vector.broadcast %477 : vector<16x1xf32> to vector<16x32xf32>
    %479 = arith.subf %473, %478 : vector<16x32xf32>
    %480 = arith.mulf %479, %479 : vector<16x32xf32>
    %cst_237 = arith.constant dense<0.000000e+00> : vector<16xf32>
    %481 = vector.multi_reduction <add>, %480, %cst_237 [1] : vector<16x32xf32> to vector<16xf32>
    %482 = vector.shape_cast %481 : vector<16xf32> to vector<16x1xf32>
    %cst_238 = arith.constant 3.200000e+01 : f32
    %483 = vector.broadcast %cst_238 : f32 to vector<16x1xf32>
    %484 = arith.divf %482, %483 : vector<16x1xf32>
    %485 = vector.broadcast %477 : vector<16x1xf32> to vector<16x32xf32>
    %486 = arith.subf %473, %485 : vector<16x32xf32>
    %cst_239 = arith.constant 9.99999974E-6 : f32
    %487 = vector.broadcast %cst_239 : f32 to vector<16x1xf32>
    %488 = arith.addf %484, %487 : vector<16x1xf32>
    %489 = math.rsqrt %488 : vector<16x1xf32>
    %490 = vector.broadcast %489 : vector<16x1xf32> to vector<16x32xf32>
    %491 = arith.mulf %486, %490 : vector<16x32xf32>
    %c7 = arith.constant 7 : index
    %c0_240 = arith.constant 0 : index
    %c0_241 = arith.constant 0 : index
    %492 = vector.load %arg12[%c7, %c0_240, %c0_241] : memref<10x1x32xf32, #tpu.memory_space<vmem>>, vector<1x1x32xf32>
    %493 = vector.shape_cast %492 : vector<1x1x32xf32> to vector<1x32xf32>
    %494 = vector.broadcast %493 : vector<1x32xf32> to vector<16x32xf32>
    %495 = arith.mulf %491, %494 : vector<16x32xf32>
    %c7_242 = arith.constant 7 : index
    %c0_243 = arith.constant 0 : index
    %c0_244 = arith.constant 0 : index
    %496 = vector.load %arg13[%c7_242, %c0_243, %c0_244] : memref<10x1x32xf32, #tpu.memory_space<vmem>>, vector<1x1x32xf32>
    %497 = vector.shape_cast %496 : vector<1x1x32xf32> to vector<1x32xf32>
    %498 = vector.broadcast %497 : vector<1x32xf32> to vector<16x32xf32>
    %499 = arith.addf %495, %498 : vector<16x32xf32>
    %c4_245 = arith.constant 4 : index
    %c0_246 = arith.constant 0 : index
    %c0_247 = arith.constant 0 : index
    %500 = vector.load %arg6[%c4_245, %c0_246, %c0_247] : memref<6x32x128xf32, #tpu.memory_space<vmem>>, vector<1x32x128xf32>
    %501 = vector.shape_cast %500 : vector<1x32x128xf32> to vector<32x128xf32>
    %c4_248 = arith.constant 4 : index
    %c0_249 = arith.constant 0 : index
    %c0_250 = arith.constant 0 : index
    %502 = vector.load %arg7[%c4_248, %c0_249, %c0_250] : memref<6x1x128xf32, #tpu.memory_space<vmem>>, vector<1x1x128xf32>
    %503 = vector.shape_cast %502 : vector<1x1x128xf32> to vector<1x128xf32>
    %504 = vector.extract_strided_slice %501 {offsets = [0, 0], sizes = [32, 96], strides = [1, 1]} : vector<32x128xf32> to vector<32x96xf32>
    %cst_251 = arith.constant dense<0.000000e+00> : vector<16x96xf32>
    %505 = tpu.matmul %499, %504, %cst_251 {dimension_numbers = #tpu.dot_dimension_numbers<[1], [0], [0], [1], [0, 0, 1, 1], [], []>} : vector<16x32xf32>, vector<32x96xf32>, vector<16x96xf32> -> vector<16x96xf32>
    %506 = vector.extract_strided_slice %503 {offsets = [0, 0], sizes = [1, 96], strides = [1, 1]} : vector<1x128xf32> to vector<1x96xf32>
    %507 = vector.broadcast %506 : vector<1x96xf32> to vector<16x96xf32>
    %508 = arith.addf %505, %507 : vector<16x96xf32>
    %509 = vector.extract_strided_slice %508 {offsets = [0, 0], sizes = [16, 32], strides = [1, 1]} : vector<16x96xf32> to vector<16x32xf32>
    %510 = vector.extract_strided_slice %508 {offsets = [0, 32], sizes = [16, 64], strides = [1, 1]} : vector<16x96xf32> to vector<16x64xf32>
    %cst_252 = arith.constant dense<0.000000e+00> : vector<64x64xf32>
    %511 = tpu.matmul %295, %510, %cst_252 {dimension_numbers = #tpu.dot_dimension_numbers<[1], [0], [0], [1], [0, 0, 1, 1], [], []>} : vector<64x16xf32>, vector<16x64xf32>, vector<64x64xf32> -> vector<64x64xf32>
    %512 = arith.mulf %511, %296 : vector<64x64xf32>
    %513 = vector.extract_strided_slice %512 {offsets = [0, 0], sizes = [64, 32], strides = [1, 1]} : vector<64x64xf32> to vector<64x32xf32>
    %cst_253 = arith.constant dense<0.000000e+00> : vector<16x64xf32>
    %514 = tpu.matmul %509, %513, %cst_253 {dimension_numbers = #tpu.dot_dimension_numbers<[1], [1], [0], [0], [0, 0, 1, 0], [], []>} : vector<16x32xf32>, vector<64x32xf32>, vector<16x64xf32> -> vector<16x64xf32>
    %515 = arith.addf %514, %298 : vector<16x64xf32>
    %cst_254 = arith.constant dense<0xFF800000> : vector<16xf32>
    %516 = vector.multi_reduction <maximumf>, %515, %cst_254 [1] : vector<16x64xf32> to vector<16xf32>
    %517 = vector.shape_cast %516 : vector<16xf32> to vector<16x1xf32>
    %518 = vector.broadcast %517 : vector<16x1xf32> to vector<16x64xf32>
    %519 = arith.subf %515, %518 : vector<16x64xf32>
    %520 = math.exp %519 : vector<16x64xf32>
    %cst_255 = arith.constant dense<0.000000e+00> : vector<16x64xf32>
    %521 = tpu.matmul %520, %297, %cst_255 {dimension_numbers = #tpu.dot_dimension_numbers<[1], [0], [0], [1], [0, 0, 1, 1], [], []>} : vector<16x64xf32>, vector<64x64xf32>, vector<16x64xf32> -> vector<16x64xf32>
    %522 = tpu.reciprocal %521 {approx = true} : vector<16x64xf32> -> vector<16x64xf32>
    %523 = arith.mulf %520, %522 : vector<16x64xf32>
    %524 = vector.extract_strided_slice %512 {offsets = [0, 32], sizes = [64, 32], strides = [1, 1]} : vector<64x64xf32> to vector<64x32xf32>
    %cst_256 = arith.constant dense<0.000000e+00> : vector<16x32xf32>
    %525 = tpu.matmul %523, %524, %cst_256 {dimension_numbers = #tpu.dot_dimension_numbers<[1], [0], [0], [1], [0, 0, 1, 1], [], []>} : vector<16x64xf32>, vector<64x32xf32>, vector<16x32xf32> -> vector<16x32xf32>
    %526 = vector.extract_strided_slice %501 {offsets = [0, 96], sizes = [32, 32], strides = [1, 1]} : vector<32x128xf32> to vector<32x32xf32>
    %cst_257 = arith.constant dense<0.000000e+00> : vector<16x32xf32>
    %527 = tpu.matmul %525, %526, %cst_257 {dimension_numbers = #tpu.dot_dimension_numbers<[1], [0], [0], [1], [0, 0, 1, 1], [], []>} : vector<16x32xf32>, vector<32x32xf32>, vector<16x32xf32> -> vector<16x32xf32>
    %528 = vector.extract_strided_slice %503 {offsets = [0, 96], sizes = [1, 32], strides = [1, 1]} : vector<1x128xf32> to vector<1x32xf32>
    %529 = vector.broadcast %528 : vector<1x32xf32> to vector<16x32xf32>
    %530 = arith.addf %527, %529 : vector<16x32xf32>
    %531 = arith.addf %473, %530 : vector<16x32xf32>
    %cst_258 = arith.constant dense<0.000000e+00> : vector<16xf32>
    %532 = vector.multi_reduction <add>, %531, %cst_258 [1] : vector<16x32xf32> to vector<16xf32>
    %533 = vector.shape_cast %532 : vector<16xf32> to vector<16x1xf32>
    %cst_259 = arith.constant 3.200000e+01 : f32
    %534 = vector.broadcast %cst_259 : f32 to vector<16x1xf32>
    %535 = arith.divf %533, %534 : vector<16x1xf32>
    %536 = vector.broadcast %535 : vector<16x1xf32> to vector<16x32xf32>
    %537 = arith.subf %531, %536 : vector<16x32xf32>
    %538 = arith.mulf %537, %537 : vector<16x32xf32>
    %cst_260 = arith.constant dense<0.000000e+00> : vector<16xf32>
    %539 = vector.multi_reduction <add>, %538, %cst_260 [1] : vector<16x32xf32> to vector<16xf32>
    %540 = vector.shape_cast %539 : vector<16xf32> to vector<16x1xf32>
    %cst_261 = arith.constant 3.200000e+01 : f32
    %541 = vector.broadcast %cst_261 : f32 to vector<16x1xf32>
    %542 = arith.divf %540, %541 : vector<16x1xf32>
    %543 = vector.broadcast %535 : vector<16x1xf32> to vector<16x32xf32>
    %544 = arith.subf %531, %543 : vector<16x32xf32>
    %cst_262 = arith.constant 9.99999974E-6 : f32
    %545 = vector.broadcast %cst_262 : f32 to vector<16x1xf32>
    %546 = arith.addf %542, %545 : vector<16x1xf32>
    %547 = math.rsqrt %546 : vector<16x1xf32>
    %548 = vector.broadcast %547 : vector<16x1xf32> to vector<16x32xf32>
    %549 = arith.mulf %544, %548 : vector<16x32xf32>
    %c7_263 = arith.constant 7 : index
    %c0_264 = arith.constant 0 : index
    %c0_265 = arith.constant 0 : index
    %550 = vector.load %arg12[%c7_263, %c0_264, %c0_265] : memref<10x1x32xf32, #tpu.memory_space<vmem>>, vector<1x1x32xf32>
    %551 = vector.shape_cast %550 : vector<1x1x32xf32> to vector<1x32xf32>
    %552 = vector.broadcast %551 : vector<1x32xf32> to vector<16x32xf32>
    %553 = arith.mulf %549, %552 : vector<16x32xf32>
    %c7_266 = arith.constant 7 : index
    %c0_267 = arith.constant 0 : index
    %c0_268 = arith.constant 0 : index
    %554 = vector.load %arg13[%c7_266, %c0_267, %c0_268] : memref<10x1x32xf32, #tpu.memory_space<vmem>>, vector<1x1x32xf32>
    %555 = vector.shape_cast %554 : vector<1x1x32xf32> to vector<1x32xf32>
    %556 = vector.broadcast %555 : vector<1x32xf32> to vector<16x32xf32>
    %557 = arith.addf %553, %556 : vector<16x32xf32>
    %c5_269 = arith.constant 5 : index
    %c0_270 = arith.constant 0 : index
    %c0_271 = arith.constant 0 : index
    %558 = vector.load %arg6[%c5_269, %c0_270, %c0_271] : memref<6x32x128xf32, #tpu.memory_space<vmem>>, vector<1x32x128xf32>
    %559 = vector.shape_cast %558 : vector<1x32x128xf32> to vector<32x128xf32>
    %c5_272 = arith.constant 5 : index
    %c0_273 = arith.constant 0 : index
    %c0_274 = arith.constant 0 : index
    %560 = vector.load %arg7[%c5_272, %c0_273, %c0_274] : memref<6x1x128xf32, #tpu.memory_space<vmem>>, vector<1x1x128xf32>
    %561 = vector.shape_cast %560 : vector<1x1x128xf32> to vector<1x128xf32>
    %562 = vector.extract_strided_slice %559 {offsets = [0, 0], sizes = [32, 32], strides = [1, 1]} : vector<32x128xf32> to vector<32x32xf32>
    %cst_275 = arith.constant dense<0.000000e+00> : vector<16x32xf32>
    %563 = tpu.matmul %557, %562, %cst_275 {dimension_numbers = #tpu.dot_dimension_numbers<[1], [0], [0], [1], [0, 0, 1, 1], [], []>} : vector<16x32xf32>, vector<32x32xf32>, vector<16x32xf32> -> vector<16x32xf32>
    %564 = vector.extract_strided_slice %561 {offsets = [0, 0], sizes = [1, 32], strides = [1, 1]} : vector<1x128xf32> to vector<1x32xf32>
    %565 = vector.broadcast %564 : vector<1x32xf32> to vector<16x32xf32>
    %566 = arith.addf %563, %565 : vector<16x32xf32>
    %567 = vector.extract_strided_slice %559 {offsets = [0, 32], sizes = [32, 64], strides = [1, 1]} : vector<32x128xf32> to vector<32x64xf32>
    %cst_276 = arith.constant dense<0.000000e+00> : vector<16x64xf32>
    %568 = tpu.matmul %294, %567, %cst_276 {dimension_numbers = #tpu.dot_dimension_numbers<[1], [0], [0], [1], [0, 0, 1, 1], [], []>} : vector<16x32xf32>, vector<32x64xf32>, vector<16x64xf32> -> vector<16x64xf32>
    %569 = vector.extract_strided_slice %561 {offsets = [0, 32], sizes = [1, 64], strides = [1, 1]} : vector<1x128xf32> to vector<1x64xf32>
    %570 = vector.broadcast %569 : vector<1x64xf32> to vector<16x64xf32>
    %571 = arith.addf %568, %570 : vector<16x64xf32>
    %cst_277 = arith.constant dense<0.000000e+00> : vector<64x64xf32>
    %572 = tpu.matmul %41, %571, %cst_277 {dimension_numbers = #tpu.dot_dimension_numbers<[1], [0], [0], [1], [0, 0, 1, 1], [], []>} : vector<64x16xf32>, vector<16x64xf32>, vector<64x64xf32> -> vector<64x64xf32>
    %573 = arith.mulf %572, %42 : vector<64x64xf32>
    %574 = vector.extract_strided_slice %573 {offsets = [0, 0], sizes = [64, 32], strides = [1, 1]} : vector<64x64xf32> to vector<64x32xf32>
    %cst_278 = arith.constant dense<0.000000e+00> : vector<16x64xf32>
    %575 = tpu.matmul %566, %574, %cst_278 {dimension_numbers = #tpu.dot_dimension_numbers<[1], [1], [0], [0], [0, 0, 1, 0], [], []>} : vector<16x32xf32>, vector<64x32xf32>, vector<16x64xf32> -> vector<16x64xf32>
    %576 = arith.addf %575, %299 : vector<16x64xf32>
    %cst_279 = arith.constant dense<0xFF800000> : vector<16xf32>
    %577 = vector.multi_reduction <maximumf>, %576, %cst_279 [1] : vector<16x64xf32> to vector<16xf32>
    %578 = vector.shape_cast %577 : vector<16xf32> to vector<16x1xf32>
    %579 = vector.broadcast %578 : vector<16x1xf32> to vector<16x64xf32>
    %580 = arith.subf %576, %579 : vector<16x64xf32>
    %581 = math.exp %580 : vector<16x64xf32>
    %cst_280 = arith.constant dense<0.000000e+00> : vector<16x64xf32>
    %582 = tpu.matmul %581, %43, %cst_280 {dimension_numbers = #tpu.dot_dimension_numbers<[1], [0], [0], [1], [0, 0, 1, 1], [], []>} : vector<16x64xf32>, vector<64x64xf32>, vector<16x64xf32> -> vector<16x64xf32>
    %583 = tpu.reciprocal %582 {approx = true} : vector<16x64xf32> -> vector<16x64xf32>
    %584 = arith.mulf %581, %583 : vector<16x64xf32>
    %585 = vector.extract_strided_slice %573 {offsets = [0, 32], sizes = [64, 32], strides = [1, 1]} : vector<64x64xf32> to vector<64x32xf32>
    %cst_281 = arith.constant dense<0.000000e+00> : vector<16x32xf32>
    %586 = tpu.matmul %584, %585, %cst_281 {dimension_numbers = #tpu.dot_dimension_numbers<[1], [0], [0], [1], [0, 0, 1, 1], [], []>} : vector<16x64xf32>, vector<64x32xf32>, vector<16x32xf32> -> vector<16x32xf32>
    %587 = vector.extract_strided_slice %559 {offsets = [0, 96], sizes = [32, 32], strides = [1, 1]} : vector<32x128xf32> to vector<32x32xf32>
    %cst_282 = arith.constant dense<0.000000e+00> : vector<16x32xf32>
    %588 = tpu.matmul %586, %587, %cst_282 {dimension_numbers = #tpu.dot_dimension_numbers<[1], [0], [0], [1], [0, 0, 1, 1], [], []>} : vector<16x32xf32>, vector<32x32xf32>, vector<16x32xf32> -> vector<16x32xf32>
    %589 = vector.extract_strided_slice %561 {offsets = [0, 96], sizes = [1, 32], strides = [1, 1]} : vector<1x128xf32> to vector<1x32xf32>
    %590 = vector.broadcast %589 : vector<1x32xf32> to vector<16x32xf32>
    %591 = arith.addf %588, %590 : vector<16x32xf32>
    %592 = arith.addf %531, %591 : vector<16x32xf32>
    %cst_283 = arith.constant dense<0.000000e+00> : vector<16xf32>
    %593 = vector.multi_reduction <add>, %592, %cst_283 [1] : vector<16x32xf32> to vector<16xf32>
    %594 = vector.shape_cast %593 : vector<16xf32> to vector<16x1xf32>
    %cst_284 = arith.constant 3.200000e+01 : f32
    %595 = vector.broadcast %cst_284 : f32 to vector<16x1xf32>
    %596 = arith.divf %594, %595 : vector<16x1xf32>
    %597 = vector.broadcast %596 : vector<16x1xf32> to vector<16x32xf32>
    %598 = arith.subf %592, %597 : vector<16x32xf32>
    %599 = arith.mulf %598, %598 : vector<16x32xf32>
    %cst_285 = arith.constant dense<0.000000e+00> : vector<16xf32>
    %600 = vector.multi_reduction <add>, %599, %cst_285 [1] : vector<16x32xf32> to vector<16xf32>
    %601 = vector.shape_cast %600 : vector<16xf32> to vector<16x1xf32>
    %cst_286 = arith.constant 3.200000e+01 : f32
    %602 = vector.broadcast %cst_286 : f32 to vector<16x1xf32>
    %603 = arith.divf %601, %602 : vector<16x1xf32>
    %604 = vector.broadcast %596 : vector<16x1xf32> to vector<16x32xf32>
    %605 = arith.subf %592, %604 : vector<16x32xf32>
    %cst_287 = arith.constant 9.99999974E-6 : f32
    %606 = vector.broadcast %cst_287 : f32 to vector<16x1xf32>
    %607 = arith.addf %603, %606 : vector<16x1xf32>
    %608 = math.rsqrt %607 : vector<16x1xf32>
    %609 = vector.broadcast %608 : vector<16x1xf32> to vector<16x32xf32>
    %610 = arith.mulf %605, %609 : vector<16x32xf32>
    %c8 = arith.constant 8 : index
    %c0_288 = arith.constant 0 : index
    %c0_289 = arith.constant 0 : index
    %611 = vector.load %arg12[%c8, %c0_288, %c0_289] : memref<10x1x32xf32, #tpu.memory_space<vmem>>, vector<1x1x32xf32>
    %612 = vector.shape_cast %611 : vector<1x1x32xf32> to vector<1x32xf32>
    %613 = vector.broadcast %612 : vector<1x32xf32> to vector<16x32xf32>
    %614 = arith.mulf %610, %613 : vector<16x32xf32>
    %c8_290 = arith.constant 8 : index
    %c0_291 = arith.constant 0 : index
    %c0_292 = arith.constant 0 : index
    %615 = vector.load %arg13[%c8_290, %c0_291, %c0_292] : memref<10x1x32xf32, #tpu.memory_space<vmem>>, vector<1x1x32xf32>
    %616 = vector.shape_cast %615 : vector<1x1x32xf32> to vector<1x32xf32>
    %617 = vector.broadcast %616 : vector<1x32xf32> to vector<16x32xf32>
    %618 = arith.addf %614, %617 : vector<16x32xf32>
    %c3_293 = arith.constant 3 : index
    %c0_294 = arith.constant 0 : index
    %c0_295 = arith.constant 0 : index
    %619 = vector.load %arg8[%c3_293, %c0_294, %c0_295] : memref<4x32x128xf32, #tpu.memory_space<vmem>>, vector<1x32x128xf32>
    %620 = vector.shape_cast %619 : vector<1x32x128xf32> to vector<32x128xf32>
    %cst_296 = arith.constant dense<0.000000e+00> : vector<16x128xf32>
    %621 = tpu.matmul %618, %620, %cst_296 {dimension_numbers = #tpu.dot_dimension_numbers<[1], [0], [0], [1], [0, 0, 1, 1], [], []>} : vector<16x32xf32>, vector<32x128xf32>, vector<16x128xf32> -> vector<16x128xf32>
    %c3_297 = arith.constant 3 : index
    %c0_298 = arith.constant 0 : index
    %c0_299 = arith.constant 0 : index
    %622 = vector.load %arg9[%c3_297, %c0_298, %c0_299] : memref<4x1x128xf32, #tpu.memory_space<vmem>>, vector<1x1x128xf32>
    %623 = vector.shape_cast %622 : vector<1x1x128xf32> to vector<1x128xf32>
    %624 = vector.broadcast %623 : vector<1x128xf32> to vector<16x128xf32>
    %625 = arith.addf %621, %624 : vector<16x128xf32>
    %cst_300 = arith.constant 5.000000e-01 : f32
    %626 = vector.broadcast %cst_300 : f32 to vector<16x128xf32>
    %627 = arith.mulf %626, %625 : vector<16x128xf32>
    %cst_301 = arith.constant 4.471500e-02 : f32
    %628 = vector.broadcast %cst_301 : f32 to vector<16x128xf32>
    %629 = arith.mulf %628, %625 : vector<16x128xf32>
    %630 = arith.mulf %629, %625 : vector<16x128xf32>
    %631 = arith.mulf %630, %625 : vector<16x128xf32>
    %632 = arith.addf %625, %631 : vector<16x128xf32>
    %cst_302 = arith.constant 0.797884583 : f32
    %633 = vector.broadcast %cst_302 : f32 to vector<16x128xf32>
    %634 = arith.mulf %633, %632 : vector<16x128xf32>
    %635 = math.tanh %634 : vector<16x128xf32>
    %cst_303 = arith.constant 1.000000e+00 : f32
    %636 = vector.broadcast %cst_303 : f32 to vector<16x128xf32>
    %637 = arith.addf %636, %635 : vector<16x128xf32>
    %638 = arith.mulf %627, %637 : vector<16x128xf32>
    %c3_304 = arith.constant 3 : index
    %c0_305 = arith.constant 0 : index
    %c0_306 = arith.constant 0 : index
    %639 = vector.load %arg10[%c3_304, %c0_305, %c0_306] : memref<4x128x32xf32, #tpu.memory_space<vmem>>, vector<1x128x32xf32>
    %640 = vector.shape_cast %639 : vector<1x128x32xf32> to vector<128x32xf32>
    %cst_307 = arith.constant dense<0.000000e+00> : vector<16x32xf32>
    %641 = tpu.matmul %638, %640, %cst_307 {dimension_numbers = #tpu.dot_dimension_numbers<[1], [0], [0], [1], [0, 0, 1, 1], [], []>} : vector<16x128xf32>, vector<128x32xf32>, vector<16x32xf32> -> vector<16x32xf32>
    %c3_308 = arith.constant 3 : index
    %c0_309 = arith.constant 0 : index
    %c0_310 = arith.constant 0 : index
    %642 = vector.load %arg11[%c3_308, %c0_309, %c0_310] : memref<4x1x32xf32, #tpu.memory_space<vmem>>, vector<1x1x32xf32>
    %643 = vector.shape_cast %642 : vector<1x1x32xf32> to vector<1x32xf32>
    %644 = vector.broadcast %643 : vector<1x32xf32> to vector<16x32xf32>
    %645 = arith.addf %641, %644 : vector<16x32xf32>
    %646 = arith.addf %592, %645 : vector<16x32xf32>
    %cst_311 = arith.constant dense<0.000000e+00> : vector<16xf32>
    %647 = vector.multi_reduction <add>, %646, %cst_311 [1] : vector<16x32xf32> to vector<16xf32>
    %648 = vector.shape_cast %647 : vector<16xf32> to vector<16x1xf32>
    %cst_312 = arith.constant 3.200000e+01 : f32
    %649 = vector.broadcast %cst_312 : f32 to vector<16x1xf32>
    %650 = arith.divf %648, %649 : vector<16x1xf32>
    %651 = vector.broadcast %650 : vector<16x1xf32> to vector<16x32xf32>
    %652 = arith.subf %646, %651 : vector<16x32xf32>
    %653 = arith.mulf %652, %652 : vector<16x32xf32>
    %cst_313 = arith.constant dense<0.000000e+00> : vector<16xf32>
    %654 = vector.multi_reduction <add>, %653, %cst_313 [1] : vector<16x32xf32> to vector<16xf32>
    %655 = vector.shape_cast %654 : vector<16xf32> to vector<16x1xf32>
    %cst_314 = arith.constant 3.200000e+01 : f32
    %656 = vector.broadcast %cst_314 : f32 to vector<16x1xf32>
    %657 = arith.divf %655, %656 : vector<16x1xf32>
    %658 = vector.broadcast %650 : vector<16x1xf32> to vector<16x32xf32>
    %659 = arith.subf %646, %658 : vector<16x32xf32>
    %cst_315 = arith.constant 9.99999974E-6 : f32
    %660 = vector.broadcast %cst_315 : f32 to vector<16x1xf32>
    %661 = arith.addf %657, %660 : vector<16x1xf32>
    %662 = math.rsqrt %661 : vector<16x1xf32>
    %663 = vector.broadcast %662 : vector<16x1xf32> to vector<16x32xf32>
    %664 = arith.mulf %659, %663 : vector<16x32xf32>
    %c9 = arith.constant 9 : index
    %c0_316 = arith.constant 0 : index
    %c0_317 = arith.constant 0 : index
    %665 = vector.load %arg12[%c9, %c0_316, %c0_317] : memref<10x1x32xf32, #tpu.memory_space<vmem>>, vector<1x1x32xf32>
    %666 = vector.shape_cast %665 : vector<1x1x32xf32> to vector<1x32xf32>
    %667 = vector.broadcast %666 : vector<1x32xf32> to vector<16x32xf32>
    %668 = arith.mulf %664, %667 : vector<16x32xf32>
    %c9_318 = arith.constant 9 : index
    %c0_319 = arith.constant 0 : index
    %c0_320 = arith.constant 0 : index
    %669 = vector.load %arg13[%c9_318, %c0_319, %c0_320] : memref<10x1x32xf32, #tpu.memory_space<vmem>>, vector<1x1x32xf32>
    %670 = vector.shape_cast %669 : vector<1x1x32xf32> to vector<1x32xf32>
    %671 = vector.broadcast %670 : vector<1x32xf32> to vector<16x32xf32>
    %672 = arith.addf %668, %671 : vector<16x32xf32>
    %c0_321 = arith.constant 0 : index
    %c0_322 = arith.constant 0 : index
    %673 = vector.load %arg5[%c0_321, %c0_322] : memref<32x128xf32, #tpu.memory_space<vmem>>, vector<32x128xf32>
    %cst_323 = arith.constant dense<0.000000e+00> : vector<16x128xf32>
    %674 = tpu.matmul %672, %673, %cst_323 {dimension_numbers = #tpu.dot_dimension_numbers<[1], [0], [0], [1], [0, 0, 1, 1], [], []>} : vector<16x32xf32>, vector<32x128xf32>, vector<16x128xf32> -> vector<16x128xf32>
    %c0_324 = arith.constant 0 : index
    %c0_325 = arith.constant 0 : index
    %675 = vector.load %arg24[%c0_324, %c0_325] : memref<16x128xf32, #tpu.memory_space<vmem>>, vector<16x128xf32>
    tpu.vector_store %arg24[%c0_324, %c0_325], %674 {strides = array<i32>} : memref<16x128xf32, #tpu.memory_space<vmem>>, vector<16x128xf32>,
    return
  }
  func.func @transform_0(%arg0: i32) -> (i32, i32) {
    %c0_i32 = arith.constant 0 : i32
    %c0_i32_0 = arith.constant 0 : i32
    %c0_i32_1 = arith.constant 0 : i32
    return %c0_i32, %c0_i32_0 : i32, i32
  }
  func.func @transform_1(%arg0: i32) -> (i32, i32) {
    %c0_i32 = arith.constant 0 : i32
    %c0_i32_0 = arith.constant 0 : i32
    %c0_i32_1 = arith.constant 0 : i32
    return %c0_i32, %c0_i32_0 : i32, i32
  }
  func.func @transform_2(%arg0: i32) -> (i32, i32) {
    %c0_i32 = arith.constant 0 : i32
    %c0_i32_0 = arith.constant 0 : i32
    %c0_i32_1 = arith.constant 0 : i32
    return %c0_i32, %c0_i32_0 : i32, i32
  }
  func.func @transform_3(%arg0: i32) -> (i32, i32) {
    %c0_i32 = arith.constant 0 : i32
    %c0_i32_0 = arith.constant 0 : i32
    %c0_i32_1 = arith.constant 0 : i32
    return %c0_i32, %c0_i32_0 : i32, i32
  }
  func.func @transform_4(%arg0: i32) -> (i32, i32) {
    %c0_i32 = arith.constant 0 : i32
    %c0_i32_0 = arith.constant 0 : i32
    %c0_i32_1 = arith.constant 0 : i32
    return %c0_i32, %c0_i32_0 : i32, i32
  }
  func.func @transform_5(%arg0: i32) -> (i32, i32, i32) {
    %c0_i32 = arith.constant 0 : i32
    %c0_i32_0 = arith.constant 0 : i32
    %c0_i32_1 = arith.constant 0 : i32
    %c0_i32_2 = arith.constant 0 : i32
    return %c0_i32, %c0_i32_0, %c0_i32_1 : i32, i32, i32
  }
  func.func @transform_6(%arg0: i32) -> (i32, i32, i32) {
    %c0_i32 = arith.constant 0 : i32
    %c0_i32_0 = arith.constant 0 : i32
    %c0_i32_1 = arith.constant 0 : i32
    %c0_i32_2 = arith.constant 0 : i32
    return %c0_i32, %c0_i32_0, %c0_i32_1 : i32, i32, i32
  }
  func.func @transform_7(%arg0: i32) -> (i32, i32, i32) {
    %c0_i32 = arith.constant 0 : i32
    %c0_i32_0 = arith.constant 0 : i32
    %c0_i32_1 = arith.constant 0 : i32
    %c0_i32_2 = arith.constant 0 : i32
    return %c0_i32, %c0_i32_0, %c0_i32_1 : i32, i32, i32
  }
  func.func @transform_8(%arg0: i32) -> (i32, i32, i32) {
    %c0_i32 = arith.constant 0 : i32
    %c0_i32_0 = arith.constant 0 : i32
    %c0_i32_1 = arith.constant 0 : i32
    %c0_i32_2 = arith.constant 0 : i32
    return %c0_i32, %c0_i32_0, %c0_i32_1 : i32, i32, i32
  }
  func.func @transform_9(%arg0: i32) -> (i32, i32, i32) {
    %c0_i32 = arith.constant 0 : i32
    %c0_i32_0 = arith.constant 0 : i32
    %c0_i32_1 = arith.constant 0 : i32
    %c0_i32_2 = arith.constant 0 : i32
    return %c0_i32, %c0_i32_0, %c0_i32_1 : i32, i32, i32
  }
  func.func @transform_10(%arg0: i32) -> (i32, i32, i32) {
    %c0_i32 = arith.constant 0 : i32
    %c0_i32_0 = arith.constant 0 : i32
    %c0_i32_1 = arith.constant 0 : i32
    %c0_i32_2 = arith.constant 0 : i32
    return %c0_i32, %c0_i32_0, %c0_i32_1 : i32, i32, i32
  }
  func.func @transform_11(%arg0: i32) -> (i32, i32, i32) {
    %c0_i32 = arith.constant 0 : i32
    %c0_i32_0 = arith.constant 0 : i32
    %c0_i32_1 = arith.constant 0 : i32
    %c0_i32_2 = arith.constant 0 : i32
    return %c0_i32, %c0_i32_0, %c0_i32_1 : i32, i32, i32
  }
  func.func @transform_12(%arg0: i32) -> (i32, i32, i32) {
    %c0_i32 = arith.constant 0 : i32
    %c0_i32_0 = arith.constant 0 : i32
    %c0_i32_1 = arith.constant 0 : i32
    %c0_i32_2 = arith.constant 0 : i32
    return %c0_i32, %c0_i32_0, %c0_i32_1 : i32, i32, i32
  }
  func.func @transform_13(%arg0: i32) -> (i32, i32, i32) {
    %c0_i32 = arith.constant 0 : i32
    %c0_i32_0 = arith.constant 0 : i32
    %c0_i32_1 = arith.constant 0 : i32
    %c0_i32_2 = arith.constant 0 : i32
    return %c0_i32, %c0_i32_0, %c0_i32_1 : i32, i32, i32
  }
  func.func @transform_14(%arg0: i32) -> (i32, i32) {
    %c0_i32 = arith.constant 0 : i32
    %c0_i32_0 = arith.constant 0 : i32
    %c0_i32_1 = arith.constant 0 : i32
    return %c0_i32, %c0_i32_0 : i32, i32
  }
  func.func @transform_15(%arg0: i32) -> (i32, i32) {
    %c0_i32 = arith.constant 0 : i32
    %c0_i32_0 = arith.constant 0 : i32
    %c0_i32_1 = arith.constant 0 : i32
    return %c0_i32, %c0_i32_0 : i32, i32
  }
  func.func @transform_16(%arg0: i32) -> (i32, i32) {
    %c0_i32 = arith.constant 0 : i32
    %c0_i32_0 = arith.constant 0 : i32
    %c0_i32_1 = arith.constant 0 : i32
    return %c0_i32, %c0_i32_0 : i32, i32
  }
  func.func @transform_17(%arg0: i32) -> (i32, i32) {
    %c0_i32 = arith.constant 0 : i32
    %c0_i32_0 = arith.constant 0 : i32
    %c0_i32_1 = arith.constant 0 : i32
    return %c0_i32, %c0_i32_0 : i32, i32
  }
  func.func @transform_18(%arg0: i32) -> (i32, i32) {
    %c0_i32 = arith.constant 0 : i32
    %c0_i32_0 = arith.constant 0 : i32
    %c0_i32_1 = arith.constant 0 : i32
    return %c0_i32, %c0_i32_0 : i32, i32
  }
  func.func @transform_19(%arg0: i32) -> (i32, i32) {
    %c0_i32 = arith.constant 0 : i32
    %c0_i32_0 = arith.constant 0 : i32
    %c0_i32_1 = arith.constant 0 : i32
    return %c0_i32, %c0_i32_0 : i32, i32
  }
  func.func @transform_20(%arg0: i32) -> (i32, i32) {
    %c0_i32 = arith.constant 0 : i32
    %c0_i32_0 = arith.constant 0 : i32
    %c0_i32_1 = arith.constant 0 : i32
    return %c0_i32, %c0_i32_0 : i32, i32
  }
  func.func @transform_21(%arg0: i32) -> (i32, i32) {
    %c0_i32 = arith.constant 0 : i32
    %c0_i32_0 = arith.constant 0 : i32
    %c0_i32_1 = arith.constant 0 : i32
    return %c0_i32, %c0_i32_0 : i32, i32
  }
  func.func @transform_22(%arg0: i32) -> (i32, i32) {
    %c0_i32 = arith.constant 0 : i32
    %c0_i32_0 = arith.constant 0 : i32
    %c0_i32_1 = arith.constant 0 : i32
    return %c0_i32, %c0_i32_0 : i32, i32
  }
  func.func @transform_23(%arg0: i32) -> (i32, i32) {
    %c0_i32 = arith.constant 0 : i32
    %c0_i32_0 = arith.constant 0 : i32
    %c0_i32_1 = arith.constant 0 : i32
    return %c0_i32, %c0_i32_0 : i32, i32
  }
}

</mosaic_0001>

<bundles_post_ra>
// kernel: gpt_forward.1
= control target key start
LH: loop header
LB: loop body
LE: loop exit
PB: predicated region body
PF: predicated region fallthrough
CT: control target
= control target key end

     0   :  { %s9753_s0 = inlined_call_operand.vmem [shape: f32[96,12], index: 0, kind: input, shape index: {}]   ;;  %s9754_s1 = inlined_call_operand.vmem [shape: f32[12,32], index: 1, kind: input, shape index: {}]   ;;  %s9755_s2 = inlined_call_operand.vmem [shape: f32[16,96], index: 2, kind: input, shape index: {}]   ;;  %s9756_s3 = inlined_call_operand.vmem [shape: f32[16,32], index: 3, kind: input, shape index: {}]   ;;  %s9757_s4 = inlined_call_operand.vmem [shape: f32[32,128], index: 4, kind: input, shape index: {}]   ;;  %s9758_s5 = inlined_call_operand.vmem [shape: f32[6,32,128], index: 5, kind: input, shape index: {}]   ;;  %s9759_s6 = inlined_call_operand.vmem [shape: f32[6,1,128], index: 6, kind: input, shape index: {}]   ;;  %s9760_s7 = inlined_call_operand.vmem [shape: f32[4,32,128], index: 7, kind: input, shape index: {}]   ;;  %s9761_s8 = inlined_call_operand.vmem [shape: f32[4,1,128], index: 8, kind: input, shape index: {}]   ;;  %s9762_s9 = inlined_call_operand.vmem [shape: f32[4,128,32], index: 9, kind: input, shape index: {}]   ;;  %s9763_s10 = inlined_call_operand.vmem [shape: f32[4,1,32], index: 10, kind: input, shape index: {}]   ;;  %s9764_s11 = inlined_call_operand.vmem [shape: f32[10,1,32], index: 11, kind: input, shape index: {}]   ;;  %s9765_s12 = inlined_call_operand.vmem [shape: f32[10,1,32], index: 12, kind: input, shape index: {}]   ;;  %s9766_s13 = inlined_call_operand.vmem [shape: f32[6,1,32], index: 13, kind: input, shape index: {}]   ;;  %s9767_s14 = inlined_call_operand.vmem [shape: f32[64,16], index: 14, kind: input, shape index: {}]   ;;  %s9768_s15 = inlined_call_operand.vmem [shape: f32[64,64], index: 15, kind: input, shape index: {}]   ;;  %s9769_s16 = inlined_call_operand.vmem [shape: f32[64,64], index: 16, kind: input, shape index: {}]   ;;  %s9770_s17 = inlined_call_operand.vmem [shape: f32[64,16], index: 17, kind: input, shape index: {}]   ;;  %s9771_s18 = inlined_call_operand.vmem [shape: f32[64,64], index: 18, kind: input, shape index: {}]   ;;  %s9772_s19 = inlined_call_operand.vmem [shape: f32[64,64], index: 19, kind: input, shape index: {}]   ;;  %s9773_s20 = inlined_call_operand.vmem [shape: f32[16,64], index: 20, kind: input, shape index: {}]   ;;  %s9774_s21 = inlined_call_operand.vmem [shape: f32[16,64], index: 21, kind: input, shape index: {}]   ;;  %s9775_s22 = inlined_call_operand.vmem [shape: f32[16,64], index: 22, kind: input, shape index: {}]   ;;  %s9776_s23 = inlined_call_operand.hbm [shape: f32[16,128], index: 23, kind: output, shape index: {}]  }
   0x1   :  { %9785 = sst [smem:[#allocation5_spill]] %s9753_s0 }
   0x2   :  { %9786 = sst [smem:[#allocation6_spill]] %s9754_s1 }
   0x3   :  { %9787 = sst [smem:[#allocation7_spill]] %s9755_s2 }
   0x4   :  { %9788 = sst [smem:[#allocation8_spill]] %s9756_s3 }
   0x5   :  { %9789 = sst [smem:[#allocation9_spill]] %s9757_s4 }
   0x6   :  { %9790 = sst [smem:[#allocation10_spill]] %s9758_s5 }
   0x7   :  { %9791 = sst [smem:[#allocation11_spill]] %s9759_s6 }
   0x8   :  { %9792 = sst [smem:[#allocation12_spill]] %s9760_s7 }
   0x9   :  { %s9793_s24 = sld [smem:[#allocation6_spill]]  ;;  %vm133_vm0 = vcmask 1043456   ;;  %vm96_vm1 = vcmask 97280  }
   0xa   :  { %s9794_s2 = sld [smem:[#allocation5_spill]] }
   0xf   :  { %v88_v0 = vld [vmem:[%s9793_s24 + $0x8] sm:$0xf]  ;;  %v87_v1 = vld [vmem:[%s9793_s24] sm:$0xff] }
  0x10   :  { %v75_v2 = vld [vmem:[%s9794_s2] sm:$0xff]  ;;  %6768 = vmatprep.subr.msk.mxu0 %vm133_vm0, %v88_v0  ;;  %v76_v3 = vld [vmem:[%s9794_s2 + $0x8] sm:$0xff]  ;;  %v77_v4 = vld [vmem:[%s9794_s2 + $0x10] sm:$0xff] }
  0x11   :  { %6772 = vmatprep.mubr.msk.f32.mxu0 %vm96_vm1, %v75_v2  ;;  %6769 = vmatpush3.msk.msra.mxu0 %vm133_vm0, %v88_v0 }
  0x12   :  { %6770 = vmatprep.subr.mxu0 %v87_v1 }
  0x13   :  { %6771 = vmatpush3.msra.mxu0 %v87_v1 }
  0x14   :  { %28 = vsyncpa [#allocation3], 0  ;;  %6773 = vmatmul.mubr.msk.f32.vlgmr.msra.gmra.mxu0 %vm96_vm1, %v76_v3  ;;  %v78_v5 = vld [vmem:[%s9794_s2 + $0x18] sm:$0xff]  ;;  %v79_v6 = vld [vmem:[%s9794_s2 + $0x20] sm:$0xff]  ;;  %s9795_s25 = sld [smem:[#allocation7_spill]]  ;;  %vm344_vm2 = vcmask 785408  }
  0x15   :  { %6775 = vmatprep.mubr.msk.f32.mxu0 %vm96_vm1, %v77_v4  ;;  %v80_v7 = vld [vmem:[%s9794_s2 + $0x28] sm:$0xff]  ;;  %v81_v8 = vld [vmem:[%s9794_s2 + $0x30] sm:$0xff]  ;;  %v82_v9 = vld [vmem:[%s9794_s2 + $0x38] sm:$0xff]  ;;  %vm514_vm3 = vcmask 261120   ;;  %s9796_s5 = sld [smem:[#allocation10_spill]]  ;;  %vm660_vm4 = vcmask 130048  }
  0x16   :  { %v83_v10 = vld [vmem:[%s9794_s2 + $0x40] sm:$0xff]  ;;  %v84_v11 = vld [vmem:[%s9794_s2 + $0x48] sm:$0xff]  ;;  %v85_v12 = vld [vmem:[%s9794_s2 + $0x50] sm:$0xff]  ;;  %s7875_s1 = smov 96   ;;  %vm901_vm5 = vcmask 523264   ;;  %s7876_s30 = smov 32  }
  0x17   :  { %v86_v13 = vld [vmem:[%s9794_s2 + $0x58] sm:$0xff]  ;;  %v5973_v23 = vld [vmem:[%s9766_s13] ss:$0 sm:$0xff]  ;;  %v5988_v61 = vld [vmem:[%s9766_s13 + $0x4] ss:$0 sm:$0xff]  ;;  %s9798_s2 = sld [smem:[#allocation12_spill]] }
  0x18   :  { %6776 = vmatmul.mubr.msk.f32.gmra.mxu0 %vm96_vm1, %v78_v5  ;;  %s9799_s27 = sld [smem:[#allocation8_spill]] }
  0x19   :  { %6778 = vmatprep.mubr.msk.f32.mxu0 %vm96_vm1, %v79_v6  ;;  %s9800_s28 = sld [smem:[#allocation9_spill]] }
  0x1a   :  { %v342_v14 = vld [vmem:[%s9795_s25] sm:$0xff] }
  0x1c   :  { %6779 = vmatmul.mubr.msk.f32.gmra.mxu0 %vm96_vm1, %v80_v7 }
  0x1d   :  { %6781 = vmatprep.mubr.msk.f32.mxu0 %vm96_vm1, %v81_v8 }
  0x20   :  { %6782 = vmatmul.mubr.msk.f32.gmra.mxu0 %vm96_vm1, %v82_v9 }
  0x21   :  { %6784 = vmatprep.mubr.msk.f32.mxu0 %vm96_vm1, %v83_v10 }
  0x24   :  { %6785 = vmatmul.mubr.msk.f32.gmra.mxu0 %vm96_vm1, %v84_v11 }
  0x25   :  { %6787 = vmatprep.mubr.msk.f32.mxu0 %vm96_vm1, %v85_v12 }
  0x28   :  { %6788 = vmatmul.mubr.msk.f32.gmra.mxu0 %vm96_vm1, %v86_v13 }
  0x29   :  { %6814 = vmatprep.mubr.msk.f32.mxu0 %vm344_vm2, %v342_v14 }
  0xd4   :  { %v6774_v15 = vpop.f32.mrf.mxu0 }
  0xd5   :  { %v209_v46 = vadd.f32 %v6774_v15, %v5973_v23 }
  0xd6   :  { %v203_v16 = vpop.f32.mrf.mxu0 }
  0xd7   :  { %v204_v48 = vadd.f32 %v5973_v23, %v203_v16  ;;  %v265_v50 = vmax.f32 %v209_v46, 1e-06 }
  0xd8   :  { %v6777_v17 = vpop.f32.mrf.mxu0 }
  0xd9   :  { %v219_v42 = vadd.f32 %v6777_v17, %v5973_v23  ;;  %v264_v52 = vmax.f32 %v204_v48, 1e-06 }
  0xda   :  { %v213_v18 = vpop.f32.mrf.mxu0 }
  0xdb   :  { %v214_v44 = vadd.f32 %v5973_v23, %v213_v18  ;;  %v267_v47 = vmax.f32 %v219_v42, 1e-06 }
  0xdc   :  { %v6780_v19 = vpop.f32.mrf.mxu0 }
  0xdd   :  { %v229_v32 = vadd.f32 %v6780_v19, %v5973_v23  ;;  %v266_v49 = vmax.f32 %v214_v44, 1e-06 }
  0xde   :  { %v223_v20 = vpop.f32.mrf.mxu0 }
  0xdf   :  { %v224_v38 = vadd.f32 %v5973_v23, %v223_v20  ;;  %v269_v41 = vmax.f32 %v229_v32, 1e-06 }
  0xe0   :  { %v6783_v21 = vpop.f32.mrf.mxu0 }
  0xe1   :  { %v239_v25 = vadd.f32 %v6783_v21, %v5973_v23  ;;  %v268_v45 = vmax.f32 %v224_v38, 1e-06 }
  0xe2   :  { %v233_v22 = vpop.f32.mrf.mxu0 }
  0xe3   :  { %v234_v28 = vadd.f32 %v5973_v23, %v233_v22  ;;  %v271_v33 = vmax.f32 %v239_v25, 1e-06 }
  0xe4   :  { %v6786_v24 = vpop.f32.mrf.mxu0 }
  0xe5   :  { %v249_v26 = vadd.f32 %v6786_v24, %v5973_v23  ;;  %v270_v37 = vmax.f32 %v234_v28, 1e-06 }
  0xe6   :  { %v243_v27 = vpop.f32.mrf.mxu0 }
  0xe7   :  { %v273_v29 = vmax.f32 %v249_v26, 1e-06  ;;  %v244_v30 = vadd.f32 %v5973_v23, %v243_v27 }
  0xe8   :  { %v6789_v31 = vpop.f32.mrf.mxu0 }
  0xe9   :  { %v272_v34 = vmax.f32 %v244_v30, 1e-06  ;;  %7609 = vlog2.f32 %v273_v29  ;;  %v259_v35 = vadd.f32 %v6789_v31, %v5973_v23 }
  0xea   :  { %v253_v36 = vpop.f32.mrf.mxu0 }
  0xeb   :  { %7611 = vlog2.f32 %v272_v34  ;;  %v275_v39 = vmax.f32 %v259_v35, 1e-06  ;;  %v254_v40 = vadd.f32 %v5973_v23, %v253_v36 }
  0xec   :  { %7613 = vlog2.f32 %v271_v33 }
  0xed   :  { %7615 = vlog2.f32 %v275_v39  ;;  %v274_v43 = vmax.f32 %v254_v40, 1e-06 }
  0xee   :  { %7617 = vlog2.f32 %v270_v37 }
  0xef   :  { %7619 = vlog2.f32 %v274_v43 }
  0xf0   :  { %7621 = vlog2.f32 %v269_v41 }
  0xf1   :  { %7623 = vlog2.f32 %v268_v45 }
  0xf2   :  { %7625 = vlog2.f32 %v267_v47 }
  0xf3   :  { %7627 = vlog2.f32 %v266_v49  ;;  %v343_v49 = vld [vmem:[%s9795_s25 + $0x8] sm:$0xff]  ;;  %s9797_s25 = sld [smem:[#allocation11_spill]] }
  0xf4   :  { %7629 = vlog2.f32 %v265_v50 }
  0xf5   :  { %7631 = vlog2.f32 %v264_v52 }
  0xf6   :  { %v7610_v51 = vpop.eup %7609 }
  0xf7   :  { %v295_v55 = vmul.f32 0.6931472, %v7610_v51 }
  0xf8   :  { %v7612_v53 = vpop.eup %7611 }
  0xf9   :  { %v7614_v54 = vpop.eup %7613  ;;  %v293_v58 = vmul.f32 0.6931472, %v7612_v53  ;;  %v315_v0 = vmul.f32 %v5988_v61, %v295_v55  ;;  %v5992_v53 = vld [vmem:[%s9766_s13 + $0x5] ss:$0 sm:$0xff] }
  0xfa   :  { %v7616_v56 = vpop.eup %7615  ;;  %v291_v63 = vmul.f32 0.6931472, %v7614_v54 }
  0xfb   :  { %v7618_v57 = vpop.eup %7617  ;;  %v299_v59 = vmul.f32 0.6931472, %v7616_v56  ;;  %v314_v4 = vmul.f32 %v5988_v61, %v293_v58  ;;  %v336_v10 = vmul.f32 1.442695, %v315_v0 }
  0xfc   :  { %v7620_v60 = vpop.eup %7619  ;;  %v289_v3 = vmul.f32 0.6931472, %v7618_v57  ;;  %v313_v9 = vmul.f32 %v5988_v61, %v291_v63  ;;  %v5996_v63 = vld [vmem:[%s9766_s13 + $0x2] ss:$0 sm:$0xff] }
  0xfd   :  { %v7622_v62 = vpop.eup %7621  ;;  %v317_v1 = vmul.f32 %v5988_v61, %v299_v59  ;;  %v297_v2 = vmul.f32 0.6931472, %v7620_v60  ;;  %v334_v15 = vmul.f32 1.442695, %v314_v4 }
  0xfe   :  { %v7624_v7 = vpop.eup %7623  ;;  %v287_v8 = vmul.f32 0.6931472, %v7622_v62  ;;  %v312_v14 = vmul.f32 %v5988_v61, %v289_v3  ;;  %v332_v19 = vmul.f32 1.442695, %v313_v9 }
  0xff   :  { %v340_v5 = vmul.f32 1.442695, %v317_v1  ;;  %v316_v6 = vmul.f32 %v5988_v61, %v297_v2  ;;  %v7626_v12 = vpop.eup %7625  ;;  %v285_v13 = vmul.f32 0.6931472, %v7624_v7 }
 0x100   :  { %v7628_v16 = vpop.eup %7627  ;;  %v283_v17 = vmul.f32 0.6931472, %v7626_v12  ;;  %v311_v18 = vmul.f32 %v5988_v61, %v287_v8  ;;  %v330_v23 = vmul.f32 1.442695, %v312_v14 }
 0x101   :  { %7633 = vpow2.f32 %v340_v5  ;;  %v338_v11 = vmul.f32 1.442695, %v316_v6  ;;  %v7630_v20 = vpop.eup %7629  ;;  %v281_v21 = vmul.f32 0.6931472, %v7628_v16  ;;  %v310_v22 = vmul.f32 %v5988_v61, %v285_v13 }
 0x102   :  { %v7632_v24 = vpop.eup %7631  ;;  %v279_v25 = vmul.f32 0.6931472, %v7630_v20  ;;  %v309_v26 = vmul.f32 %v5988_v61, %v283_v17  ;;  %v328_v27 = vmul.f32 1.442695, %v311_v18 }
 0x103   :  { %7635 = vpow2.f32 %v338_v11  ;;  %v277_v28 = vmul.f32 0.6931472, %v7632_v24  ;;  %v308_v29 = vmul.f32 %v5988_v61, %v281_v21  ;;  %v326_v30 = vmul.f32 1.442695, %v310_v22 }
 0x104   :  { %7637 = vpow2.f32 %v336_v10  ;;  %v307_v31 = vmul.f32 %v5988_v61, %v279_v25  ;;  %v324_v32 = vmul.f32 1.442695, %v309_v26 }
 0x105   :  { %7639 = vpow2.f32 %v334_v15  ;;  %v306_v34 = vmul.f32 %v5988_v61, %v277_v28  ;;  %v322_v35 = vmul.f32 1.442695, %v308_v29  ;;  %v5994_v61 = vld [vmem:[%s9766_s13 + $0x1] ss:$0 sm:$0xff]  ;;  %v6000_v15 = vld [vmem:[%s9766_s13 + $0x3] ss:$0 sm:$0xff] }
 0x106   :  { %7641 = vpow2.f32 %v332_v19  ;;  %v320_v37 = vmul.f32 1.442695, %v307_v31  ;;  %v8100_v31 = vld [vmem:[%s9796_s5 + $0x10] sm:$0xff] }
 0x107   :  { %7643 = vpow2.f32 %v330_v23  ;;  %v318_v39 = vmul.f32 1.442695, %v306_v34 }
 0x108   :  { %7645 = vpow2.f32 %v328_v27 }
 0x109   :  { %7647 = vpow2.f32 %v326_v30  ;;  %v8095_v30 = vld [vmem:[%s9796_s5 + $0x18] sm:$0xff] }
 0x10a   :  { %7649 = vpow2.f32 %v324_v32  ;;  %6817 = vmatprep.subr.mxu1 %v8095_v30  ;;  %v8107_v32 = vld [vmem:[%s9796_s5 + $0x8] sm:$0xff] }
 0x10b   :  { %7651 = vpow2.f32 %v322_v35  ;;  %6818 = vmatpush3.msra.mxu1 %v8095_v30 }
 0x10c   :  { %7653 = vpow2.f32 %v320_v37  ;;  %6819 = vmatprep.subr.mxu1 %v8100_v31 }
 0x10d   :  { %7655 = vpow2.f32 %v318_v39  ;;  %6820 = vmatpush3.msra.mxu1 %v8100_v31 }
 0x10e   :  { %v7634_v33 = vpop.eup %7633  ;;  %6821 = vmatprep.subr.mxu1 %v8107_v32 }
 0x10f   :  { %6790 = vmatprep.subr.mxu0 %v7634_v33  ;;  %6822 = vmatpush3.msra.mxu1 %v8107_v32 }
 0x110   :  { %v7636_v36 = vpop.eup %7635  ;;  %6791 = vmatpush3.msra.mxu0 %v7634_v33  ;;  %v8116_v33 = vld [vmem:[%s9796_s5] sm:$0xff] }
 0x111   :  { %6792 = vmatprep.subr.mxu0 %v7636_v36  ;;  %v7638_v38 = vpop.eup %7637  ;;  %6823 = vmatprep.subr.mxu1 %v8116_v33 }
 0x112   :  { %6793 = vmatpush3.msra.mxu0 %v7636_v36  ;;  %v7640_v40 = vpop.eup %7639  ;;  %6824 = vmatpush3.msra.mxu1 %v8116_v33 }
 0x113   :  { %6794 = vmatprep.subr.mxu0 %v7638_v38  ;;  %v7642_v41 = vpop.eup %7641 }
 0x114   :  { %6795 = vmatpush3.msra.mxu0 %v7638_v38  ;;  %v7644_v42 = vpop.eup %7643 }
 0x115   :  { %6796 = vmatprep.subr.mxu0 %v7640_v40  ;;  %v7646_v43 = vpop.eup %7645 }
 0x116   :  { %6797 = vmatpush3.msra.mxu0 %v7640_v40  ;;  %v7648_v44 = vpop.eup %7647 }
 0x117   :  { %6798 = vmatprep.subr.mxu0 %v7642_v41  ;;  %v7650_v45 = vpop.eup %7649 }
 0x118   :  { %6799 = vmatpush3.msra.mxu0 %v7642_v41  ;;  %v7652_v46 = vpop.eup %7651  ;;  %v6001_v41 = vld [vmem:[%s9764_s11] ss:$0 sm:$0xff] }
 0x119   :  { %6800 = vmatprep.subr.mxu0 %v7644_v42  ;;  %v7654_v47 = vpop.eup %7653 }
 0x11a   :  { %6801 = vmatpush3.msra.mxu0 %v7644_v42  ;;  %v7656_v48 = vpop.eup %7655 }
 0x11b   :  { %6802 = vmatprep.subr.mxu0 %v7646_v43 }
 0x11c   :  { %6803 = vmatpush3.msra.mxu0 %v7646_v43  ;;  %v6002_v43 = vld [vmem:[%s9765_s12] ss:$0 sm:$0xff] }
 0x11d   :  { %6804 = vmatprep.subr.mxu0 %v7648_v44 }
 0x11e   :  { %6805 = vmatpush3.msra.mxu0 %v7648_v44 }
 0x11f   :  { %6806 = vmatprep.subr.mxu0 %v7650_v45 }
 0x120   :  { %6807 = vmatpush3.msra.mxu0 %v7650_v45 }
 0x121   :  { %6808 = vmatprep.subr.mxu0 %v7652_v46 }
 0x122   :  { %6809 = vmatpush3.msra.mxu0 %v7652_v46 }
 0x123   :  { %6810 = vmatprep.subr.mxu0 %v7654_v47 }
 0x124   :  { %6811 = vmatpush3.msra.mxu0 %v7654_v47 }
 0x125   :  { %6812 = vmatprep.subr.mxu0 %v7656_v48 }
 0x126   :  { %6813 = vmatpush3.msra.mxu0 %v7656_v48 }
 0x127   :  { %6815 = vmatmul.mubr.msk.f32.vlgmr.msra.gmra.mxu0 %vm344_vm2, %v343_v49 }
 0x1e7   :  { %v6816_v50 = vpop.f32.mrf.mxu0 }
 0x1e8   :  { %7657 = vlog2.f32 %v6816_v50  ;;  %v8131_v50 = vld [vmem:[%s9767_s14] sm:$0xff] }
 0x1e9   :  { %v417_v51 = vpop.f32.mrf.mxu0 }
 0x1ea   :  { %7659 = vlog2.f32 %v417_v51  ;;  %v8138_v51 = vld [vmem:[%s9797_s25] ss:$0 sm:$0xff] }
 0x1f5   :  { %v7658_v52 = vpop.eup %7657 }
 0x1f6   :  { %v431_v54 = vmul.f32 0.6931472, %v7658_v52 }
 0x1f7   :  { %v7660_v55 = vpop.eup %7659 }
 0x1f8   :  { %v439_v56 = vmul.f32 %v5992_v53, %v431_v54  ;;  %v429_v57 = vmul.f32 0.6931472, %v7660_v55 }
 0x1fa   :  { %v442_v58 = vmul.f32 1.442695, %v439_v56  ;;  %v438_v59 = vmul.f32 %v5992_v53, %v429_v57 }
 0x1fc   :  { %7661 = vpow2.f32 %v442_v58  ;;  %v440_v60 = vmul.f32 1.442695, %v438_v59  ;;  %v8151_v58 = vld [vmem:[%s9767_s14 + $0x8] sm:$0xff]  ;;  %v8156_v59 = vld [vmem:[%s9767_s14 + $0x10] sm:$0xff] }
 0x1fe   :  { %7663 = vpow2.f32 %v440_v60  ;;  %v8165_v60 = vld [vmem:[%s9767_s14 + $0x18] sm:$0xff] }
 0x209   :  { %v7662_v62 = vpop.eup %7661 }
 0x20a   :  { %v453_v0 = vmul.f32 %v7662_v62, %v5994_v61  ;;  %v8179_v62 = vld [vmem:[%s9767_s14 + $0x28] sm:$0xff] }
 0x20b   :  { %v7664_v1 = vpop.eup %7663 }
 0x20c   :  { %v452_v2 = vmul.f32 %v7664_v1, %v5994_v61  ;;  %v463_v3 = vadd.f32 %v5996_v63, %v453_v0  ;;  %v8170_v61 = vld [vmem:[%s9767_s14 + $0x20] sm:$0xff]  ;;  %v8193_v0 = vld [vmem:[%s9767_s14 + $0x38] sm:$0xff] }
 0x20e   :  { %v462_v4 = vadd.f32 %v5996_v63, %v452_v2  ;;  %v5998_v5 = vmul.f32 -1.442695, %v463_v3  ;;  %v8184_v63 = vld [vmem:[%s9767_s14 + $0x30] sm:$0xff] }
 0x210   :  { %v5997_v6 = vmul.f32 -1.442695, %v462_v4  ;;  %7665 = vpow2.f32 %v5998_v5 }
 0x212   :  { %7667 = vpow2.f32 %v5997_v6 }
 0x21d   :  { %v7666_v7 = vpop.eup %7665 }
 0x21e   :  { %v471_v8 = vadd.f32 1.0, %v7666_v7  ;;  %v8200_v7 = vld [vmem:[%s9768_s15 + $0x38] sm:$0xff] }
 0x21f   :  { %v7668_v9 = vpop.eup %7667 }
 0x220   :  { %v470_v10 = vadd.f32 1.0, %v7668_v9  ;;  %7669 = vrcp.f32 %v471_v8  ;;  %v8205_v9 = vld [vmem:[%s9768_s15 + $0x30] sm:$0xff] }
 0x222   :  { %7671 = vrcp.f32 %v470_v10 }
 0x22d   :  { %v7670_v11 = vpop.eup %7669 }
 0x22e   :  { %v477_v14 = vmul.f32 %v7670_v11, %v463_v3 }
 0x22f   :  { %v7672_v12 = vpop.eup %7671 }
 0x230   :  { %v476_v13 = vmul.f32 %v7672_v12, %v462_v4  ;;  %v8084_v18 = vadd.f32 %v6000_v15, %v477_v14 }
 0x232   :  { %v8080_v16 = vadd.f32 %v6000_v15, %v476_v13  ;;  %v518_v19 = vsel %vm514_vm3, %v8084_v18, 0.0  ;;  %v8218_v13 = vld [vmem:[%s9768_s15 + $0x28] sm:$0xff]  ;;  %v8228_v15 = vld [vmem:[%s9768_s15 + $0x20] sm:$0xff] }
 0x234   :  { %v515_v17 = vsel %vm514_vm3, %v8080_v16, 0.0 }
 0x235   :  { %516 = vadd.xlane.f32.xlu0 %v515_v17 }
 0x239   :  { %519 = vadd.xlane.f32.xlu0 %v518_v19  ;;  %v8237_v19 = vld [vmem:[%s9768_s15 + $0x18] sm:$0xff] }
 0x2be   :  { %v517_v20 = vpop.xlane.xlu0 %516 }
 0x2bf   :  { %v522_v21 = vmul.f32 0.03125, %v517_v20 }
 0x2c1   :  { %v524_v22 = vsub.f32 %v8080_v16, %v522_v21  ;;  %v8245_v21 = vld [vmem:[%s9768_s15 + $0x10] sm:$0xff] }
 0x2c2   :  { %v520_v23 = vpop.xlane.xlu0 %519 }
 0x2c3   :  { %v523_v24 = vmul.f32 0.03125, %v520_v23  ;;  %v526_v25 = vmul.f32 %v524_v22, %v524_v22  ;;  %v8253_v23 = vld [vmem:[%s9768_s15 + $0x8] sm:$0xff] }
 0x2c5   :  { %v525_v26 = vsub.f32 %v8084_v18, %v523_v24  ;;  %v528_v27 = vsel %vm514_vm3, %v526_v25, 0.0  ;;  %v8261_v25 = vld [vmem:[%s9768_s15] sm:$0xff] }
 0x2c6   :  { %529 = vadd.xlane.f32.xlu1 %v528_v27  ;;  %v8274_v27 = vld [vmem:[%s9769_s16 + $0x38] sm:$0xff] }
 0x2c7   :  { %v527_v28 = vmul.f32 %v525_v26, %v525_v26 }
 0x2c9   :  { %v531_v29 = vsel %vm514_vm3, %v527_v28, 0.0  ;;  %v8279_v28 = vld [vmem:[%s9769_s16 + $0x30] sm:$0xff] }
 0x2ca   :  { %532 = vadd.xlane.f32.xlu1 %v531_v29  ;;  %v8286_v29 = vld [vmem:[%s9769_s16 + $0x28] sm:$0xff] }
 0x34f   :  { %v530_v34 = vpop.xlane.xlu1 %529 }
 0x350   :  { %v534_v35 = vmul.f32 0.03125, %v530_v34  ;;  %v8293_v34 = vld [vmem:[%s9769_s16 + $0x20] sm:$0xff] }
 0x352   :  { %v536_v36 = vadd.f32 1e-05, %v534_v35  ;;  %v8300_v35 = vld [vmem:[%s9769_s16 + $0x18] sm:$0xff] }
 0x353   :  { %v533_v37 = vpop.xlane.xlu1 %532 }
 0x354   :  { %7673 = vrsqrt.f32 %v536_v36  ;;  %v535_v38 = vmul.f32 0.03125, %v533_v37  ;;  %v8307_v36 = vld [vmem:[%s9769_s16 + $0x10] sm:$0xff]  ;;  %v8316_v37 = vld [vmem:[%s9773_s20 + $0x8] sm:$0xff] }
 0x356   :  { %v537_v39 = vadd.f32 1e-05, %v535_v38 }
 0x358   :  { %7675 = vrsqrt.f32 %v537_v39  ;;  %v8321_v39 = vld [vmem:[%s9773_s20] sm:$0xff] }
 0x361   :  { %v7674_v40 = vpop.eup %7673 }
 0x362   :  { %v540_v42 = vmul.f32 %v7674_v40, %v524_v22 }
 0x364   :  { %v549_v44 = vmul.f32 %v6001_v41, %v540_v42 }
 0x365   :  { %v7676_v45 = vpop.eup %7675 }
 0x366   :  { %v541_v46 = vmul.f32 %v7676_v45, %v525_v26  ;;  %v558_v47 = vadd.f32 %v6002_v43, %v549_v44  ;;  %v8330_v45 = vld [vmem:[%s9769_s16 + $0x8] sm:$0xff] }
 0x368   :  { %v550_v48 = vmul.f32 %v6001_v41, %v541_v46  ;;  %6825 = vmatprep.mubr.msk.f32.mxu1 %vm514_vm3, %v558_v47  ;;  %v8337_v46 = vld [vmem:[%s9769_s16] sm:$0xff] }
 0x36a   :  { %v559_v49 = vadd.f32 %v6002_v43, %v550_v48 }
 0x36c   :  { %6826 = vmatmul.mubr.msk.f32.vlgmr.msra.gmra.mxu1 %vm514_vm3, %v559_v49 }
 0x36d   :  { %6832 = vmatprep.mubr.msk.f32.mxu1 %vm660_vm4, %v8131_v50 }
 0x42c   :  { %v6827_v52 = vpop.f32.mrf.mxu1 }
 0x42d   :  { %v8141_v53 = vadd.f32 %v6827_v52, %v8138_v51 }
 0x42e   :  { %v643_v54 = vpop.f32.mrf.mxu1 }
 0x42f   :  { %v644_v55 = vadd.f32 %v8138_v51, %v643_v54  ;;  %656 = vrot.lane.b32.xlu0 %v8141_v53, %s7875_s1 }
 0x431   :  { %654 = vrot.lane.b32.xlu1 %v644_v55, %s7875_s1  ;;  %6860 = vmatprep.mubr.msk.f32.mxu0 %vm514_vm3, %v644_v55 }
 0x4a1   :  { %v657_v56 = vpop.permute.xlu0 %656 }
 0x4a2   :  { %6828 = vmatprep.subr.mxu1 %v657_v56 }
 0x4a3   :  { %6829 = vmatpush3.msra.mxu1 %v657_v56  ;;  %v655_v57 = vpop.permute.xlu1 %654 }
 0x4a4   :  { %6830 = vmatprep.subr.mxu1 %v655_v57 }
 0x4a5   :  { %6831 = vmatpush3.msra.mxu1 %v655_v57 }
 0x4a6   :  { %6833 = vmatmul.mubr.msk.f32.vlgmr.msra.gmra.mxu1 %vm660_vm4, %v8151_v58  ;;  %6863 = vmatprep.subr.mxu1 %v8274_v27 }
 0x4a7   :  { %6835 = vmatprep.mubr.msk.f32.mxu1 %vm660_vm4, %v8156_v59  ;;  %6864 = vmatpush3.msra.mxu1 %v8274_v27 }
 0x4a8   :  { %6865 = vmatprep.subr.mxu1 %v8279_v28 }
 0x4a9   :  { %6866 = vmatpush3.msra.mxu1 %v8279_v28 }
 0x4aa   :  { %6836 = vmatmul.mubr.msk.f32.gmra.mxu1 %vm660_vm4, %v8165_v60  ;;  %6867 = vmatprep.subr.mxu1 %v8286_v29 }
 0x4ab   :  { %6838 = vmatprep.mubr.msk.f32.mxu1 %vm660_vm4, %v8170_v61  ;;  %6868 = vmatpush3.msra.mxu1 %v8286_v29 }
 0x4ac   :  { %6869 = vmatprep.subr.mxu1 %v8293_v34 }
 0x4ad   :  { %6870 = vmatpush3.msra.mxu1 %v8293_v34 }
 0x4ae   :  { %6839 = vmatmul.mubr.msk.f32.gmra.mxu1 %vm660_vm4, %v8179_v62  ;;  %6871 = vmatprep.subr.mxu1 %v8300_v35 }
 0x4af   :  { %6841 = vmatprep.mubr.msk.f32.mxu1 %vm660_vm4, %v8184_v63  ;;  %6872 = vmatpush3.msra.mxu1 %v8300_v35 }
 0x4b0   :  { %6873 = vmatprep.subr.mxu1 %v8307_v36 }
 0x4b1   :  { %6874 = vmatpush3.msra.mxu1 %v8307_v36 }
 0x4b2   :  { %6842 = vmatmul.mubr.msk.f32.gmra.mxu1 %vm660_vm4, %v8193_v0  ;;  %6875 = vmatprep.subr.mxu1 %v8330_v45 }
 0x4b3   :  { %6876 = vmatpush3.msra.mxu1 %v8330_v45 }
 0x4b4   :  { %6877 = vmatprep.subr.mxu1 %v8337_v46 }
 0x4b5   :  { %6878 = vmatpush3.msra.mxu1 %v8337_v46 }
 0x566   :  { %v6834_v1 = vpop.f32.mrf.mxu1 }
 0x567   :  { %v791_v24 = vmul.f32 %v6834_v1, %v8253_v23 }
 0x568   :  { %v751_v2 = vpop.f32.mrf.mxu1 }
 0x569   :  { %v790_v26 = vmul.f32 %v751_v2, %v8261_v25 }
 0x56a   :  { %v6837_v3 = vpop.f32.mrf.mxu1 }
 0x56b   :  { %v793_v20 = vmul.f32 %v6837_v3, %v8237_v19 }
 0x56c   :  { %v761_v4 = vpop.f32.mrf.mxu1 }
 0x56d   :  { %v792_v22 = vmul.f32 %v761_v4, %v8245_v21 }
 0x56e   :  { %v6840_v5 = vpop.f32.mrf.mxu1 }
 0x56f   :  { %v795_v14 = vmul.f32 %v6840_v5, %v8218_v13 }
 0x570   :  { %v771_v6 = vpop.f32.mrf.mxu1 }
 0x571   :  { %v794_v17 = vmul.f32 %v771_v6, %v8228_v15 }
 0x572   :  { %v6843_v8 = vpop.f32.mrf.mxu1 }
 0x573   :  { %v8208_v10 = vmul.f32 %v6843_v8, %v8200_v7 }
 0x574   :  { %v781_v11 = vpop.f32.mrf.mxu1 }
 0x575   :  { %v8211_v12 = vmul.f32 %v781_v11, %v8205_v9  ;;  %6844 = vmatprep.subr.msk.mxu0 %vm514_vm3, %v8208_v10 }
 0x576   :  { %6845 = vmatpush3.xpose.msk.msra.mxu0 %vm514_vm3, %v8208_v10 }
 0x577   :  { %6846 = vmatprep.subr.msk.mxu0 %vm514_vm3, %v8211_v12 }
 0x57a   :  { %6847 = vmatpush3.xpose.msk.msra.mxu0 %vm514_vm3, %v8211_v12 }
 0x57b   :  { %6848 = vmatprep.subr.msk.mxu0 %vm514_vm3, %v795_v14 }
 0x57e   :  { %6849 = vmatpush3.xpose.msk.msra.mxu0 %vm514_vm3, %v795_v14 }
 0x57f   :  { %6850 = vmatprep.subr.msk.mxu0 %vm514_vm3, %v794_v17 }
 0x582   :  { %6851 = vmatpush3.xpose.msk.msra.mxu0 %vm514_vm3, %v794_v17 }
 0x583   :  { %6852 = vmatprep.subr.msk.mxu0 %vm514_vm3, %v793_v20 }
 0x586   :  { %6853 = vmatpush3.xpose.msk.msra.mxu0 %vm514_vm3, %v793_v20 }
 0x587   :  { %6854 = vmatprep.subr.msk.mxu0 %vm514_vm3, %v792_v22 }
 0x58a   :  { %6855 = vmatpush3.xpose.msk.msra.mxu0 %vm514_vm3, %v792_v22 }
 0x58b   :  { %6856 = vmatprep.subr.msk.mxu0 %vm514_vm3, %v791_v24 }
 0x58e   :  { %6857 = vmatpush3.xpose.msk.msra.mxu0 %vm514_vm3, %v791_v24 }
 0x58f   :  { %6858 = vmatprep.subr.msk.mxu0 %vm514_vm3, %v790_v26 }
 0x592   :  { %6859 = vmatpush3.xpose.msk.msra.mxu0 %vm514_vm3, %v790_v26 }
 0x595   :  { %6861 = vmatmul.mubr.msk.f32.vlgmr.msra.gmra.mxu0 %vm514_vm3, %v8141_v53 }
 0x655   :  { %v6862_v38 = vpop.f32.mrf.mxu0 }
 0x656   :  { %v898_v40 = vadd.f32 %v6862_v38, %v8316_v37 }
 0x657   :  { %v892_v41 = vpop.f32.mrf.mxu0 }
 0x658   :  { %v893_v42 = vadd.f32 %v892_v41, %v8321_v39  ;;  %v905_v43 = vsel %vm901_vm5, %v898_v40, -inf }
 0x659   :  { %906 = vmax.xlane.f32.xlu0 %v905_v43 }
 0x65a   :  { %v902_v44 = vsel %vm901_vm5, %v893_v42, -inf }
 0x65b   :  { %903 = vmax.xlane.f32.xlu1 %v902_v44 }
 0x66c   :  { %1011 = vrot.lane.b32.xlu1 %v8211_v12, %s7875_s1 }
 0x66f   :  { %1013 = vrot.lane.b32.xlu0 %v8208_v10, %s7875_s1 }
 0x670   :  { %1009 = vrot.lane.b32.xlu1 %v795_v14, %s7875_s1 }
 0x673   :  { %1005 = vrot.lane.b32.xlu0 %v793_v20, %s7875_s1 }
 0x674   :  { %1007 = vrot.lane.b32.xlu1 %v794_v17, %s7875_s1 }
 0x677   :  { %1001 = vrot.lane.b32.xlu0 %v791_v24, %s7875_s1 }
 0x678   :  { %1003 = vrot.lane.b32.xlu1 %v792_v22, %s7875_s1 }
 0x67b   :  { %1114 = vrot.lane.b32.xlu0 %v8095_v30, %s7876_s30 }
 0x67c   :  { %999 = vrot.lane.b32.xlu1 %v790_v26, %s7875_s1 }
 0x67f   :  { %1110 = vrot.lane.b32.xlu0 %v8107_v32, %s7876_s30 }
 0x680   :  { %1112 = vrot.lane.b32.xlu1 %v8100_v31, %s7876_s30 }
 0x683   :  { %1120 = vrot.lane.b32.xlu0 %v8138_v51, %s7876_s30 }
 0x684   :  { %1108 = vrot.lane.b32.xlu1 %v8116_v33, %s7876_s30 }
 0x6e2   :  { %v907_v47 = vpop.xlane.xlu0 %906 }
 0x6e3   :  { %v909_v48 = vsub.f32 %v898_v40, %v907_v47 }
 0x6e4   :  { %v904_v49 = vpop.xlane.xlu1 %903 }
 0x6e5   :  { %v908_v52 = vsub.f32 %v893_v42, %v904_v49  ;;  %v912_v53 = vmul.f32 1.442695, %v909_v48 }
 0x6e6   :  { %v1014_v54 = vpop.permute.xlu0 %1013 }
 0x6e7   :  { %v910_v55 = vmul.f32 1.442695, %v908_v52  ;;  %6882 = vmatprep.subr.mxu1 %v1014_v54 }
 0x6e8   :  { %v1012_v56 = vpop.permute.xlu1 %1011 }
 0x6e9   :  { %7677 = vpow2.f32 %v910_v55 }
 0x6ea   :  { %7679 = vpow2.f32 %v912_v53  ;;  %v1006_v4 = vpop.permute.xlu0 %1005 }
 0x6ec   :  { %v1010_v57 = vpop.permute.xlu1 %1009 }
 0x6ee   :  { %v1002_v6 = vpop.permute.xlu0 %1001 }
 0x6f0   :  { %v1008_v3 = vpop.permute.xlu1 %1007 }
 0x6f2   :  { %v1115_v12 = vpop.permute.xlu0 %1114 }
 0x6f3   :  { %6901 = vmatprep.subr.mxu0 %v1115_v12 }
 0x6f4   :  { %v1004_v5 = vpop.permute.xlu1 %1003  ;;  %6902 = vmatpush3.msra.mxu0 %v1115_v12 }
 0x6f6   :  { %v7678_v1 = vpop.eup %7677  ;;  %v1111_v30 = vpop.permute.xlu0 %1110 }
 0x6f7   :  { %v7680_v2 = vpop.eup %7679  ;;  %6879 = vmatprep.mubr.msk.f32.mxu1 %vm901_vm5, %v7678_v1 }
 0x6f8   :  { %6880 = vmatmul.mubr.msk.f32.vlgmr.msra.gmra.mxu1 %vm901_vm5, %v7680_v2  ;;  %v1000_v8 = vpop.permute.xlu1 %999 }
 0x6f9   :  { %6883 = vmatpush3.msra.mxu1 %v1014_v54 }
 0x6fa   :  { %6884 = vmatprep.subr.mxu1 %v1012_v56  ;;  %v1121_v24 = vpop.permute.xlu0 %1120 }
 0x6fb   :  { %6885 = vmatpush3.msra.mxu1 %v1012_v56 }
 0x6fc   :  { %6886 = vmatprep.subr.mxu1 %v1010_v57  ;;  %v1113_v14 = vpop.permute.xlu1 %1112 }
 0x6fd   :  { %6887 = vmatpush3.msra.mxu1 %v1010_v57  ;;  %6903 = vmatprep.subr.mxu0 %v1113_v14 }
 0x6fe   :  { %6888 = vmatprep.subr.mxu1 %v1008_v3  ;;  %6904 = vmatpush3.msra.mxu0 %v1113_v14 }
 0x6ff   :  { %6889 = vmatpush3.msra.mxu1 %v1008_v3  ;;  %6905 = vmatprep.subr.mxu0 %v1111_v30  ;;  %v1253_v3 = vld [vmem:[%s9798_s2 + $0x8] sm:$0xff] }
 0x700   :  { %6890 = vmatprep.subr.mxu1 %v1006_v4  ;;  %6906 = vmatpush3.msra.mxu0 %v1111_v30  ;;  %v1109_v51 = vpop.permute.xlu1 %1108  ;;  %v6031_v30 = vld [vmem:[%s9764_s11 + $0x1] ss:$0 sm:$0xff] }
 0x701   :  { %6891 = vmatpush3.msra.mxu1 %v1006_v4  ;;  %6907 = vmatprep.subr.mxu0 %v1109_v51  ;;  %v1252_v4 = vld [vmem:[%s9798_s2] sm:$0xff] }
 0x702   :  { %6892 = vmatprep.subr.mxu1 %v1004_v5  ;;  %6908 = vmatpush3.msra.mxu0 %v1109_v51 }
 0x703   :  { %6893 = vmatpush3.msra.mxu1 %v1004_v5 }
 0x704   :  { %6894 = vmatprep.subr.mxu1 %v1002_v6 }
 0x705   :  { %6895 = vmatpush3.msra.mxu1 %v1002_v6 }
 0x706   :  { %6896 = vmatprep.subr.mxu1 %v1000_v8 }
 0x707   :  { %6897 = vmatpush3.msra.mxu1 %v1000_v8 }
 0x7b8   :  { %v6881_v10 = vpop.f32.mrf.mxu1 }
 0x7b9   :  { %7681 = vrcp.f32 %v6881_v10 }
 0x7ba   :  { %v986_v11 = vpop.f32.mrf.mxu1 }
 0x7bb   :  { %7683 = vrcp.f32 %v986_v11 }
 0x7c6   :  { %v7682_v31 = vpop.eup %7681 }
 0x7c7   :  { %v998_v33 = vmul.f32 %v7682_v31, %v7680_v2  ;;  %v1254_v2 = vld [vmem:[%s9798_s2 + $0x10] sm:$0xff] }
 0x7c8   :  { %v7684_v32 = vpop.eup %7683 }
 0x7c9   :  { %v997_v17 = vmul.f32 %v7684_v32, %v7678_v1  ;;  %v1255_v1 = vld [vmem:[%s9798_s2 + $0x18] sm:$0xff]  ;;  %v6033_v32 = vld [vmem:[%s9765_s12 + $0x1] ss:$0 sm:$0xff] }
 0x7ca   :  { %6912 = vmatprep.subr.mxu1 %v1255_v1 }
 0x7cb   :  { %6898 = vmatprep.mubr.msk.f32.mxu1 %vm901_vm5, %v997_v17 }
 0x7cc   :  { %6899 = vmatmul.mubr.msk.f32.vlgmr.msra.gmra.mxu1 %vm901_vm5, %v998_v33 }
 0x7cd   :  { %6913 = vmatpush3.msra.mxu1 %v1255_v1  ;;  %v6034_v1 = vld [vmem:[%s9761_s8] ss:$0 sm:$0xff] }
 0x7ce   :  { %6914 = vmatprep.subr.mxu1 %v1254_v2 }
 0x7cf   :  { %6915 = vmatpush3.msra.mxu1 %v1254_v2 }
 0x7d0   :  { %6916 = vmatprep.subr.mxu1 %v1253_v3 }
 0x7d1   :  { %6917 = vmatpush3.msra.mxu1 %v1253_v3 }
 0x7d2   :  { %6918 = vmatprep.subr.mxu1 %v1252_v4 }
 0x7d3   :  { %6919 = vmatpush3.msra.mxu1 %v1252_v4 }
 0x88c   :  { %v6900_v20 = vpop.f32.mrf.mxu1 }
 0x88e   :  { %v1095_v22 = vpop.f32.mrf.mxu1 }
 0x88f   :  { %6909 = vmatprep.mubr.msk.f32.mxu0 %vm514_vm3, %v1095_v22 }
 0x890   :  { %6910 = vmatmul.mubr.msk.f32.vlgmr.msra.gmra.mxu0 %vm514_vm3, %v6900_v20 }
 0x950   :  { %v6911_v26 = vpop.f32.mrf.mxu0 }
 0x951   :  { %v1201_v38 = vadd.f32 %v6911_v26, %v1121_v24  ;;  %v1377_v26 = vld [vmem:[%s9762_s9 + $0x78] sm:$0xff] }
 0x952   :  { %v1195_v40 = vpop.f32.mrf.mxu0  ;;  %6923 = vmatprep.subr.mxu0 %v1377_v26 }
 0x953   :  { %v8368_v41 = vadd.f32 %v1201_v38, %v8084_v18  ;;  %v1196_v42 = vadd.f32 %v1195_v40, %v1121_v24  ;;  %6924 = vmatpush3.msra.mxu0 %v1377_v26  ;;  %v1376_v38 = vld [vmem:[%s9762_s9 + $0x70] sm:$0xff]  ;;  %v1375_v40 = vld [vmem:[%s9762_s9 + $0x68] sm:$0xff] }
 0x954   :  { %6925 = vmatprep.subr.mxu0 %v1376_v38 }
 0x955   :  { %v8371_v43 = vadd.f32 %v1196_v42, %v8080_v16  ;;  %v1209_v44 = vsel %vm514_vm3, %v8368_v41, 0.0  ;;  %6926 = vmatpush3.msra.mxu0 %v1376_v38  ;;  %v1374_v42 = vld [vmem:[%s9762_s9 + $0x60] sm:$0xff] }
 0x956   :  { %1210 = vadd.xlane.f32.xlu0 %v1209_v44  ;;  %6927 = vmatprep.subr.mxu0 %v1375_v40  ;;  %v1373_v44 = vld [vmem:[%s9762_s9 + $0x58] sm:$0xff] }
 0x957   :  { %v1206_v47 = vsel %vm514_vm3, %v8371_v43, 0.0  ;;  %6928 = vmatpush3.msra.mxu0 %v1375_v40 }
 0x958   :  { %1207 = vadd.xlane.f32.xlu1 %v1206_v47  ;;  %6929 = vmatprep.subr.mxu0 %v1374_v42  ;;  %v1372_v47 = vld [vmem:[%s9762_s9 + $0x50] sm:$0xff] }
 0x959   :  { %6930 = vmatpush3.msra.mxu0 %v1374_v42 }
 0x95a   :  { %6931 = vmatprep.subr.mxu0 %v1373_v44 }
 0x95b   :  { %6932 = vmatpush3.msra.mxu0 %v1373_v44 }
 0x95c   :  { %6933 = vmatprep.subr.mxu0 %v1372_v47 }
 0x95d   :  { %6934 = vmatpush3.msra.mxu0 %v1372_v47 }
 0x9df   :  { %v1211_v48 = vpop.xlane.xlu0 %1210 }
 0x9e0   :  { %v1213_v49 = vmul.f32 0.03125, %v1211_v48  ;;  %v1371_v48 = vld [vmem:[%s9762_s9 + $0x48] sm:$0xff] }
 0x9e1   :  { %v1208_v52 = vpop.xlane.xlu1 %1207  ;;  %6935 = vmatprep.subr.mxu0 %v1371_v48 }
 0x9e2   :  { %v1212_v53 = vmul.f32 0.03125, %v1208_v52  ;;  %v1215_v54 = vsub.f32 %v8368_v41, %v1213_v49  ;;  %v1370_v49 = vld [vmem:[%s9762_s9 + $0x40] sm:$0xff]  ;;  %6936 = vmatpush3.msra.mxu0 %v1371_v48  ;;  %v1369_v52 = vld [vmem:[%s9762_s9 + $0x38] sm:$0xff] }
 0x9e3   :  { %6937 = vmatprep.subr.mxu0 %v1370_v49 }
 0x9e4   :  { %v1214_v18 = vsub.f32 %v8371_v43, %v1212_v53  ;;  %v1217_v56 = vmul.f32 %v1215_v54, %v1215_v54  ;;  %6938 = vmatpush3.msra.mxu0 %v1370_v49  ;;  %v1368_v53 = vld [vmem:[%s9762_s9 + $0x30] sm:$0xff] }
 0x9e5   :  { %6939 = vmatprep.subr.mxu0 %v1369_v52 }
 0x9e6   :  { %v1216_v55 = vmul.f32 %v1214_v18, %v1214_v18  ;;  %v1221_v57 = vsel %vm514_vm3, %v1217_v56, 0.0  ;;  %6940 = vmatpush3.msra.mxu0 %v1369_v52  ;;  %v1363_v56 = vld [vmem:[%s9762_s9 + $0x8] sm:$0xff] }
 0x9e7   :  { %6941 = vmatprep.subr.mxu0 %v1368_v53 }
 0x9e8   :  { %v1218_v16 = vsel %vm514_vm3, %v1216_v55, 0.0  ;;  %6942 = vmatpush3.msra.mxu0 %v1368_v53  ;;  %v1365_v55 = vld [vmem:[%s9762_s9 + $0x18] sm:$0xff] }
 0x9e9   :  { %1219 = vadd.xlane.f32.xlu0 %v1218_v16  ;;  %v1364_v16 = vld [vmem:[%s9762_s9 + $0x10] sm:$0xff] }
 0x9ed   :  { %1222 = vadd.xlane.f32.xlu0 %v1221_v57  ;;  %v1362_v57 = vld [vmem:[%s9762_s9] sm:$0xff] }
 0xa72   :  { %v1220_v5 = vpop.xlane.xlu0 %1219 }
 0xa73   :  { %v1224_v6 = vmul.f32 0.03125, %v1220_v5 }
 0xa75   :  { %v1226_v8 = vadd.f32 1e-05, %v1224_v6 }
 0xa76   :  { %v1223_v10 = vpop.xlane.xlu0 %1222 }
 0xa77   :  { %7685 = vrsqrt.f32 %v1226_v8  ;;  %v1225_v11 = vmul.f32 0.03125, %v1223_v10 }
 0xa79   :  { %v1227_v12 = vadd.f32 1e-05, %v1225_v11 }
 0xa7b   :  { %7687 = vrsqrt.f32 %v1227_v12 }
 0xa84   :  { %v7686_v14 = vpop.eup %7685 }
 0xa85   :  { %v1230_v31 = vmul.f32 %v7686_v14, %v1214_v18  ;;  %v1366_v18 = vld [vmem:[%s9762_s9 + $0x20] sm:$0xff] }
 0xa87   :  { %v1240_v17 = vmul.f32 %v6031_v30, %v1230_v31 }
 0xa88   :  { %v7688_v33 = vpop.eup %7687 }
 0xa89   :  { %v1231_v51 = vmul.f32 %v7688_v33, %v1215_v54  ;;  %v1250_v20 = vadd.f32 %v6033_v32, %v1240_v17  ;;  %v1367_v54 = vld [vmem:[%s9762_s9 + $0x28] sm:$0xff] }
 0xa8a   :  { %6943 = vmatprep.subr.mxu0 %v1367_v54 }
 0xa8b   :  { %v1241_v22 = vmul.f32 %v6031_v30, %v1231_v51  ;;  %6920 = vmatprep.mubr.msk.f32.mxu1 %vm514_vm3, %v1250_v20  ;;  %6944 = vmatpush3.msra.mxu0 %v1367_v54 }
 0xa8c   :  { %6945 = vmatprep.subr.mxu0 %v1366_v18 }
 0xa8d   :  { %v1251_v24 = vadd.f32 %v6033_v32, %v1241_v22  ;;  %6946 = vmatpush3.msra.mxu0 %v1366_v18 }
 0xa8e   :  { %6947 = vmatprep.subr.mxu0 %v1365_v55 }
 0xa8f   :  { %6921 = vmatmul.mubr.msk.f32.vlgmr.msra.gmra.mxu1 %vm514_vm3, %v1251_v24  ;;  %6948 = vmatpush3.msra.mxu0 %v1365_v55  ;;  %v8488_v55 = vld [vmem:[%s9796_s5 + $0x38] sm:$0xff] }
 0xa90   :  { %6949 = vmatprep.subr.mxu0 %v1364_v16  ;;  %6958 = vmatprep.subr.mxu1 %v8488_v55 }
 0xa91   :  { %6950 = vmatpush3.msra.mxu0 %v1364_v16  ;;  %v8493_v16 = vld [vmem:[%s9796_s5 + $0x30] sm:$0xff]  ;;  %6959 = vmatpush3.msra.mxu1 %v8488_v55 }
 0xa92   :  { %6951 = vmatprep.subr.mxu0 %v1363_v56  ;;  %6960 = vmatprep.subr.mxu1 %v8493_v16 }
 0xa93   :  { %6952 = vmatpush3.msra.mxu0 %v1363_v56  ;;  %v8500_v56 = vld [vmem:[%s9796_s5 + $0x28] sm:$0xff]  ;;  %6961 = vmatpush3.msra.mxu1 %v8493_v16 }
 0xa94   :  { %6953 = vmatprep.subr.mxu0 %v1362_v57  ;;  %6962 = vmatprep.subr.mxu1 %v8500_v56 }
 0xa95   :  { %6954 = vmatpush3.msra.mxu0 %v1362_v57  ;;  %v8507_v57 = vld [vmem:[%s9796_s5 + $0x20] sm:$0xff]  ;;  %6963 = vmatpush3.msra.mxu1 %v8500_v56 }
 0xa96   :  { %7004 = vmatprep.subr.mxu0 %v8274_v27  ;;  %6964 = vmatprep.subr.mxu1 %v8507_v57 }
 0xa97   :  { %6965 = vmatpush3.msra.mxu1 %v8507_v57 }
 0xb4f   :  { %v6922_v2 = vpop.f32.mrf.mxu1 }
 0xb50   :  { %v1341_v3 = vadd.f32 %v6922_v2, %v6034_v1 }
 0xb51   :  { %v1335_v4 = vpop.f32.mrf.mxu1 }
 0xb52   :  { %v1347_v5 = vmul.f32 0.044715, %v1341_v3  ;;  %v1336_v6 = vadd.f32 %v6034_v1, %v1335_v4  ;;  %v1345_v26 = vmul.f32 0.5, %v1341_v3 }
 0xb54   :  { %v1349_v8 = vmul.f32 %v1347_v5, %v1341_v3  ;;  %v1346_v10 = vmul.f32 0.044715, %v1336_v6  ;;  %v1344_v22 = vmul.f32 0.5, %v1336_v6 }
 0xb56   :  { %v1351_v11 = vmul.f32 %v1349_v8, %v1341_v3  ;;  %v1348_v12 = vmul.f32 %v1346_v10, %v1336_v6 }
 0xb58   :  { %v1353_v14 = vadd.f32 %v1351_v11, %v1341_v3  ;;  %v1350_v30 = vmul.f32 %v1348_v12, %v1336_v6  ;;  %v6039_v11 = vld [vmem:[%s9764_s11 + $0x2] ss:$0 sm:$0xff] }
 0xb5a   :  { %v1352_v31 = vadd.f32 %v1350_v30, %v1336_v6  ;;  %v1355_v32 = vmul.f32 0.7978846, %v1353_v14 }
 0xb5c   :  { %v1354_v17 = vmul.f32 0.7978846, %v1352_v31  ;;  %7689 = vtanh.f32 %v1355_v32  ;;  %v6041_v32 = vld [vmem:[%s9765_s12 + $0x2] ss:$0 sm:$0xff] }
 0xb5e   :  { %7691 = vtanh.f32 %v1354_v17 }
 0xb69   :  { %v7690_v33 = vpop.eup %7689 }
 0xb6a   :  { %v1359_v20 = vadd.f32 1.0, %v7690_v33 }
 0xb6b   :  { %v7692_v51 = vpop.eup %7691 }
 0xb6c   :  { %v1358_v24 = vadd.f32 1.0, %v7692_v51  ;;  %v1361_v40 = vmul.f32 %v1359_v20, %v1345_v26  ;;  %v8526_v51 = vld [vmem:[%s9797_s25 + $0x1] ss:$0 sm:$0xff] }
 0xb6e   :  { %v1360_v38 = vmul.f32 %v1358_v24, %v1344_v22 }
 0xb70   :  { %6955 = vmatprep.mubr.f32.mxu0 %v1360_v38 }
 0xb71   :  { %6956 = vmatmul.mubr.f32.vlgmr.msra.gmra.mxu0 %v1361_v40 }
 0xb72   :  { %7005 = vmatpush3.msra.mxu0 %v8274_v27  ;;  %v6037_v27 = vld [vmem:[%s9763_s10] ss:$0 sm:$0xff] }
 0xb73   :  { %7006 = vmatprep.subr.mxu0 %v8279_v28 }
 0xb74   :  { %7007 = vmatpush3.msra.mxu0 %v8279_v28 }
 0xb75   :  { %7008 = vmatprep.subr.mxu0 %v8286_v29 }
 0xb76   :  { %7009 = vmatpush3.msra.mxu0 %v8286_v29 }
 0xb77   :  { %7010 = vmatprep.subr.mxu0 %v8293_v34 }
 0xb78   :  { %7011 = vmatpush3.msra.mxu0 %v8293_v34 }
 0xb79   :  { %7012 = vmatprep.subr.mxu0 %v8300_v35 }
 0xb7a   :  { %7013 = vmatpush3.msra.mxu0 %v8300_v35 }
 0xb7b   :  { %7014 = vmatprep.subr.mxu0 %v8307_v36 }
 0xb7c   :  { %7015 = vmatpush3.msra.mxu0 %v8307_v36 }
 0xb7d   :  { %7016 = vmatprep.subr.mxu0 %v8330_v45 }
 0xb7e   :  { %7017 = vmatpush3.msra.mxu0 %v8330_v45 }
 0xb7f   :  { %7018 = vmatprep.subr.mxu0 %v8337_v46 }
 0xb80   :  { %7019 = vmatpush3.msra.mxu0 %v8337_v46 }
 0xc31   :  { %v6957_v28 = vpop.f32.mrf.mxu0 }
 0xc32   :  { %v1457_v29 = vadd.f32 %v6957_v28, %v6037_v27 }
 0xc33   :  { %v1451_v34 = vpop.f32.mrf.mxu0 }
 0xc34   :  { %v8472_v35 = vadd.f32 %v1457_v29, %v8368_v41  ;;  %v1452_v42 = vadd.f32 %v6037_v27, %v1451_v34 }
 0xc36   :  { %v8475_v36 = vadd.f32 %v1452_v42, %v8371_v43  ;;  %v1465_v45 = vsel %vm514_vm3, %v8472_v35, 0.0 }
 0xc37   :  { %1466 = vadd.xlane.f32.xlu0 %v1465_v45 }
 0xc38   :  { %v1462_v46 = vsel %vm514_vm3, %v8475_v36, 0.0 }
 0xc39   :  { %1463 = vadd.xlane.f32.xlu1 %v1462_v46 }
 0xcc0   :  { %v1467_v44 = vpop.xlane.xlu0 %1466 }
 0xcc1   :  { %v1469_v47 = vmul.f32 0.03125, %v1467_v44 }
 0xcc2   :  { %v1464_v48 = vpop.xlane.xlu1 %1463 }
 0xcc3   :  { %v1471_v49 = vsub.f32 %v8472_v35, %v1469_v47  ;;  %v1468_v52 = vmul.f32 0.03125, %v1464_v48 }
 0xcc5   :  { %v1470_v41 = vsub.f32 %v8475_v36, %v1468_v52  ;;  %v1473_v53 = vmul.f32 %v1471_v49, %v1471_v49 }
 0xcc7   :  { %v1477_v43 = vsel %vm514_vm3, %v1473_v53, 0.0  ;;  %v1472_v54 = vmul.f32 %v1470_v41, %v1470_v41 }
 0xcc8   :  { %1478 = vadd.xlane.f32.xlu0 %v1477_v43 }
 0xcc9   :  { %v1474_v18 = vsel %vm514_vm3, %v1472_v54, 0.0 }
 0xcca   :  { %1475 = vadd.xlane.f32.xlu1 %v1474_v18 }
 0xd51   :  { %v1479_v1 = vpop.xlane.xlu0 %1478 }
 0xd52   :  { %v1481_v2 = vmul.f32 0.03125, %v1479_v1 }
 0xd53   :  { %v1476_v3 = vpop.xlane.xlu1 %1475 }
 0xd54   :  { %v1483_v4 = vadd.f32 1e-05, %v1481_v2  ;;  %v1480_v5 = vmul.f32 0.03125, %v1476_v3 }
 0xd56   :  { %7693 = vrsqrt.f32 %v1483_v4  ;;  %v1482_v6 = vadd.f32 1e-05, %v1480_v5 }
 0xd58   :  { %7695 = vrsqrt.f32 %v1482_v6 }
 0xd63   :  { %v7694_v8 = vpop.eup %7693 }
 0xd64   :  { %v1487_v10 = vmul.f32 %v7694_v8, %v1471_v49 }
 0xd65   :  { %v7696_v12 = vpop.eup %7695 }
 0xd66   :  { %v1486_v14 = vmul.f32 %v7696_v12, %v1470_v41  ;;  %v1497_v30 = vmul.f32 %v6039_v11, %v1487_v10 }
 0xd68   :  { %v1496_v31 = vmul.f32 %v6039_v11, %v1486_v14  ;;  %v1507_v33 = vadd.f32 %v6041_v32, %v1497_v30 }
 0xd6a   :  { %v1506_v17 = vadd.f32 %v6041_v32, %v1496_v31 }
 0xd6c   :  { %6966 = vmatprep.mubr.msk.f32.mxu1 %vm514_vm3, %v1506_v17 }
 0xd6d   :  { %6967 = vmatmul.mubr.msk.f32.vlgmr.msra.gmra.mxu1 %vm514_vm3, %v1507_v33 }
 0xd6e   :  { %6973 = vmatprep.mubr.msk.f32.mxu1 %vm660_vm4, %v8131_v50 }
 0xe2d   :  { %v6968_v20 = vpop.f32.mrf.mxu1 }
 0xe2e   :  { %v1599_v22 = vadd.f32 %v6968_v20, %v8526_v51 }
 0xe2f   :  { %v1593_v24 = vpop.f32.mrf.mxu1 }
 0xe30   :  { %v1594_v26 = vadd.f32 %v8526_v51, %v1593_v24  ;;  %1606 = vrot.lane.b32.xlu1 %v1599_v22, %s7875_s1  ;;  %v8611_v24 = vld [vmem:[%s9799_s27] sm:$0xff] }
 0xe32   :  { %1604 = vrot.lane.b32.xlu0 %v1594_v26, %s7875_s1 }
 0xea2   :  { %v1607_v38 = vpop.permute.xlu1 %1606 }
 0xea3   :  { %6969 = vmatprep.subr.mxu1 %v1607_v38 }
 0xea4   :  { %6970 = vmatpush3.msra.mxu1 %v1607_v38  ;;  %v1605_v40 = vpop.permute.xlu0 %1604 }
 0xea5   :  { %6971 = vmatprep.subr.mxu1 %v1605_v40 }
 0xea6   :  { %6972 = vmatpush3.msra.mxu1 %v1605_v40 }
 0xea7   :  { %6974 = vmatmul.mubr.msk.f32.vlgmr.msra.gmra.mxu1 %vm660_vm4, %v8151_v58 }
 0xea8   :  { %6976 = vmatprep.mubr.msk.f32.mxu1 %vm660_vm4, %v8156_v59 }
 0xeab   :  { %6977 = vmatmul.mubr.msk.f32.gmra.mxu1 %vm660_vm4, %v8165_v60 }
 0xeac   :  { %6979 = vmatprep.mubr.msk.f32.mxu1 %vm660_vm4, %v8170_v61 }
 0xeaf   :  { %6980 = vmatmul.mubr.msk.f32.gmra.mxu1 %vm660_vm4, %v8179_v62 }
 0xeb0   :  { %6982 = vmatprep.mubr.msk.f32.mxu1 %vm660_vm4, %v8184_v63 }
 0xeb3   :  { %6983 = vmatmul.mubr.msk.f32.gmra.mxu1 %vm660_vm4, %v8193_v0 }
 0xeb4   :  { %7001 = vmatprep.mubr.msk.f32.mxu1 %vm514_vm3, %v1594_v26 }
 0xf67   :  { %v6975_v50 = vpop.f32.mrf.mxu1 }
 0xf69   :  { %v1676_v58 = vpop.f32.mrf.mxu1 }
 0xf6b   :  { %v6978_v59 = vpop.f32.mrf.mxu1 }
 0xf6d   :  { %v1686_v27 = vpop.f32.mrf.mxu1 }
 0xf6f   :  { %v6981_v28 = vpop.f32.mrf.mxu1 }
 0xf70   :  { %v1720_v63 = vmul.f32 %v6981_v28, %v8218_v13  ;;  %v1716_v13 = vmul.f32 %v6975_v50, %v8253_v23 }
 0xf71   :  { %v1696_v60 = vpop.f32.mrf.mxu1 }
 0xf72   :  { %v1719_v0 = vmul.f32 %v1696_v60, %v8228_v15  ;;  %v1715_v15 = vmul.f32 %v1676_v58, %v8261_v25 }
 0xf73   :  { %v6984_v29 = vpop.f32.mrf.mxu1 }
 0xf74   :  { %v1722_v61 = vmul.f32 %v6984_v29, %v8200_v7  ;;  %v1718_v7 = vmul.f32 %v6978_v59, %v8237_v19 }
 0xf75   :  { %v1706_v34 = vpop.f32.mrf.mxu1 }
 0xf76   :  { %v1721_v62 = vmul.f32 %v1706_v34, %v8205_v9  ;;  %6985 = vmatprep.subr.msk.mxu1 %vm514_vm3, %v1722_v61  ;;  %v1717_v9 = vmul.f32 %v1686_v27, %v8245_v21 }
 0xf77   :  { %6986 = vmatpush3.xpose.msk.msra.mxu1 %vm514_vm3, %v1722_v61 }
 0xf78   :  { %6987 = vmatprep.subr.msk.mxu1 %vm514_vm3, %v1721_v62 }
 0xf7b   :  { %6988 = vmatpush3.xpose.msk.msra.mxu1 %vm514_vm3, %v1721_v62 }
 0xf7c   :  { %6989 = vmatprep.subr.msk.mxu1 %vm514_vm3, %v1720_v63 }
 0xf7f   :  { %6990 = vmatpush3.xpose.msk.msra.mxu1 %vm514_vm3, %v1720_v63 }
 0xf80   :  { %6991 = vmatprep.subr.msk.mxu1 %vm514_vm3, %v1719_v0 }
 0xf83   :  { %6992 = vmatpush3.xpose.msk.msra.mxu1 %vm514_vm3, %v1719_v0 }
 0xf84   :  { %6993 = vmatprep.subr.msk.mxu1 %vm514_vm3, %v1718_v7 }
 0xf87   :  { %6994 = vmatpush3.xpose.msk.msra.mxu1 %vm514_vm3, %v1718_v7 }
 0xf88   :  { %6995 = vmatprep.subr.msk.mxu1 %vm514_vm3, %v1717_v9 }
 0xf8b   :  { %6996 = vmatpush3.xpose.msk.msra.mxu1 %vm514_vm3, %v1717_v9 }
 0xf8c   :  { %6997 = vmatprep.subr.msk.mxu1 %vm514_vm3, %v1716_v13 }
 0xf8f   :  { %6998 = vmatpush3.xpose.msk.msra.mxu1 %vm514_vm3, %v1716_v13 }
 0xf90   :  { %6999 = vmatprep.subr.msk.mxu1 %vm514_vm3, %v1715_v15 }
 0xf93   :  { %7000 = vmatpush3.xpose.msk.msra.mxu1 %vm514_vm3, %v1715_v15 }
 0xf96   :  { %7002 = vmatmul.mubr.msk.f32.vlgmr.msra.gmra.mxu1 %vm514_vm3, %v1599_v22 }
0x1056   :  { %v7003_v19 = vpop.f32.mrf.mxu1 }
0x1057   :  { %v1823_v21 = vadd.f32 %v7003_v19, %v8316_v37 }
0x1058   :  { %v1817_v42 = vpop.f32.mrf.mxu1 }
0x1059   :  { %v1818_v23 = vadd.f32 %v1817_v42, %v8321_v39  ;;  %v1829_v45 = vsel %vm901_vm5, %v1823_v21, -inf }
0x105a   :  { %1830 = vmax.xlane.f32.xlu0 %v1829_v45  ;;  %v6080_v45 = vld [vmem:[%s9798_s2 + $0x30] sm:$0xff] }
0x105b   :  { %v1826_v46 = vsel %vm901_vm5, %v1818_v23, -inf }
0x105c   :  { %1827 = vmax.xlane.f32.xlu1 %v1826_v46  ;;  %v6079_v46 = vld [vmem:[%s9798_s2 + $0x28] sm:$0xff] }
0x106d   :  { %1937 = vrot.lane.b32.xlu1 %v1722_v61, %s7875_s1 }
0x1070   :  { %1935 = vrot.lane.b32.xlu0 %v1721_v62, %s7875_s1 }
0x1071   :  { %1933 = vrot.lane.b32.xlu1 %v1720_v63, %s7875_s1 }
0x1074   :  { %1927 = vrot.lane.b32.xlu0 %v1717_v9, %s7875_s1 }
0x1075   :  { %1931 = vrot.lane.b32.xlu1 %v1719_v0, %s7875_s1 }
0x1078   :  { %1923 = vrot.lane.b32.xlu0 %v1715_v15, %s7875_s1 }
0x1079   :  { %1929 = vrot.lane.b32.xlu1 %v1718_v7, %s7875_s1 }
0x107c   :  { %2036 = vrot.lane.b32.xlu0 %v8493_v16, %s7876_s30 }
0x107d   :  { %1925 = vrot.lane.b32.xlu1 %v1716_v13, %s7875_s1 }
0x1080   :  { %2032 = vrot.lane.b32.xlu0 %v8507_v57, %s7876_s30 }
0x1081   :  { %2038 = vrot.lane.b32.xlu1 %v8488_v55, %s7876_s30 }
0x1085   :  { %2034 = vrot.lane.b32.xlu1 %v8500_v56, %s7876_s30 }
0x1089   :  { %2044 = vrot.lane.b32.xlu1 %v8526_v51, %s7876_s30 }
0x10e3   :  { %v1831_v25 = vpop.xlane.xlu0 %1830 }
0x10e4   :  { %v1833_v37 = vsub.f32 %v1823_v21, %v1831_v25  ;;  %v6078_v25 = vld [vmem:[%s9798_s2 + $0x20] sm:$0xff] }
0x10e5   :  { %v1828_v39 = vpop.xlane.xlu1 %1827 }
0x10e6   :  { %v1832_v44 = vsub.f32 %v1818_v23, %v1828_v39  ;;  %v1836_v47 = vmul.f32 1.442695, %v1833_v37  ;;  %v6081_v23 = vld [vmem:[%s9798_s2 + $0x38] sm:$0xff] }
0x10e7   :  { %v1936_v52 = vpop.permute.xlu0 %1935  ;;  %v8647_v37 = vld [vmem:[%s9796_s5 + $0x58] sm:$0xff] }
0x10e8   :  { %v1834_v48 = vmul.f32 1.442695, %v1832_v44 }
0x10e9   :  { %v1938_v49 = vpop.permute.xlu1 %1937 }
0x10ea   :  { %7697 = vpow2.f32 %v1834_v48  ;;  %7023 = vmatprep.subr.mxu1 %v1938_v49 }
0x10eb   :  { %7699 = vpow2.f32 %v1836_v47  ;;  %7024 = vmatpush3.msra.mxu1 %v1938_v49  ;;  %v1928_v43 = vpop.permute.xlu0 %1927 }
0x10ec   :  { %7025 = vmatprep.subr.mxu1 %v1936_v52 }
0x10ed   :  { %7026 = vmatpush3.msra.mxu1 %v1936_v52  ;;  %v1934_v41 = vpop.permute.xlu1 %1933 }
0x10ee   :  { %7027 = vmatprep.subr.mxu1 %v1934_v41 }
0x10ef   :  { %7028 = vmatpush3.msra.mxu1 %v1934_v41  ;;  %v1924_v56 = vpop.permute.xlu0 %1923 }
0x10f1   :  { %v1932_v53 = vpop.permute.xlu1 %1931 }
0x10f2   :  { %7029 = vmatprep.subr.mxu1 %v1932_v53 }
0x10f3   :  { %7030 = vmatpush3.msra.mxu1 %v1932_v53  ;;  %v2037_v1 = vpop.permute.xlu0 %2036 }
0x10f5   :  { %v1930_v54 = vpop.permute.xlu1 %1929 }
0x10f6   :  { %7031 = vmatprep.subr.mxu1 %v1930_v54 }
0x10f7   :  { %v7698_v18 = vpop.eup %7697  ;;  %7032 = vmatpush3.msra.mxu1 %v1930_v54  ;;  %v2033_v3 = vpop.permute.xlu0 %2032 }
0x10f8   :  { %v7700_v55 = vpop.eup %7699  ;;  %7020 = vmatprep.mubr.msk.f32.mxu0 %vm901_vm5, %v7698_v18  ;;  %7033 = vmatprep.subr.mxu1 %v1928_v43 }
0x10f9   :  { %7021 = vmatmul.mubr.msk.f32.vlgmr.msra.gmra.mxu0 %vm901_vm5, %v7700_v55  ;;  %7034 = vmatpush3.msra.mxu1 %v1928_v43  ;;  %v1926_v16 = vpop.permute.xlu1 %1925 }
0x10fa   :  { %7035 = vmatprep.subr.mxu1 %v1926_v16 }
0x10fb   :  { %7036 = vmatpush3.msra.mxu1 %v1926_v16 }
0x10fc   :  { %7037 = vmatprep.subr.mxu1 %v1924_v56 }
0x10fd   :  { %7038 = vmatpush3.msra.mxu1 %v1924_v56  ;;  %v2039_v57 = vpop.permute.xlu1 %2038 }
0x10fe   :  { %7042 = vmatprep.subr.mxu0 %v2039_v57 }
0x10ff   :  { %7043 = vmatpush3.msra.mxu0 %v2039_v57  ;;  %v6075_v57 = vld [vmem:[%s9764_s11 + $0x3] ss:$0 sm:$0xff] }
0x1100   :  { %7044 = vmatprep.subr.mxu0 %v2037_v1 }
0x1101   :  { %7045 = vmatpush3.msra.mxu0 %v2037_v1  ;;  %v2035_v2 = vpop.permute.xlu1 %2034 }
0x1102   :  { %7046 = vmatprep.subr.mxu0 %v2035_v2 }
0x1103   :  { %7047 = vmatpush3.msra.mxu0 %v2035_v2 }
0x1104   :  { %7048 = vmatprep.subr.mxu0 %v2033_v3 }
0x1105   :  { %7049 = vmatpush3.msra.mxu0 %v2033_v3  ;;  %v2045_v30 = vpop.permute.xlu1 %2044 }
0x1106   :  { %7053 = vmatprep.subr.mxu0 %v6081_v23 }
0x11b9   :  { %v7022_v4 = vpop.f32.mrf.mxu0 }
0x11ba   :  { %7701 = vrcp.f32 %v7022_v4 }
0x11bb   :  { %v1910_v5 = vpop.f32.mrf.mxu0 }
0x11bc   :  { %7703 = vrcp.f32 %v1910_v5  ;;  %v6077_v5 = vld [vmem:[%s9765_s12 + $0x3] ss:$0 sm:$0xff] }
0x11c7   :  { %v7702_v6 = vpop.eup %7701 }
0x11c8   :  { %v1922_v11 = vmul.f32 %v7702_v6, %v7700_v55 }
0x11c9   :  { %v7704_v8 = vpop.eup %7703 }
0x11ca   :  { %v1921_v10 = vmul.f32 %v7704_v8, %v7698_v18  ;;  %v8659_v8 = vld [vmem:[%s9764_s11 + $0x5] ss:$0 sm:$0xff] }
0x11cc   :  { %7039 = vmatprep.mubr.msk.f32.mxu1 %vm901_vm5, %v1921_v10 }
0x11cd   :  { %7040 = vmatmul.mubr.msk.f32.vlgmr.msra.gmra.mxu1 %vm901_vm5, %v1922_v11 }
0x128d   :  { %v7041_v12 = vpop.f32.mrf.mxu1 }
0x128f   :  { %v2019_v14 = vpop.f32.mrf.mxu1 }
0x1290   :  { %7050 = vmatprep.mubr.msk.f32.mxu0 %vm514_vm3, %v2019_v14  ;;  %v8664_v14 = vld [vmem:[%s9765_s12 + $0x5] ss:$0 sm:$0xff] }
0x1291   :  { %7051 = vmatmul.mubr.msk.f32.vlgmr.msra.gmra.mxu0 %vm514_vm3, %v7041_v12 }
0x1292   :  { %7054 = vmatpush3.msra.mxu0 %v6081_v23 }
0x1293   :  { %7055 = vmatprep.subr.mxu0 %v6080_v45 }
0x1294   :  { %7056 = vmatpush3.msra.mxu0 %v6080_v45 }
0x1295   :  { %7057 = vmatprep.subr.mxu0 %v6079_v46 }
0x1296   :  { %7058 = vmatpush3.msra.mxu0 %v6079_v46 }
0x1297   :  { %7059 = vmatprep.subr.mxu0 %v6078_v25 }
0x1298   :  { %7060 = vmatpush3.msra.mxu0 %v6078_v25 }
0x1299   :  { %7099 = vmatprep.subr.mxu0 %v8647_v37 }
0x1351   :  { %v7052_v31 = vpop.f32.mrf.mxu0 }
0x1352   :  { %v2125_v32 = vadd.f32 %v7052_v31, %v2045_v30 }
0x1353   :  { %v2119_v17 = vpop.f32.mrf.mxu0 }
0x1354   :  { %v2120_v33 = vadd.f32 %v2119_v17, %v2045_v30  ;;  %v8601_v51 = vadd.f32 %v2125_v32, %v8472_v35  ;;  %v2466_v35 = vsel %vm514_vm3, %v8611_v24, 0.0  ;;  %v8670_v30 = vld [vmem:[%s9796_s5 + $0x50] sm:$0xff]  ;;  %v8678_v17 = vld [vmem:[%s9796_s5 + $0x48] sm:$0xff] }
0x1356   :  { %v8604_v20 = vadd.f32 %v2120_v33, %v8475_v36  ;;  %v2133_v22 = vsel %vm514_vm3, %v8601_v51, 0.0  ;;  %v8620_v36 = vld [vmem:[%s9799_s27 + $0x8] sm:$0xff] }
0x1357   :  { %2134 = vadd.xlane.f32.xlu1 %v2133_v22  ;;  %v2469_v38 = vsel %vm514_vm3, %v8620_v36, 0.0 }
0x1358   :  { %v2130_v26 = vsel %vm514_vm3, %v8604_v20, 0.0 }
0x1359   :  { %2131 = vadd.xlane.f32.xlu0 %v2130_v26  ;;  %v8687_v26 = vld [vmem:[%s9796_s5 + $0x40] sm:$0xff] }
0x135d   :  { %2467 = vadd.xlane.f32.xlu0 %v2466_v35 }
0x1361   :  { %2470 = vadd.xlane.f32.xlu0 %v2469_v38 }
0x13e0   :  { %v2135_v40 = vpop.xlane.xlu1 %2134 }
0x13e1   :  { %v2137_v50 = vmul.f32 0.03125, %v2135_v40  ;;  %v6101_v40 = vld [vmem:[%s9762_s9 + $0xf8] sm:$0xff] }
0x13e2   :  { %v2132_v58 = vpop.xlane.xlu0 %2131  ;;  %7064 = vmatprep.subr.mxu1 %v6101_v40 }
0x13e3   :  { %v2139_v59 = vsub.f32 %v8601_v51, %v2137_v50  ;;  %v2136_v27 = vmul.f32 0.03125, %v2132_v58  ;;  %7065 = vmatpush3.msra.mxu1 %v6101_v40  ;;  %v6100_v50 = vld [vmem:[%s9762_s9 + $0xf0] sm:$0xff]  ;;  %v6099_v58 = vld [vmem:[%s9762_s9 + $0xe8] sm:$0xff] }
0x13e4   :  { %7066 = vmatprep.subr.mxu1 %v6100_v50 }
0x13e5   :  { %v2138_v28 = vsub.f32 %v8604_v20, %v2136_v27  ;;  %v2141_v60 = vmul.f32 %v2139_v59, %v2139_v59  ;;  %7067 = vmatpush3.msra.mxu1 %v6100_v50  ;;  %v6097_v27 = vld [vmem:[%s9762_s9 + $0xd8] sm:$0xff] }
0x13e6   :  { %v2468_v29 = vpop.xlane.xlu0 %2467  ;;  %7068 = vmatprep.subr.mxu1 %v6099_v58 }
0x13e7   :  { %v2472_v61 = vmul.f32 0.03125, %v2468_v29  ;;  %v2145_v34 = vsel %vm514_vm3, %v2141_v60, 0.0  ;;  %v2140_v62 = vmul.f32 %v2138_v28, %v2138_v28  ;;  %7069 = vmatpush3.msra.mxu1 %v6099_v58  ;;  %v6095_v60 = vld [vmem:[%s9762_s9 + $0xc8] sm:$0xff]  ;;  %v6094_v29 = vld [vmem:[%s9762_s9 + $0xc0] sm:$0xff] }
0x13e8   :  { %2146 = vadd.xlane.f32.xlu1 %v2145_v34  ;;  %v6092_v34 = vld [vmem:[%s9762_s9 + $0xb0] sm:$0xff] }
0x13e9   :  { %v2474_v63 = vsub.f32 %v8611_v24, %v2472_v61  ;;  %v2142_v0 = vsel %vm514_vm3, %v2140_v62, 0.0  ;;  %v6093_v61 = vld [vmem:[%s9762_s9 + $0xb8] sm:$0xff]  ;;  %v6091_v62 = vld [vmem:[%s9762_s9 + $0xa8] sm:$0xff] }
0x13ea   :  { %2143 = vadd.xlane.f32.xlu0 %v2142_v0  ;;  %v2471_v7 = vpop.xlane.xlu0 %2470  ;;  %v6089_v0 = vld [vmem:[%s9762_s9 + $0x98] sm:$0xff] }
0x13eb   :  { %v2473_v9 = vmul.f32 0.03125, %v2471_v7  ;;  %v2476_v13 = vmul.f32 %v2474_v63, %v2474_v63  ;;  %v6088_v7 = vld [vmem:[%s9762_s9 + $0x90] sm:$0xff] }
0x13ed   :  { %v2475_v15 = vsub.f32 %v8620_v36, %v2473_v9  ;;  %v2478_v19 = vsel %vm514_vm3, %v2476_v13, 0.0  ;;  %v6087_v9 = vld [vmem:[%s9762_s9 + $0x88] sm:$0xff]  ;;  %v6086_v13 = vld [vmem:[%s9762_s9 + $0x80] sm:$0xff] }
0x13ee   :  { %2479 = vadd.xlane.f32.xlu0 %v2478_v19 }
0x13ef   :  { %v2477_v21 = vmul.f32 %v2475_v15, %v2475_v15 }
0x13f1   :  { %v2481_v42 = vsel %vm514_vm3, %v2477_v21, 0.0  ;;  %v2436_v21 = vld [vmem:[%s9770_s17] sm:$0xff] }
0x13f2   :  { %2482 = vadd.xlane.f32.xlu1 %v2481_v42 }
0x1471   :  { %v2147_v39 = vpop.xlane.xlu1 %2146 }
0x1472   :  { %v2149_v44 = vmul.f32 0.03125, %v2147_v39 }
0x1473   :  { %v2144_v47 = vpop.xlane.xlu0 %2143 }
0x1474   :  { %v2151_v48 = vadd.f32 1e-05, %v2149_v44  ;;  %v2148_v49 = vmul.f32 0.03125, %v2144_v47  ;;  %v8754_v44 = vld [vmem:[%s9797_s25 + $0x2] ss:$0 sm:$0xff] }
0x1476   :  { %7705 = vrsqrt.f32 %v2151_v48  ;;  %v2150_v52 = vadd.f32 1e-05, %v2148_v49 }
0x1477   :  { %v2480_v41 = vpop.xlane.xlu0 %2479 }
0x1478   :  { %7707 = vrsqrt.f32 %v2150_v52  ;;  %v2484_v53 = vmul.f32 0.03125, %v2480_v41 }
0x147a   :  { %v2486_v43 = vadd.f32 1e-05, %v2484_v53 }
0x147b   :  { %v2483_v54 = vpop.xlane.xlu1 %2482 }
0x147c   :  { %7709 = vrsqrt.f32 %v2486_v43  ;;  %v2485_v18 = vmul.f32 0.03125, %v2483_v54 }
0x147e   :  { %v2487_v55 = vadd.f32 1e-05, %v2485_v18 }
0x1480   :  { %7711 = vrsqrt.f32 %v2487_v55 }
0x1483   :  { %v7706_v16 = vpop.eup %7705 }
0x1484   :  { %v2155_v56 = vmul.f32 %v7706_v16, %v2139_v59  ;;  %v6098_v59 = vld [vmem:[%s9762_s9 + $0xe0] sm:$0xff] }
0x1485   :  { %v7708_v1 = vpop.eup %7707  ;;  %7070 = vmatprep.subr.mxu1 %v6098_v59 }
0x1486   :  { %v2154_v2 = vmul.f32 %v7708_v1, %v2138_v28  ;;  %v2165_v3 = vmul.f32 %v6075_v57, %v2155_v56  ;;  %7071 = vmatpush3.msra.mxu1 %v6098_v59  ;;  %v6096_v28 = vld [vmem:[%s9762_s9 + $0xd0] sm:$0xff] }
0x1487   :  { %7072 = vmatprep.subr.mxu1 %v6097_v27 }
0x1488   :  { %v2164_v4 = vmul.f32 %v6075_v57, %v2154_v2  ;;  %v2175_v12 = vadd.f32 %v6077_v5, %v2165_v3  ;;  %7073 = vmatpush3.msra.mxu1 %v6097_v27 }
0x1489   :  { %v7710_v6 = vpop.eup %7709  ;;  %7074 = vmatprep.subr.mxu1 %v6096_v28 }
0x148a   :  { %v2174_v10 = vadd.f32 %v6077_v5, %v2164_v4  ;;  %v2490_v11 = vmul.f32 %v7710_v6, %v2474_v63  ;;  %7075 = vmatpush3.msra.mxu1 %v6096_v28  ;;  %v6090_v63 = vld [vmem:[%s9762_s9 + $0xa0] sm:$0xff] }
0x148b   :  { %7076 = vmatprep.subr.mxu1 %v6095_v60 }
0x148c   :  { %7061 = vmatprep.mubr.msk.f32.mxu0 %vm514_vm3, %v2174_v10  ;;  %v2500_v31 = vmul.f32 %v8659_v8, %v2490_v11  ;;  %7077 = vmatpush3.msra.mxu1 %v6095_v60  ;;  %v2451_v60 = vld [vmem:[%s9771_s18 + $0x38] sm:$0xff] }
0x148d   :  { %v7712_v32 = vpop.eup %7711  ;;  %7062 = vmatmul.mubr.msk.f32.vlgmr.msra.gmra.mxu0 %vm514_vm3, %v2175_v12  ;;  %7078 = vmatprep.subr.mxu1 %v6094_v29  ;;  %v2437_v12 = vld [vmem:[%s9770_s17 + $0x8] sm:$0xff] }
0x148e   :  { %7100 = vmatpush3.msra.mxu0 %v8647_v37  ;;  %v2510_v33 = vadd.f32 %v8664_v14, %v2500_v31  ;;  %v2491_v22 = vmul.f32 %v7712_v32, %v2475_v15  ;;  %7079 = vmatpush3.msra.mxu1 %v6094_v29  ;;  %v6083_v15 = vld [vmem:[%s9761_s8 + $0x1] ss:$0 sm:$0xff]  ;;  %v2438_v31 = vld [vmem:[%s9770_s17 + $0x10] sm:$0xff]  ;;  %v2439_v32 = vld [vmem:[%s9770_s17 + $0x18] sm:$0xff] }
0x148f   :  { %7101 = vmatprep.subr.mxu0 %v8670_v30  ;;  %7080 = vmatprep.subr.mxu1 %v6093_v61 }
0x1490   :  { %7102 = vmatpush3.msra.mxu0 %v8670_v30  ;;  %7107 = vmatprep.mubr.msk.f32.mxu0 %vm514_vm3, %v2510_v33  ;;  %v2501_v35 = vmul.f32 %v8659_v8, %v2491_v22  ;;  %v2440_v33 = vld [vmem:[%s9770_s17 + $0x20] sm:$0xff]  ;;  %v2441_v22 = vld [vmem:[%s9770_s17 + $0x28] sm:$0xff] }
0x1491   :  { %7103 = vmatprep.subr.mxu0 %v8678_v17  ;;  %7081 = vmatpush3.msra.mxu1 %v6093_v61  ;;  %v2450_v61 = vld [vmem:[%s9771_s18 + $0x30] sm:$0xff] }
0x1492   :  { %7104 = vmatpush3.msra.mxu0 %v8678_v17  ;;  %v2511_v38 = vadd.f32 %v8664_v14, %v2501_v35  ;;  %7082 = vmatprep.subr.mxu1 %v6092_v34  ;;  %v2442_v35 = vld [vmem:[%s9770_s17 + $0x30] sm:$0xff] }
0x1493   :  { %7105 = vmatprep.subr.mxu0 %v8687_v26  ;;  %7083 = vmatpush3.msra.mxu1 %v6092_v34 }
0x1494   :  { %7106 = vmatpush3.msra.mxu0 %v8687_v26  ;;  %7084 = vmatprep.subr.mxu1 %v6091_v62 }
0x1495   :  { %7108 = vmatmul.mubr.msk.f32.vlgmr.msra.gmra.mxu0 %vm514_vm3, %v2511_v38  ;;  %7085 = vmatpush3.msra.mxu1 %v6091_v62  ;;  %v2443_v38 = vld [vmem:[%s9770_s17 + $0x38] sm:$0xff] }
0x1496   :  { %7086 = vmatprep.subr.mxu1 %v6090_v63  ;;  %7114 = vmatprep.mubr.msk.f32.mxu0 %vm660_vm4, %v2436_v21  ;;  %v2446_v21 = vld [vmem:[%s9771_s18 + $0x10] sm:$0xff] }
0x1497   :  { %7087 = vmatpush3.msra.mxu1 %v6090_v63 }
0x1498   :  { %7088 = vmatprep.subr.mxu1 %v6089_v0 }
0x1499   :  { %7089 = vmatpush3.msra.mxu1 %v6089_v0  ;;  %v2449_v0 = vld [vmem:[%s9771_s18 + $0x28] sm:$0xff] }
0x149a   :  { %7090 = vmatprep.subr.mxu1 %v6088_v7 }
0x149b   :  { %7091 = vmatpush3.msra.mxu1 %v6088_v7 }
0x149c   :  { %7092 = vmatprep.subr.mxu1 %v6087_v9 }
0x149d   :  { %7093 = vmatpush3.msra.mxu1 %v6087_v9  ;;  %v2448_v9 = vld [vmem:[%s9771_s18 + $0x20] sm:$0xff] }
0x149e   :  { %7094 = vmatprep.subr.mxu1 %v6086_v13 }
0x149f   :  { %7095 = vmatpush3.msra.mxu1 %v6086_v13 }
0x154d   :  { %v7063_v19 = vpop.f32.mrf.mxu0 }
0x154e   :  { %v2267_v42 = vadd.f32 %v7063_v19, %v6083_v15 }
0x154f   :  { %v2261_v23 = vpop.f32.mrf.mxu0 }
0x1550   :  { %v2273_v45 = vmul.f32 0.044715, %v2267_v42  ;;  %v2262_v46 = vadd.f32 %v6083_v15, %v2261_v23  ;;  %v2271_v4 = vmul.f32 0.5, %v2267_v42  ;;  %v2447_v15 = vld [vmem:[%s9771_s18 + $0x18] sm:$0xff]  ;;  %v2445_v23 = vld [vmem:[%s9771_s18 + $0x8] sm:$0xff] }
0x1552   :  { %v2275_v25 = vmul.f32 %v2273_v45, %v2267_v42  ;;  %v2272_v39 = vmul.f32 0.044715, %v2262_v46  ;;  %v2270_v2 = vmul.f32 0.5, %v2262_v46 }
0x1554   :  { %v2277_v47 = vmul.f32 %v2275_v25, %v2267_v42  ;;  %v2274_v48 = vmul.f32 %v2272_v39, %v2262_v46  ;;  %v2461_v39 = vld [vmem:[%s9774_s21 + $0x8] sm:$0xff] }
0x1555   :  { %v7109_v49 = vpop.f32.mrf.mxu0 }
0x1556   :  { %v2279_v52 = vadd.f32 %v2277_v47, %v2267_v42  ;;  %v8757_v41 = vadd.f32 %v7109_v49, %v8754_v44  ;;  %v2276_v53 = vmul.f32 %v2274_v48, %v2262_v46  ;;  %v2460_v48 = vld [vmem:[%s9774_s21] sm:$0xff] }
0x1557   :  { %v2597_v43 = vpop.f32.mrf.mxu0 }
0x1558   :  { %v2598_v54 = vadd.f32 %v8754_v44, %v2597_v43  ;;  %2610 = vrot.lane.b32.xlu0 %v8757_v41, %s7875_s1  ;;  %v2278_v18 = vadd.f32 %v2276_v53, %v2262_v46  ;;  %v2281_v55 = vmul.f32 0.7978846, %v2279_v52  ;;  %v2444_v46 = vld [vmem:[%s9771_s18] sm:$0xff] }
0x155a   :  { %2608 = vrot.lane.b32.xlu1 %v2598_v54, %s7875_s1  ;;  %v2280_v16 = vmul.f32 0.7978846, %v2278_v18  ;;  %7713 = vtanh.f32 %v2281_v55  ;;  %v8858_v18 = vld [vmem:[%s9772_s19 + $0x30] sm:$0xff]  ;;  %v8864_v55 = vld [vmem:[%s9772_s19 + $0x28] sm:$0xff] }
0x155c   :  { %7715 = vtanh.f32 %v2280_v16  ;;  %v8873_v16 = vld [vmem:[%s9772_s19 + $0x20] sm:$0xff] }
0x1567   :  { %v7714_v56 = vpop.eup %7713 }
0x1568   :  { %v2285_v1 = vadd.f32 1.0, %v7714_v56  ;;  %v8879_v56 = vld [vmem:[%s9772_s19 + $0x18] sm:$0xff] }
0x1569   :  { %v7716_v57 = vpop.eup %7715 }
0x156a   :  { %v2284_v3 = vadd.f32 1.0, %v7716_v57  ;;  %v2287_v6 = vmul.f32 %v2285_v1, %v2271_v4  ;;  %v8889_v57 = vld [vmem:[%s9772_s19 + $0x10] sm:$0xff]  ;;  %v8897_v1 = vld [vmem:[%s9772_s19 + $0x8] sm:$0xff] }
0x156c   :  { %v2286_v5 = vmul.f32 %v2284_v3, %v2270_v2  ;;  %v8905_v2 = vld [vmem:[%s9772_s19] sm:$0xff] }
0x156e   :  { %7096 = vmatprep.mubr.f32.mxu1 %v2286_v5  ;;  %v6103_v5 = vld [vmem:[%s9763_s10 + $0x1] ss:$0 sm:$0xff] }
0x156f   :  { %7097 = vmatmul.mubr.f32.vlgmr.msra.gmra.mxu1 %v2287_v6 }
0x15ca   :  { %v2611_v10 = vpop.permute.xlu0 %2610 }
0x15cb   :  { %7110 = vmatprep.subr.mxu0 %v2611_v10 }
0x15cc   :  { %7111 = vmatpush3.msra.mxu0 %v2611_v10  ;;  %v2609_v11 = vpop.permute.xlu1 %2608 }
0x15cd   :  { %7112 = vmatprep.subr.mxu0 %v2609_v11 }
0x15ce   :  { %7113 = vmatpush3.msra.mxu0 %v2609_v11  ;;  %v8936_v11 = vld [vmem:[%s9796_s5 + $0x70] sm:$0xff] }
0x15cf   :  { %7115 = vmatmul.mubr.msk.f32.vlgmr.msra.gmra.mxu0 %vm660_vm4, %v2437_v12 }
0x15d0   :  { %7117 = vmatprep.mubr.msk.f32.mxu0 %vm660_vm4, %v2438_v31 }
0x15d3   :  { %7118 = vmatmul.mubr.msk.f32.gmra.mxu0 %vm660_vm4, %v2439_v32 }
0x15d4   :  { %7120 = vmatprep.mubr.msk.f32.mxu0 %vm660_vm4, %v2440_v33 }
0x15d7   :  { %7121 = vmatmul.mubr.msk.f32.gmra.mxu0 %vm660_vm4, %v2441_v22 }
0x15d8   :  { %7123 = vmatprep.mubr.msk.f32.mxu0 %vm660_vm4, %v2442_v35 }
0x15db   :  { %7124 = vmatmul.mubr.msk.f32.gmra.mxu0 %vm660_vm4, %v2443_v38 }
0x15dc   :  { %7142 = vmatprep.mubr.msk.f32.mxu0 %vm514_vm3, %v2598_v54  ;;  %v8851_v54 = vld [vmem:[%s9772_s19 + $0x38] sm:$0xff] }
0x15dd   :  { %7145 = vmatprep.subr.mxu1 %v8851_v54 }
0x15de   :  { %7146 = vmatpush3.msra.mxu1 %v8851_v54 }
0x15df   :  { %7147 = vmatprep.subr.mxu1 %v8858_v18 }
0x15e0   :  { %7148 = vmatpush3.msra.mxu1 %v8858_v18 }
0x15e1   :  { %7149 = vmatprep.subr.mxu1 %v8864_v55 }
0x15e2   :  { %7150 = vmatpush3.msra.mxu1 %v8864_v55 }
0x15e3   :  { %7151 = vmatprep.subr.mxu1 %v8873_v16 }
0x15e4   :  { %7152 = vmatpush3.msra.mxu1 %v8873_v16 }
0x15e5   :  { %7153 = vmatprep.subr.mxu1 %v8879_v56 }
0x15e6   :  { %7154 = vmatpush3.msra.mxu1 %v8879_v56 }
0x15e7   :  { %7155 = vmatprep.subr.mxu1 %v8889_v57 }
0x15e8   :  { %7156 = vmatpush3.msra.mxu1 %v8889_v57 }
0x15e9   :  { %7157 = vmatprep.subr.mxu1 %v8897_v1 }
0x15ea   :  { %7158 = vmatpush3.msra.mxu1 %v8897_v1 }
0x15eb   :  { %7159 = vmatprep.subr.mxu1 %v8905_v2 }
0x15ec   :  { %7160 = vmatpush3.msra.mxu1 %v8905_v2 }
0x162f   :  { %v7098_v3 = vpop.f32.mrf.mxu1 }
0x1631   :  { %v2379_v4 = vpop.f32.mrf.mxu1 }
0x1632   :  { %v2380_v6 = vadd.f32 %v6103_v5, %v2379_v4 }
0x168f   :  { %v7116_v40 = vpop.f32.mrf.mxu0 }
0x1690   :  { %v2744_v45 = vmul.f32 %v7116_v40, %v2445_v23 }
0x1691   :  { %v2704_v50 = vpop.f32.mrf.mxu0 }
0x1692   :  { %v2743_v25 = vmul.f32 %v2704_v50, %v2444_v46 }
0x1693   :  { %v7119_v58 = vpop.f32.mrf.mxu0 }
0x1694   :  { %v2746_v19 = vmul.f32 %v7119_v58, %v2447_v15 }
0x1695   :  { %v2714_v59 = vpop.f32.mrf.mxu0 }
0x1696   :  { %v2745_v42 = vmul.f32 %v2714_v59, %v2446_v21 }
0x1697   :  { %v7122_v27 = vpop.f32.mrf.mxu0 }
0x1698   :  { %v2748_v7 = vmul.f32 %v7122_v27, %v2449_v0 }
0x1699   :  { %v2724_v28 = vpop.f32.mrf.mxu0 }
0x169a   :  { %v2747_v13 = vmul.f32 %v2724_v28, %v2448_v9 }
0x169b   :  { %v7125_v29 = vpop.f32.mrf.mxu0 }
0x169c   :  { %v2750_v34 = vmul.f32 %v7125_v29, %v2451_v60 }
0x169d   :  { %v2734_v62 = vpop.f32.mrf.mxu0 }
0x169e   :  { %v2749_v63 = vmul.f32 %v2734_v62, %v2450_v61  ;;  %7126 = vmatprep.subr.msk.mxu0 %vm514_vm3, %v2750_v34 }
0x169f   :  { %7127 = vmatpush3.xpose.msk.msra.mxu0 %vm514_vm3, %v2750_v34 }
0x16a0   :  { %7128 = vmatprep.subr.msk.mxu0 %vm514_vm3, %v2749_v63 }
0x16a3   :  { %7129 = vmatpush3.xpose.msk.msra.mxu0 %vm514_vm3, %v2749_v63 }
0x16a4   :  { %7130 = vmatprep.subr.msk.mxu0 %vm514_vm3, %v2748_v7 }
0x16a7   :  { %7131 = vmatpush3.xpose.msk.msra.mxu0 %vm514_vm3, %v2748_v7 }
0x16a8   :  { %7132 = vmatprep.subr.msk.mxu0 %vm514_vm3, %v2747_v13 }
0x16ab   :  { %7133 = vmatpush3.xpose.msk.msra.mxu0 %vm514_vm3, %v2747_v13 }
0x16ac   :  { %7134 = vmatprep.subr.msk.mxu0 %vm514_vm3, %v2746_v19 }
0x16af   :  { %7135 = vmatpush3.xpose.msk.msra.mxu0 %vm514_vm3, %v2746_v19 }
0x16b0   :  { %7136 = vmatprep.subr.msk.mxu0 %vm514_vm3, %v2745_v42 }
0x16b3   :  { %7137 = vmatpush3.xpose.msk.msra.mxu0 %vm514_vm3, %v2745_v42 }
0x16b4   :  { %7138 = vmatprep.subr.msk.mxu0 %vm514_vm3, %v2744_v45 }
0x16b7   :  { %7139 = vmatpush3.xpose.msk.msra.mxu0 %vm514_vm3, %v2744_v45 }
0x16b8   :  { %7140 = vmatprep.subr.msk.mxu0 %vm514_vm3, %v2743_v25 }
0x16bb   :  { %7141 = vmatpush3.xpose.msk.msra.mxu0 %vm514_vm3, %v2743_v25 }
0x16be   :  { %7143 = vmatmul.mubr.msk.f32.vlgmr.msra.gmra.mxu0 %vm514_vm3, %v8757_v41 }
0x177e   :  { %v7144_v47 = vpop.f32.mrf.mxu0 }
0x177f   :  { %v8840_v49 = vadd.f32 %v7144_v47, %v2461_v39 }
0x1780   :  { %v2845_v52 = vpop.f32.mrf.mxu0 }
0x1781   :  { %v8842_v53 = vadd.f32 %v2845_v52, %v2460_v48  ;;  %v2857_v43 = vsel %vm901_vm5, %v8840_v49, -inf }
0x1782   :  { %2858 = vmax.xlane.f32.xlu0 %v2857_v43 }
0x1783   :  { %v2854_v41 = vsel %vm901_vm5, %v8842_v53, -inf }
0x1784   :  { %2855 = vmax.xlane.f32.xlu1 %v2854_v41 }
0x1795   :  { %2963 = vrot.lane.b32.xlu1 %v2749_v63, %s7875_s1 }
0x1798   :  { %2965 = vrot.lane.b32.xlu0 %v2750_v34, %s7875_s1 }
0x1799   :  { %2961 = vrot.lane.b32.xlu1 %v2748_v7, %s7875_s1  ;;  %v8961_v7 = vld [vmem:[%s9796_s5 + $0x78] sm:$0xff] }
0x179c   :  { %2957 = vrot.lane.b32.xlu0 %v2746_v19, %s7875_s1 }
0x179d   :  { %2959 = vrot.lane.b32.xlu1 %v2747_v13, %s7875_s1 }
0x17a0   :  { %2953 = vrot.lane.b32.xlu0 %v2744_v45, %s7875_s1 }
0x17a1   :  { %2955 = vrot.lane.b32.xlu1 %v2745_v42, %s7875_s1 }
0x17a4   :  { %3066 = vrot.lane.b32.xlu0 %v8647_v37, %s7876_s30  ;;  %v8924_v37 = vadd.f32 %v2380_v6, %v8604_v20  ;;  %v8943_v20 = vld [vmem:[%s9796_s5 + $0x68] sm:$0xff] }
0x17a5   :  { %2951 = vrot.lane.b32.xlu1 %v2743_v25, %s7875_s1 }
0x17a6   :  { %v2390_v10 = vsel %vm514_vm3, %v8924_v37, 0.0 }
0x17a8   :  { %3062 = vrot.lane.b32.xlu0 %v8678_v17, %s7876_s30  ;;  %v2385_v17 = vadd.f32 %v7098_v3, %v6103_v5 }
0x17a9   :  { %3064 = vrot.lane.b32.xlu1 %v8670_v30, %s7876_s30 }
0x17aa   :  { %v8929_v30 = vadd.f32 %v2385_v17, %v8601_v51  ;;  %v8950_v51 = vld [vmem:[%s9796_s5 + $0x60] sm:$0xff] }
0x17ad   :  { %3060 = vrot.lane.b32.xlu1 %v8687_v26, %s7876_s30  ;;  %v2393_v26 = vsel %vm514_vm3, %v8929_v30, 0.0 }
0x17c7   :  { %2391 = vadd.xlane.f32.xlu0 %v2390_v10 }
0x17d1   :  { %2394 = vadd.xlane.f32.xlu1 %v2393_v26 }
0x17e2   :  { %3290 = vrot.lane.b32.xlu1 %v8936_v11, %s7875_s1 }
0x17e6   :  { %3288 = vrot.lane.b32.xlu1 %v8943_v20, %s7875_s1 }
0x17ea   :  { %3286 = vrot.lane.b32.xlu1 %v8950_v51, %s7875_s1 }
0x180b   :  { %v2859_v12 = vpop.xlane.xlu0 %2858 }
0x180c   :  { %v2861_v31 = vsub.f32 %v8840_v49, %v2859_v12  ;;  %v6107_v12 = vld [vmem:[%s9765_s12 + $0x4] ss:$0 sm:$0xff] }
0x180d   :  { %v2856_v32 = vpop.xlane.xlu1 %2855 }
0x180e   :  { %v2860_v33 = vsub.f32 %v8842_v53, %v2856_v32  ;;  %v2864_v22 = vmul.f32 1.442695, %v2861_v31 }
0x180f   :  { %v2966_v35 = vpop.permute.xlu0 %2965 }
0x1810   :  { %v2862_v38 = vmul.f32 1.442695, %v2860_v33  ;;  %7164 = vmatprep.subr.mxu0 %v2966_v35 }
0x1811   :  { %7165 = vmatpush3.msra.mxu0 %v2966_v35  ;;  %v2964_v40 = vpop.permute.xlu1 %2963  ;;  %v7785_v35 = vld [vmem:[%s9769_s16 + $0x38] sm:$0xff] }
0x1812   :  { %7717 = vpow2.f32 %v2862_v38  ;;  %7166 = vmatprep.subr.mxu0 %v2964_v40 }
0x1813   :  { %7719 = vpow2.f32 %v2864_v22  ;;  %v2958_v50 = vpop.permute.xlu0 %2957  ;;  %7167 = vmatpush3.msra.mxu0 %v2964_v40 }
0x1815   :  { %v2962_v58 = vpop.permute.xlu1 %2961 }
0x1816   :  { %7168 = vmatprep.subr.mxu0 %v2962_v58 }
0x1817   :  { %v2954_v59 = vpop.permute.xlu0 %2953  ;;  %7169 = vmatpush3.msra.mxu0 %v2962_v58  ;;  %v7786_v58 = vld [vmem:[%s9769_s16 + $0x30] sm:$0xff] }
0x1819   :  { %v2960_v27 = vpop.permute.xlu1 %2959 }
0x181a   :  { %7170 = vmatprep.subr.mxu0 %v2960_v27 }
0x181b   :  { %7171 = vmatpush3.msra.mxu0 %v2960_v27  ;;  %v3067_v28 = vpop.permute.xlu0 %3066  ;;  %v7788_v27 = vld [vmem:[%s9769_s16 + $0x20] sm:$0xff] }
0x181c   :  { %7172 = vmatprep.subr.mxu0 %v2958_v50  ;;  %7183 = vmatprep.subr.mxu1 %v3067_v28 }
0x181d   :  { %7173 = vmatpush3.msra.mxu0 %v2958_v50  ;;  %v2956_v60 = vpop.permute.xlu1 %2955 }
0x181e   :  { %7174 = vmatprep.subr.mxu0 %v2956_v60 }
0x181f   :  { %v7718_v29 = vpop.eup %7717  ;;  %7175 = vmatpush3.msra.mxu0 %v2956_v60  ;;  %v3063_v63 = vpop.permute.xlu0 %3062  ;;  %v7790_v60 = vld [vmem:[%s9769_s16 + $0x10] sm:$0xff] }
0x1820   :  { %v7720_v61 = vpop.eup %7719  ;;  %7161 = vmatprep.mubr.msk.f32.mxu1 %vm901_vm5, %v7718_v29  ;;  %7176 = vmatprep.subr.mxu0 %v2954_v59 }
0x1821   :  { %7162 = vmatmul.mubr.msk.f32.vlgmr.msra.gmra.mxu1 %vm901_vm5, %v7720_v61  ;;  %7177 = vmatpush3.msra.mxu0 %v2954_v59  ;;  %v2952_v34 = vpop.permute.xlu1 %2951  ;;  %v7787_v59 = vld [vmem:[%s9769_s16 + $0x28] sm:$0xff] }
0x1822   :  { %7178 = vmatprep.subr.mxu0 %v2952_v34  ;;  %7184 = vmatpush3.msra.mxu1 %v3067_v28  ;;  %v7789_v28 = vld [vmem:[%s9769_s16 + $0x18] sm:$0xff] }
0x1823   :  { %7179 = vmatpush3.msra.mxu0 %v2952_v34 }
0x1825   :  { %v3065_v62 = vpop.permute.xlu1 %3064 }
0x1826   :  { %7185 = vmatprep.subr.mxu1 %v3065_v62 }
0x1827   :  { %7186 = vmatpush3.msra.mxu1 %v3065_v62 }
0x1828   :  { %7187 = vmatprep.subr.mxu1 %v3063_v63 }
0x1829   :  { %v3061_v0 = vpop.permute.xlu1 %3060  ;;  %7188 = vmatpush3.msra.mxu1 %v3063_v63 }
0x182a   :  { %7189 = vmatprep.subr.mxu1 %v3061_v0 }
0x182b   :  { %7190 = vmatpush3.msra.mxu1 %v3061_v0 }
0x182c   :  { %7194 = vmatprep.subr.mxu1 %v8961_v7 }
0x1850   :  { %v2392_v9 = vpop.xlane.xlu0 %2391 }
0x1851   :  { %v2396_v13 = vmul.f32 0.03125, %v2392_v9 }
0x1853   :  { %v2398_v15 = vsub.f32 %v8924_v37, %v2396_v13 }
0x1855   :  { %v2400_v19 = vmul.f32 %v2398_v15, %v2398_v15 }
0x1857   :  { %v2402_v21 = vsel %vm514_vm3, %v2400_v19, 0.0 }
0x1858   :  { %2403 = vadd.xlane.f32.xlu0 %v2402_v21 }
0x185a   :  { %v2395_v42 = vpop.xlane.xlu1 %2394 }
0x185b   :  { %v2397_v23 = vmul.f32 0.03125, %v2395_v42 }
0x185d   :  { %v2399_v45 = vsub.f32 %v8929_v30, %v2397_v23  ;;  %v6105_v30 = vld [vmem:[%s9764_s11 + $0x4] ss:$0 sm:$0xff] }
0x185e   :  { %v3291_v41 = vpop.permute.xlu1 %3290 }
0x185f   :  { %v2401_v46 = vmul.f32 %v2399_v45, %v2399_v45 }
0x1861   :  { %v2405_v25 = vsel %vm514_vm3, %v2401_v46, 0.0 }
0x1862   :  { %2406 = vadd.xlane.f32.xlu0 %v2405_v25  ;;  %v3289_v10 = vpop.permute.xlu1 %3288 }
0x1866   :  { %v3287_v33 = vpop.permute.xlu1 %3286 }
0x1878   :  { %3292 = vrot.lane.b32.xlu0 %v8961_v7, %s7875_s1 }
0x187c   :  { %3072 = vrot.lane.b32.xlu0 %v8754_v44, %s7876_s30 }
0x18e1   :  { %v2404_v39 = vpop.xlane.xlu0 %2403  ;;  %v7163_v47 = vpop.f32.mrf.mxu1 }
0x18e2   :  { %v2408_v48 = vmul.f32 0.03125, %v2404_v39  ;;  %7721 = vrcp.f32 %v7163_v47 }
0x18e3   :  { %v2938_v49 = vpop.f32.mrf.mxu1 }
0x18e4   :  { %v2410_v52 = vadd.f32 1e-05, %v2408_v48  ;;  %7723 = vrcp.f32 %v2938_v49 }
0x18e6   :  { %7725 = vrsqrt.f32 %v2410_v52 }
0x18eb   :  { %v2407_v53 = vpop.xlane.xlu0 %2406 }
0x18ec   :  { %v2409_v43 = vmul.f32 0.03125, %v2407_v53 }
0x18ee   :  { %v2411_v3 = vadd.f32 1e-05, %v2409_v43 }
0x18ef   :  { %v3293_v4 = vpop.permute.xlu0 %3292  ;;  %v7722_v5 = vpop.eup %7721 }
0x18f0   :  { %7727 = vrsqrt.f32 %v2411_v3  ;;  %7205 = vmatprep.subr.mxu0 %v3293_v4  ;;  %v2950_v17 = vmul.f32 %v7722_v5, %v7720_v61  ;;  %v7792_v61 = vld [vmem:[%s9769_s16] sm:$0xff] }
0x18f1   :  { %v7724_v6 = vpop.eup %7723 }
0x18f2   :  { %v2949_v37 = vmul.f32 %v7724_v6, %v7718_v29  ;;  %v7791_v29 = vld [vmem:[%s9769_s16 + $0x8] sm:$0xff] }
0x18f3   :  { %v7726_v44 = vpop.eup %7725  ;;  %v3073_v63 = vpop.permute.xlu0 %3072 }
0x18f4   :  { %7180 = vmatprep.mubr.msk.f32.mxu0 %vm901_vm5, %v2949_v37  ;;  %v2414_v26 = vmul.f32 %v7726_v44, %v2398_v15 }
0x18f5   :  { %7181 = vmatmul.mubr.msk.f32.vlgmr.msra.gmra.mxu0 %vm901_vm5, %v2950_v17 }
0x18f6   :  { %v2424_v31 = vmul.f32 %v6105_v30, %v2414_v26  ;;  %7206 = vmatpush3.msra.mxu0 %v3293_v4 }
0x18f7   :  { %7207 = vmatprep.subr.mxu0 %v3291_v41 }
0x18f8   :  { %v8980_v32 = vadd.f32 %v6107_v12, %v2424_v31  ;;  %7208 = vmatpush3.msra.mxu0 %v3291_v41 }
0x18f9   :  { %7209 = vmatprep.subr.mxu0 %v3289_v10 }
0x18fa   :  { %7213 = vmatprep.mubr.msk.f32.mxu0 %vm514_vm3, %v8980_v32  ;;  %7210 = vmatpush3.msra.mxu0 %v3289_v10 }
0x18fb   :  { %7211 = vmatprep.subr.mxu0 %v3287_v33 }
0x18fc   :  { %7212 = vmatpush3.msra.mxu0 %v3287_v33 }
0x18fd   :  { %v7728_v22 = vpop.eup %7727  ;;  %7251 = vmatprep.subr.mxu0 %v7785_v35 }
0x18fe   :  { %v2415_v38 = vmul.f32 %v7728_v22, %v2399_v45  ;;  %v9034_v45 = vld [vmem:[%s9797_s25 + $0x3] ss:$0 sm:$0xff] }
0x1900   :  { %v2425_v40 = vmul.f32 %v6105_v30, %v2415_v38 }
0x1902   :  { %v8987_v50 = vadd.f32 %v6107_v12, %v2425_v40 }
0x1904   :  { %7214 = vmatmul.mubr.msk.f32.vlgmr.msra.gmra.mxu0 %vm514_vm3, %v8987_v50 }
0x1905   :  { %7252 = vmatpush3.msra.mxu0 %v7785_v35 }
0x1906   :  { %7253 = vmatprep.subr.mxu0 %v7786_v58 }
0x1907   :  { %7254 = vmatpush3.msra.mxu0 %v7786_v58  ;;  %v7793_v58 = vld [vmem:[%s9767_s14] sm:$0xff] }
0x1908   :  { %7255 = vmatprep.subr.mxu0 %v7787_v59 }
0x1909   :  { %7256 = vmatpush3.msra.mxu0 %v7787_v59  ;;  %v7794_v59 = vld [vmem:[%s9767_s14 + $0x8] sm:$0xff] }
0x190a   :  { %7257 = vmatprep.subr.mxu0 %v7788_v27 }
0x190b   :  { %7258 = vmatpush3.msra.mxu0 %v7788_v27  ;;  %v7797_v27 = vld [vmem:[%s9767_s14 + $0x20] sm:$0xff] }
0x190c   :  { %7259 = vmatprep.subr.mxu0 %v7789_v28 }
0x190d   :  { %7260 = vmatpush3.msra.mxu0 %v7789_v28  ;;  %v7798_v28 = vld [vmem:[%s9767_s14 + $0x28] sm:$0xff] }
0x190e   :  { %7261 = vmatprep.subr.mxu0 %v7790_v60 }
0x190f   :  { %7262 = vmatpush3.msra.mxu0 %v7790_v60  ;;  %v7799_v60 = vld [vmem:[%s9767_s14 + $0x30] sm:$0xff] }
0x1910   :  { %7263 = vmatprep.subr.mxu0 %v7791_v29 }
0x1911   :  { %7264 = vmatpush3.msra.mxu0 %v7791_v29  ;;  %v7800_v29 = vld [vmem:[%s9767_s14 + $0x38] sm:$0xff] }
0x1912   :  { %7265 = vmatprep.subr.mxu0 %v7792_v61 }
0x1913   :  { %7266 = vmatpush3.msra.mxu0 %v7792_v61 }
0x19b5   :  { %v7182_v34 = vpop.f32.mrf.mxu0 }
0x19b7   :  { %v3047_v62 = vpop.f32.mrf.mxu0 }
0x19b8   :  { %7191 = vmatprep.mubr.msk.f32.mxu1 %vm514_vm3, %v3047_v62 }
0x19b9   :  { %7192 = vmatmul.mubr.msk.f32.vlgmr.msra.gmra.mxu1 %vm514_vm3, %v7182_v34 }
0x19ba   :  { %7195 = vmatpush3.msra.mxu1 %v8961_v7 }
0x19bb   :  { %7196 = vmatprep.subr.mxu1 %v8936_v11 }
0x19bc   :  { %7197 = vmatpush3.msra.mxu1 %v8936_v11 }
0x19bd   :  { %7198 = vmatprep.subr.mxu1 %v8943_v20 }
0x19be   :  { %7199 = vmatpush3.msra.mxu1 %v8943_v20 }
0x19bf   :  { %7200 = vmatprep.subr.mxu1 %v8950_v51 }
0x19c0   :  { %7201 = vmatpush3.msra.mxu1 %v8950_v51 }
0x19c4   :  { %v7215_v48 = vpop.f32.mrf.mxu0 }
0x19c6   :  { %v3373_v38 = vpop.f32.mrf.mxu0 }
0x1a79   :  { %v7193_v0 = vpop.f32.mrf.mxu1 }
0x1a7a   :  { %v3153_v9 = vadd.f32 %v7193_v0, %v3073_v63 }
0x1a7b   :  { %v3147_v13 = vpop.f32.mrf.mxu1 }
0x1a7c   :  { %v9022_v15 = vadd.f32 %v3153_v9, %v8620_v36  ;;  %v3148_v19 = vadd.f32 %v3147_v13, %v3073_v63 }
0x1a7e   :  { %v9025_v21 = vadd.f32 %v3148_v19, %v8611_v24  ;;  %v3161_v42 = vsel %vm514_vm3, %v9022_v15, 0.0 }
0x1a7f   :  { %3162 = vadd.xlane.f32.xlu0 %v3161_v42 }
0x1a80   :  { %v3158_v23 = vsel %vm514_vm3, %v9025_v21, 0.0 }
0x1a81   :  { %3159 = vadd.xlane.f32.xlu1 %v3158_v23 }
0x1a92   :  { %3298 = vrot.lane.b32.xlu1 %v9034_v45, %s7875_s1 }
0x1b08   :  { %v3163_v36 = vpop.xlane.xlu0 %3162 }
0x1b09   :  { %v3165_v46 = vmul.f32 0.03125, %v3163_v36  ;;  %v7801_v36 = vld [vmem:[%s9768_s15 + $0x38] sm:$0xff] }
0x1b0a   :  { %v3160_v24 = vpop.xlane.xlu1 %3159 }
0x1b0b   :  { %v3164_v25 = vmul.f32 0.03125, %v3160_v24  ;;  %v3167_v39 = vsub.f32 %v9022_v15, %v3165_v46 }
0x1b0d   :  { %v3166_v47 = vsub.f32 %v9025_v21, %v3164_v25  ;;  %v3169_v41 = vmul.f32 %v3167_v39, %v3167_v39  ;;  %v7802_v25 = vld [vmem:[%s9768_s15 + $0x30] sm:$0xff] }
0x1b0e   :  { %v3299_v49 = vpop.permute.xlu1 %3298 }
0x1b0f   :  { %v3379_v52 = vadd.f32 %v7215_v48, %v3299_v49  ;;  %v3168_v53 = vmul.f32 %v3166_v47, %v3166_v47  ;;  %v3173_v3 = vsel %vm514_vm3, %v3169_v41, 0.0  ;;  %v3374_v40 = vadd.f32 %v3373_v38, %v3299_v49  ;;  %v7804_v49 = vld [vmem:[%s9768_s15 + $0x20] sm:$0xff]  ;;  %v7806_v41 = vld [vmem:[%s9768_s15 + $0x10] sm:$0xff] }
0x1b11   :  { %7216 = vmatprep.subr.mxu1 %v3379_v52  ;;  %v3170_v43 = vsel %vm514_vm3, %v3168_v53, 0.0  ;;  %v7805_v53 = vld [vmem:[%s9768_s15 + $0x18] sm:$0xff] }
0x1b12   :  { %3171 = vadd.xlane.f32.xlu0 %v3170_v43 }
0x1b16   :  { %3174 = vadd.xlane.f32.xlu0 %v3173_v3 }
0x1b9b   :  { %v3172_v4 = vpop.xlane.xlu0 %3171 }
0x1b9c   :  { %v3176_v5 = vmul.f32 0.03125, %v3172_v4  ;;  %v7807_v4 = vld [vmem:[%s9768_s15 + $0x8] sm:$0xff] }
0x1b9e   :  { %v3178_v6 = vadd.f32 1e-05, %v3176_v5 }
0x1b9f   :  { %v3175_v37 = vpop.xlane.xlu0 %3174 }
0x1ba0   :  { %7729 = vrsqrt.f32 %v3178_v6  ;;  %v3177_v10 = vmul.f32 0.03125, %v3175_v37  ;;  %v7808_v6 = vld [vmem:[%s9768_s15] sm:$0xff] }
0x1ba2   :  { %v3179_v44 = vadd.f32 1e-05, %v3177_v10 }
0x1ba4   :  { %7731 = vrsqrt.f32 %v3179_v44 }
0x1bad   :  { %v7730_v17 = vpop.eup %7729 }
0x1bae   :  { %v3182_v30 = vmul.f32 %v7730_v17, %v3166_v47  ;;  %v7803_v47 = vld [vmem:[%s9768_s15 + $0x28] sm:$0xff]  ;;  %v2462_v17 = vld [vmem:[%s9775_s22] sm:$0xff] }
0x1bb0   :  { %v3184_v26 = vmul.f32 %v8659_v8, %v3182_v30  ;;  %v2463_v30 = vld [vmem:[%s9775_s22 + $0x8] sm:$0xff] }
0x1bb1   :  { %v7732_v12 = vpop.eup %7731 }
0x1bb2   :  { %v3183_v31 = vmul.f32 %v7732_v12, %v3167_v39  ;;  %v3186_v33 = vadd.f32 %v8664_v14, %v3184_v26 }
0x1bb4   :  { %7202 = vmatprep.mubr.msk.f32.mxu1 %vm514_vm3, %v3186_v33  ;;  %v3185_v22 = vmul.f32 %v8659_v8, %v3183_v31  ;;  %v7795_v8 = vld [vmem:[%s9767_s14 + $0x10] sm:$0xff] }
0x1bb6   :  { %v3187_v35 = vadd.f32 %v8664_v14, %v3185_v22  ;;  %v7796_v14 = vld [vmem:[%s9767_s14 + $0x18] sm:$0xff] }
0x1bb8   :  { %7203 = vmatmul.mubr.msk.f32.vlgmr.msra.gmra.mxu1 %vm514_vm3, %v3187_v35 }
0x1bb9   :  { %7217 = vmatpush3.msra.mxu1 %v3379_v52  ;;  %7220 = vmatprep.mubr.msk.f32.mxu1 %vm660_vm4, %v7793_v58 }
0x1bba   :  { %7218 = vmatprep.subr.mxu1 %v3374_v40 }
0x1bbb   :  { %7219 = vmatpush3.msra.mxu1 %v3374_v40 }
0x1bbc   :  { %7221 = vmatmul.mubr.msk.f32.vlgmr.msra.gmra.mxu1 %vm660_vm4, %v7794_v59 }
0x1bbd   :  { %7223 = vmatprep.mubr.msk.f32.mxu1 %vm660_vm4, %v7795_v8 }
0x1bc0   :  { %7224 = vmatmul.mubr.msk.f32.gmra.mxu1 %vm660_vm4, %v7796_v14 }
0x1bc1   :  { %7226 = vmatprep.mubr.msk.f32.mxu1 %vm660_vm4, %v7797_v27 }
0x1bc4   :  { %7227 = vmatmul.mubr.msk.f32.gmra.mxu1 %vm660_vm4, %v7798_v28 }
0x1bc5   :  { %7229 = vmatprep.mubr.msk.f32.mxu1 %vm660_vm4, %v7799_v60 }
0x1bc8   :  { %7230 = vmatmul.mubr.msk.f32.gmra.mxu1 %vm660_vm4, %v7800_v29 }
0x1c78   :  { %v7204_v61 = vpop.f32.mrf.mxu1 }
0x1c79   :  { %v3279_v10 = vadd.f32 %v7204_v61, %v9034_v45 }
0x1c7a   :  { %v3273_v34 = vpop.f32.mrf.mxu1 }
0x1c7b   :  { %v3274_v62 = vadd.f32 %v9034_v45, %v3273_v34 }
0x1c7c   :  { %v7222_v63 = vpop.f32.mrf.mxu1 }
0x1c7d   :  { %7248 = vmatprep.mubr.msk.f32.mxu1 %vm514_vm3, %v3274_v62  ;;  %v3488_v5 = vmul.f32 %v7807_v4, %v7222_v63 }
0x1c7e   :  { %v3448_v0 = vpop.f32.mrf.mxu1 }
0x1c7f   :  { %v3487_v37 = vmul.f32 %v7808_v6, %v3448_v0 }
0x1c80   :  { %v7225_v9 = vpop.f32.mrf.mxu1 }
0x1c81   :  { %v3490_v43 = vmul.f32 %v7805_v53, %v7225_v9 }
0x1c82   :  { %v3458_v13 = vpop.f32.mrf.mxu1 }
0x1c83   :  { %v3489_v3 = vmul.f32 %v7806_v41, %v3458_v13 }
0x1c84   :  { %v7228_v19 = vpop.f32.mrf.mxu1 }
0x1c85   :  { %v3492_v48 = vmul.f32 %v7803_v47, %v7228_v19 }
0x1c86   :  { %v3468_v42 = vpop.f32.mrf.mxu1 }
0x1c87   :  { %v3491_v52 = vmul.f32 %v7804_v49, %v3468_v42 }
0x1c88   :  { %v7231_v23 = vpop.f32.mrf.mxu1 }
0x1c89   :  { %v3494_v46 = vmul.f32 %v7801_v36, %v7231_v23 }
0x1c8a   :  { %v3478_v24 = vpop.f32.mrf.mxu1 }
0x1c8b   :  { %v3493_v39 = vmul.f32 %v7802_v25, %v3478_v24  ;;  %7232 = vmatprep.subr.msk.mxu1 %vm514_vm3, %v3494_v46 }
0x1c8c   :  { %7233 = vmatpush3.xpose.msk.msra.mxu1 %vm514_vm3, %v3494_v46 }
0x1c8d   :  { %3709 = vrot.lane.b32.xlu1 %v3493_v39, %s7875_s1  ;;  %7234 = vmatprep.subr.msk.mxu1 %vm514_vm3, %v3493_v39 }
0x1c90   :  { %7235 = vmatpush3.xpose.msk.msra.mxu1 %vm514_vm3, %v3493_v39 }
0x1c91   :  { %3707 = vrot.lane.b32.xlu1 %v3492_v48, %s7875_s1  ;;  %7236 = vmatprep.subr.msk.mxu1 %vm514_vm3, %v3492_v48 }
0x1c94   :  { %7237 = vmatpush3.xpose.msk.msra.mxu1 %vm514_vm3, %v3492_v48 }
0x1c95   :  { %3705 = vrot.lane.b32.xlu1 %v3491_v52, %s7875_s1  ;;  %7238 = vmatprep.subr.msk.mxu1 %vm514_vm3, %v3491_v52 }
0x1c98   :  { %7239 = vmatpush3.xpose.msk.msra.mxu1 %vm514_vm3, %v3491_v52 }
0x1c99   :  { %3703 = vrot.lane.b32.xlu1 %v3490_v43, %s7875_s1  ;;  %7240 = vmatprep.subr.msk.mxu1 %vm514_vm3, %v3490_v43 }
0x1c9c   :  { %7241 = vmatpush3.xpose.msk.msra.mxu1 %vm514_vm3, %v3490_v43 }
0x1c9d   :  { %3701 = vrot.lane.b32.xlu1 %v3489_v3, %s7875_s1  ;;  %7242 = vmatprep.subr.msk.mxu1 %vm514_vm3, %v3489_v3 }
0x1ca0   :  { %7243 = vmatpush3.xpose.msk.msra.mxu1 %vm514_vm3, %v3489_v3 }
0x1ca1   :  { %3697 = vrot.lane.b32.xlu1 %v3487_v37, %s7875_s1  ;;  %7244 = vmatprep.subr.msk.mxu1 %vm514_vm3, %v3488_v5 }
0x1ca4   :  { %7245 = vmatpush3.xpose.msk.msra.mxu1 %vm514_vm3, %v3488_v5 }
0x1ca5   :  { %7246 = vmatprep.subr.msk.mxu1 %vm514_vm3, %v3487_v37  ;;  %3806 = vrot.lane.b32.xlu1 %v8936_v11, %s7876_s30 }
0x1ca8   :  { %7247 = vmatpush3.xpose.msk.msra.mxu1 %vm514_vm3, %v3487_v37 }
0x1ca9   :  { %3802 = vrot.lane.b32.xlu1 %v8950_v51, %s7876_s30 }
0x1cab   :  { %7249 = vmatmul.mubr.msk.f32.vlgmr.msra.gmra.mxu1 %vm514_vm3, %v3279_v10 }
0x1cff   :  { %v3710_v58 = vpop.permute.xlu1 %3709 }
0x1d03   :  { %v3708_v14 = vpop.permute.xlu1 %3707 }
0x1d6b   :  { %v7250_v44 = vpop.f32.mrf.mxu1 }
0x1d6c   :  { %v3597_v12 = vadd.f32 %v7250_v44, %v2463_v30  ;;  %v6184_v30 = vld [vmem:[%s9798_s2 + $0x50] sm:$0xff] }
0x1d6d   :  { %v3591_v26 = vpop.f32.mrf.mxu1 }
0x1d6e   :  { %v3592_v11 = vadd.f32 %v3591_v26, %v2462_v17  ;;  %v3603_v33 = vsel %vm901_vm5, %v3597_v12, -inf  ;;  %v6185_v17 = vld [vmem:[%s9798_s2 + $0x58] sm:$0xff]  ;;  %v6183_v26 = vld [vmem:[%s9798_s2 + $0x48] sm:$0xff] }
0x1d70   :  { %v3600_v31 = vsel %vm901_vm5, %v3592_v11, -inf }
0x1d71   :  { %3601 = vmax.xlane.f32.xlu0 %v3600_v31 }
0x1d75   :  { %3604 = vmax.xlane.f32.xlu0 %v3603_v33 }
0x1d8b   :  { %3711 = vrot.lane.b32.xlu0 %v3494_v46, %s7875_s1 }
0x1d8f   :  { %3699 = vrot.lane.b32.xlu0 %v3488_v5, %s7875_s1 }
0x1d93   :  { %3808 = vrot.lane.b32.xlu0 %v8961_v7, %s7876_s30  ;;  %v3706_v7 = vpop.permute.xlu1 %3705 }
0x1d97   :  { %3804 = vrot.lane.b32.xlu0 %v8943_v20, %s7876_s30 }
0x1d9b   :  { %3814 = vrot.lane.b32.xlu0 %v9034_v45, %s7876_s30  ;;  %v3704_v45 = vpop.permute.xlu1 %3703 }
0x1d9f   :  { %v3702_v28 = vpop.permute.xlu1 %3701 }
0x1da3   :  { %v3698_v29 = vpop.permute.xlu1 %3697 }
0x1da7   :  { %v3807_v34 = vpop.permute.xlu1 %3806 }
0x1dab   :  { %v3803_v63 = vpop.permute.xlu1 %3802 }
0x1dfa   :  { %v3602_v51 = vpop.xlane.xlu0 %3601 }
0x1dfb   :  { %v3606_v22 = vsub.f32 %v3592_v11, %v3602_v51  ;;  %v6182_v11 = vld [vmem:[%s9798_s2 + $0x40] sm:$0xff] }
0x1dfd   :  { %v3608_v35 = vmul.f32 1.442695, %v3606_v22 }
0x1dfe   :  { %v3605_v38 = vpop.xlane.xlu0 %3604 }
0x1dff   :  { %7733 = vpow2.f32 %v3608_v35  ;;  %v3607_v40 = vsub.f32 %v3597_v12, %v3605_v38 }
0x1e01   :  { %v3610_v59 = vmul.f32 1.442695, %v3607_v40  ;;  %v6179_v40 = vld [vmem:[%s9764_s11 + $0x6] ss:$0 sm:$0xff] }
0x1e02   :  { %v3712_v8 = vpop.permute.xlu0 %3711 }
0x1e03   :  { %7735 = vpow2.f32 %v3610_v59  ;;  %7270 = vmatprep.subr.mxu0 %v3712_v8  ;;  %v6181_v59 = vld [vmem:[%s9765_s12 + $0x6] ss:$0 sm:$0xff] }
0x1e06   :  { %v3700_v60 = vpop.permute.xlu0 %3699 }
0x1e0a   :  { %v3809_v61 = vpop.permute.xlu0 %3808 }
0x1e0b   :  { %7289 = vmatprep.subr.mxu1 %v3809_v61 }
0x1e0c   :  { %v7734_v27 = vpop.eup %7733  ;;  %7290 = vmatpush3.msra.mxu1 %v3809_v61  ;;  %v6202_v61 = vld [vmem:[%s9762_s9 + $0x160] sm:$0xff] }
0x1e0d   :  { %7267 = vmatprep.mubr.msk.f32.mxu0 %vm901_vm5, %v7734_v27  ;;  %7291 = vmatprep.subr.mxu1 %v3807_v34 }
0x1e0e   :  { %7292 = vmatpush3.msra.mxu1 %v3807_v34  ;;  %v3805_v62 = vpop.permute.xlu0 %3804  ;;  %v6201_v34 = vld [vmem:[%s9762_s9 + $0x158] sm:$0xff] }
0x1e0f   :  { %7293 = vmatprep.subr.mxu1 %v3805_v62 }
0x1e10   :  { %v7736_v20 = vpop.eup %7735  ;;  %7294 = vmatpush3.msra.mxu1 %v3805_v62  ;;  %v6200_v62 = vld [vmem:[%s9762_s9 + $0x150] sm:$0xff] }
0x1e11   :  { %7268 = vmatmul.mubr.msk.f32.vlgmr.msra.gmra.mxu0 %vm901_vm5, %v7736_v20  ;;  %7295 = vmatprep.subr.mxu1 %v3803_v63 }
0x1e12   :  { %7271 = vmatpush3.msra.mxu0 %v3712_v8  ;;  %7296 = vmatpush3.msra.mxu1 %v3803_v63  ;;  %v3815_v24 = vpop.permute.xlu0 %3814  ;;  %v6199_v63 = vld [vmem:[%s9762_s9 + $0x148] sm:$0xff] }
0x1e13   :  { %7272 = vmatprep.subr.mxu0 %v3710_v58 }
0x1e14   :  { %7273 = vmatpush3.msra.mxu0 %v3710_v58 }
0x1e15   :  { %7274 = vmatprep.subr.mxu0 %v3708_v14 }
0x1e16   :  { %7275 = vmatpush3.msra.mxu0 %v3708_v14 }
0x1e17   :  { %7276 = vmatprep.subr.mxu0 %v3706_v7 }
0x1e18   :  { %7277 = vmatpush3.msra.mxu0 %v3706_v7 }
0x1e19   :  { %7278 = vmatprep.subr.mxu0 %v3704_v45 }
0x1e1a   :  { %7279 = vmatpush3.msra.mxu0 %v3704_v45 }
0x1e1b   :  { %7280 = vmatprep.subr.mxu0 %v3702_v28 }
0x1e1c   :  { %7281 = vmatpush3.msra.mxu0 %v3702_v28  ;;  %v6205_v28 = vld [vmem:[%s9762_s9 + $0x178] sm:$0xff] }
0x1e1d   :  { %7282 = vmatprep.subr.mxu0 %v3700_v60  ;;  %7311 = vmatprep.subr.mxu1 %v6205_v28 }
0x1e1e   :  { %7283 = vmatpush3.msra.mxu0 %v3700_v60  ;;  %v6204_v60 = vld [vmem:[%s9762_s9 + $0x170] sm:$0xff] }
0x1e1f   :  { %7284 = vmatprep.subr.mxu0 %v3698_v29 }
0x1e20   :  { %7285 = vmatpush3.msra.mxu0 %v3698_v29  ;;  %v6203_v29 = vld [vmem:[%s9762_s9 + $0x168] sm:$0xff] }
0x1e21   :  { %7300 = vmatprep.subr.mxu0 %v6185_v17 }
0x1ed1   :  { %v7269_v0 = vpop.f32.mrf.mxu0 }
0x1ed2   :  { %7737 = vrcp.f32 %v7269_v0  ;;  %v6198_v0 = vld [vmem:[%s9762_s9 + $0x140] sm:$0xff] }
0x1ed3   :  { %v3684_v9 = vpop.f32.mrf.mxu0 }
0x1ed4   :  { %7739 = vrcp.f32 %v3684_v9  ;;  %v6197_v9 = vld [vmem:[%s9762_s9 + $0x138] sm:$0xff] }
0x1edf   :  { %v7738_v13 = vpop.eup %7737 }
0x1ee0   :  { %v3696_v23 = vmul.f32 %v7738_v13, %v7736_v20  ;;  %v6196_v13 = vld [vmem:[%s9762_s9 + $0x130] sm:$0xff] }
0x1ee1   :  { %v7740_v19 = vpop.eup %7739 }
0x1ee2   :  { %v3695_v42 = vmul.f32 %v7740_v19, %v7734_v27  ;;  %v6195_v19 = vld [vmem:[%s9762_s9 + $0x128] sm:$0xff] }
0x1ee4   :  { %7286 = vmatprep.mubr.msk.f32.mxu0 %vm901_vm5, %v3695_v42  ;;  %v6194_v42 = vld [vmem:[%s9762_s9 + $0x120] sm:$0xff] }
0x1ee5   :  { %7287 = vmatmul.mubr.msk.f32.vlgmr.msra.gmra.mxu0 %vm901_vm5, %v3696_v23  ;;  %v6193_v23 = vld [vmem:[%s9762_s9 + $0x118] sm:$0xff] }
0x1ee6   :  { %7301 = vmatpush3.msra.mxu0 %v6185_v17 }
0x1ee7   :  { %7302 = vmatprep.subr.mxu0 %v6184_v30 }
0x1ee8   :  { %7303 = vmatpush3.msra.mxu0 %v6184_v30 }
0x1ee9   :  { %7304 = vmatprep.subr.mxu0 %v6183_v26 }
0x1eea   :  { %7305 = vmatpush3.msra.mxu0 %v6183_v26 }
0x1eeb   :  { %7306 = vmatprep.subr.mxu0 %v6182_v11 }
0x1eec   :  { %7307 = vmatpush3.msra.mxu0 %v6182_v11 }
0x1fa5   :  { %v7288_v36 = vpop.f32.mrf.mxu0 }
0x1fa7   :  { %v3793_v46 = vpop.f32.mrf.mxu0 }
0x1fa8   :  { %7297 = vmatprep.mubr.msk.f32.mxu1 %vm514_vm3, %v3793_v46  ;;  %v6191_v46 = vld [vmem:[%s9762_s9 + $0x108] sm:$0xff] }
0x1fa9   :  { %7298 = vmatmul.mubr.msk.f32.vlgmr.msra.gmra.mxu1 %vm514_vm3, %v7288_v36  ;;  %v6192_v36 = vld [vmem:[%s9762_s9 + $0x110] sm:$0xff] }
0x1faa   :  { %7312 = vmatpush3.msra.mxu1 %v6205_v28 }
0x1fab   :  { %7313 = vmatprep.subr.mxu1 %v6204_v60 }
0x1fac   :  { %7314 = vmatpush3.msra.mxu1 %v6204_v60 }
0x1fad   :  { %7315 = vmatprep.subr.mxu1 %v6203_v29 }
0x1fae   :  { %7316 = vmatpush3.msra.mxu1 %v6203_v29 }
0x1faf   :  { %7317 = vmatprep.subr.mxu1 %v6202_v61 }
0x1fb0   :  { %7318 = vmatpush3.msra.mxu1 %v6202_v61 }
0x1fb1   :  { %7319 = vmatprep.subr.mxu1 %v6201_v34 }
0x1fb2   :  { %7320 = vmatpush3.msra.mxu1 %v6201_v34 }
0x1fb3   :  { %7321 = vmatprep.subr.mxu1 %v6200_v62 }
0x1fb4   :  { %7322 = vmatpush3.msra.mxu1 %v6200_v62 }
0x1fb5   :  { %7323 = vmatprep.subr.mxu1 %v6199_v63 }
0x1fb6   :  { %7324 = vmatpush3.msra.mxu1 %v6199_v63 }
0x1fb7   :  { %7325 = vmatprep.subr.mxu1 %v6198_v0 }
0x1fb8   :  { %7326 = vmatpush3.msra.mxu1 %v6198_v0 }
0x1fb9   :  { %7327 = vmatprep.subr.mxu1 %v6197_v9 }
0x1fba   :  { %7328 = vmatpush3.msra.mxu1 %v6197_v9  ;;  %v9305_v9 = vld [vmem:[%s9764_s11 + $0x7] ss:$0 sm:$0xff] }
0x1fbb   :  { %7329 = vmatprep.subr.mxu1 %v6196_v13 }
0x1fbc   :  { %7330 = vmatpush3.msra.mxu1 %v6196_v13 }
0x1fbd   :  { %7331 = vmatprep.subr.mxu1 %v6195_v19 }
0x1fbe   :  { %7332 = vmatpush3.msra.mxu1 %v6195_v19 }
0x1fbf   :  { %7333 = vmatprep.subr.mxu1 %v6194_v42 }
0x1fc0   :  { %7334 = vmatpush3.msra.mxu1 %v6194_v42 }
0x1fc1   :  { %7335 = vmatprep.subr.mxu1 %v6193_v23 }
0x1fc2   :  { %7336 = vmatpush3.msra.mxu1 %v6193_v23 }
0x1fc3   :  { %7337 = vmatprep.subr.mxu1 %v6192_v36 }
0x1fc4   :  { %7338 = vmatpush3.msra.mxu1 %v6192_v36  ;;  %v9312_v36 = vld [vmem:[%s9765_s12 + $0x7] ss:$0 sm:$0xff] }
0x1fc5   :  { %7339 = vmatprep.subr.mxu1 %v6191_v46 }
0x1fc6   :  { %7340 = vmatpush3.msra.mxu1 %v6191_v46 }
0x2069   :  { %v7299_v25 = vpop.f32.mrf.mxu1 }
0x206a   :  { %v3895_v39 = vadd.f32 %v7299_v25, %v3815_v24  ;;  %v6187_v25 = vld [vmem:[%s9761_s8 + $0x2] ss:$0 sm:$0xff] }
0x206b   :  { %v3889_v47 = vpop.f32.mrf.mxu1 }
0x206c   :  { %v9157_v48 = vadd.f32 %v3895_v39, %v9022_v15  ;;  %v3890_v49 = vadd.f32 %v3889_v47, %v3815_v24  ;;  %v6190_v24 = vld [vmem:[%s9762_s9 + $0x100] sm:$0xff] }
0x206d   :  { %7341 = vmatprep.subr.mxu1 %v6190_v24 }
0x206e   :  { %v9160_v52 = vadd.f32 %v3890_v49, %v9025_v21  ;;  %v3903_v53 = vsel %vm514_vm3, %v9157_v48, 0.0  ;;  %7342 = vmatpush3.msra.mxu1 %v6190_v24 }
0x206f   :  { %3904 = vadd.xlane.f32.xlu0 %v3903_v53  ;;  %7392 = vmatprep.subr.mxu1 %v8851_v54 }
0x2070   :  { %v3900_v43 = vsel %vm514_vm3, %v9160_v52, 0.0 }
0x2071   :  { %3901 = vadd.xlane.f32.xlu1 %v3900_v43 }
0x20f8   :  { %v3905_v41 = vpop.xlane.xlu0 %3904 }
0x20f9   :  { %v3907_v3 = vmul.f32 0.03125, %v3905_v41 }
0x20fa   :  { %v3902_v4 = vpop.xlane.xlu1 %3901 }
0x20fb   :  { %v3906_v5 = vmul.f32 0.03125, %v3902_v4  ;;  %v3909_v6 = vsub.f32 %v9157_v48, %v3907_v3 }
0x20fd   :  { %v3908_v15 = vsub.f32 %v9160_v52, %v3906_v5  ;;  %v3911_v10 = vmul.f32 %v3909_v6, %v3909_v6 }
0x20ff   :  { %v3910_v37 = vmul.f32 %v3908_v15, %v3908_v15  ;;  %v3915_v44 = vsel %vm514_vm3, %v3911_v10, 0.0 }
0x2101   :  { %v3912_v21 = vsel %vm514_vm3, %v3910_v37, 0.0 }
0x2102   :  { %3913 = vadd.xlane.f32.xlu0 %v3912_v21 }
0x2106   :  { %3916 = vadd.xlane.f32.xlu0 %v3915_v44 }
0x218b   :  { %v3914_v12 = vpop.xlane.xlu0 %3913 }
0x218c   :  { %v3918_v31 = vmul.f32 0.03125, %v3914_v12 }
0x218e   :  { %v3920_v33 = vadd.f32 1e-05, %v3918_v31 }
0x218f   :  { %v3917_v51 = vpop.xlane.xlu0 %3916 }
0x2190   :  { %7741 = vrsqrt.f32 %v3920_v33  ;;  %v3919_v22 = vmul.f32 0.03125, %v3917_v51 }
0x2192   :  { %v3921_v35 = vadd.f32 1e-05, %v3919_v22 }
0x2194   :  { %7743 = vrsqrt.f32 %v3921_v35 }
0x219d   :  { %v7742_v38 = vpop.eup %7741 }
0x219e   :  { %v3924_v58 = vmul.f32 %v7742_v38, %v3908_v15 }
0x21a0   :  { %v3934_v8 = vmul.f32 %v6179_v40, %v3924_v58 }
0x21a1   :  { %v7744_v14 = vpop.eup %7743 }
0x21a2   :  { %v3925_v27 = vmul.f32 %v7744_v14, %v3909_v6  ;;  %v3944_v7 = vadd.f32 %v6181_v59, %v3934_v8 }
0x21a4   :  { %v3935_v20 = vmul.f32 %v6179_v40, %v3925_v27  ;;  %7308 = vmatprep.mubr.msk.f32.mxu0 %vm514_vm3, %v3944_v7  ;;  %v9277_v27 = vld [vmem:[%s9796_s5 + $0x98] sm:$0xff]  ;;  %v9282_v7 = vld [vmem:[%s9796_s5 + $0x90] sm:$0xff] }
0x21a5   :  { %7346 = vmatprep.subr.mxu0 %v9277_v27 }
0x21a6   :  { %v3945_v45 = vadd.f32 %v6181_v59, %v3935_v20  ;;  %v9289_v20 = vld [vmem:[%s9796_s5 + $0x88] sm:$0xff] }
0x21a8   :  { %7309 = vmatmul.mubr.msk.f32.vlgmr.msra.gmra.mxu0 %vm514_vm3, %v3945_v45  ;;  %v9296_v45 = vld [vmem:[%s9796_s5 + $0x80] sm:$0xff] }
0x21a9   :  { %7347 = vmatpush3.msra.mxu0 %v9277_v27 }
0x21aa   :  { %7348 = vmatprep.subr.mxu0 %v9282_v7 }
0x21ab   :  { %7349 = vmatpush3.msra.mxu0 %v9282_v7 }
0x21ac   :  { %7350 = vmatprep.subr.mxu0 %v9289_v20 }
0x21ad   :  { %7351 = vmatpush3.msra.mxu0 %v9289_v20 }
0x21ae   :  { %7352 = vmatprep.subr.mxu0 %v9296_v45 }
0x21af   :  { %7353 = vmatpush3.msra.mxu0 %v9296_v45 }
0x2268   :  { %v7310_v39 = vpop.f32.mrf.mxu0 }
0x2269   :  { %v4037_v47 = vadd.f32 %v7310_v39, %v6187_v25  ;;  %v9325_v39 = vld [vmem:[%s9797_s25 + $0x4] ss:$0 sm:$0xff] }
0x226a   :  { %v4031_v49 = vpop.f32.mrf.mxu0 }
0x226b   :  { %v4043_v53 = vmul.f32 0.044715, %v4037_v47  ;;  %v4032_v43 = vadd.f32 %v6187_v25, %v4031_v49  ;;  %v4041_v12 = vmul.f32 0.5, %v4037_v47  ;;  %v7809_v25 = vld [vmem:[%s9770_s17] sm:$0xff] }
0x226d   :  { %v4045_v41 = vmul.f32 %v4043_v53, %v4037_v47  ;;  %v4042_v3 = vmul.f32 0.044715, %v4032_v43  ;;  %v4040_v26 = vmul.f32 0.5, %v4032_v43 }
0x226f   :  { %v4047_v4 = vmul.f32 %v4045_v41, %v4037_v47  ;;  %v4044_v5 = vmul.f32 %v4042_v3, %v4032_v43 }
0x2271   :  { %v4049_v6 = vadd.f32 %v4047_v4, %v4037_v47  ;;  %v4046_v15 = vmul.f32 %v4044_v5, %v4032_v43  ;;  %v7810_v4 = vld [vmem:[%s9770_s17 + $0x8] sm:$0xff]  ;;  %v7811_v5 = vld [vmem:[%s9770_s17 + $0x10] sm:$0xff] }
0x2273   :  { %v4048_v37 = vadd.f32 %v4046_v15, %v4032_v43  ;;  %v4051_v21 = vmul.f32 0.7978846, %v4049_v6  ;;  %v7812_v6 = vld [vmem:[%s9770_s17 + $0x18] sm:$0xff]  ;;  %v7813_v15 = vld [vmem:[%s9770_s17 + $0x20] sm:$0xff] }
0x2275   :  { %v4050_v10 = vmul.f32 0.7978846, %v4048_v37  ;;  %7745 = vtanh.f32 %v4051_v21  ;;  %v7814_v37 = vld [vmem:[%s9770_s17 + $0x28] sm:$0xff]  ;;  %v7815_v21 = vld [vmem:[%s9770_s17 + $0x30] sm:$0xff] }
0x2277   :  { %7747 = vtanh.f32 %v4050_v10  ;;  %v7816_v10 = vld [vmem:[%s9770_s17 + $0x38] sm:$0xff] }
0x2282   :  { %v7746_v44 = vpop.eup %7745 }
0x2283   :  { %v4055_v30 = vadd.f32 1.0, %v7746_v44 }
0x2284   :  { %v7748_v17 = vpop.eup %7747 }
0x2285   :  { %v4054_v11 = vadd.f32 1.0, %v7748_v17  ;;  %v4057_v33 = vmul.f32 %v4055_v30, %v4041_v12 }
0x2287   :  { %v4056_v31 = vmul.f32 %v4054_v11, %v4040_v26 }
0x2289   :  { %7343 = vmatprep.mubr.f32.mxu1 %v4056_v31 }
0x228a   :  { %7344 = vmatmul.mubr.f32.vlgmr.msra.gmra.mxu1 %v4057_v33  ;;  %v7817_v33 = vld [vmem:[%s9771_s18 + $0x38] sm:$0xff] }
0x228b   :  { %7393 = vmatpush3.msra.mxu1 %v8851_v54  ;;  %v6207_v54 = vld [vmem:[%s9763_s10 + $0x2] ss:$0 sm:$0xff] }
0x228c   :  { %7394 = vmatprep.subr.mxu1 %v8858_v18 }
0x228d   :  { %7395 = vmatpush3.msra.mxu1 %v8858_v18 }
0x228e   :  { %7396 = vmatprep.subr.mxu1 %v8864_v55 }
0x228f   :  { %7397 = vmatpush3.msra.mxu1 %v8864_v55 }
0x2290   :  { %7398 = vmatprep.subr.mxu1 %v8873_v16 }
0x2291   :  { %7399 = vmatpush3.msra.mxu1 %v8873_v16 }
0x2292   :  { %7400 = vmatprep.subr.mxu1 %v8879_v56 }
0x2293   :  { %7401 = vmatpush3.msra.mxu1 %v8879_v56 }
0x2294   :  { %7402 = vmatprep.subr.mxu1 %v8889_v57 }
0x2295   :  { %7403 = vmatpush3.msra.mxu1 %v8889_v57 }
0x2296   :  { %7404 = vmatprep.subr.mxu1 %v8897_v1 }
0x2297   :  { %7405 = vmatpush3.msra.mxu1 %v8897_v1 }
0x2298   :  { %7406 = vmatprep.subr.mxu1 %v8905_v2 }
0x2299   :  { %7407 = vmatpush3.msra.mxu1 %v8905_v2 }
0x234a   :  { %v7345_v18 = vpop.f32.mrf.mxu1 }
0x234b   :  { %v4155_v55 = vadd.f32 %v7345_v18, %v6207_v54 }
0x234c   :  { %v4149_v16 = vpop.f32.mrf.mxu1 }
0x234d   :  { %v9261_v56 = vadd.f32 %v4155_v55, %v9157_v48  ;;  %v4150_v51 = vadd.f32 %v6207_v54, %v4149_v16  ;;  %v7818_v55 = vld [vmem:[%s9771_s18 + $0x30] sm:$0xff] }
0x234f   :  { %v9264_v57 = vadd.f32 %v4150_v51, %v9160_v52  ;;  %v4163_v1 = vsel %vm514_vm3, %v9261_v56, 0.0  ;;  %v7819_v51 = vld [vmem:[%s9771_s18 + $0x28] sm:$0xff] }
0x2350   :  { %4164 = vadd.xlane.f32.xlu0 %v4163_v1 }
0x2351   :  { %v4160_v2 = vsel %vm514_vm3, %v9264_v57, 0.0 }
0x2352   :  { %4161 = vadd.xlane.f32.xlu1 %v4160_v2  ;;  %v7820_v2 = vld [vmem:[%s9771_s18 + $0x20] sm:$0xff] }
0x23d9   :  { %v4165_v22 = vpop.xlane.xlu0 %4164 }
0x23da   :  { %v4167_v35 = vmul.f32 0.03125, %v4165_v22 }
0x23db   :  { %v4162_v38 = vpop.xlane.xlu1 %4161 }
0x23dc   :  { %v4169_v40 = vsub.f32 %v9261_v56, %v4167_v35  ;;  %v4166_v58 = vmul.f32 0.03125, %v4162_v38  ;;  %v7821_v35 = vld [vmem:[%s9771_s18 + $0x18] sm:$0xff] }
0x23de   :  { %v4168_v48 = vsub.f32 %v9264_v57, %v4166_v58  ;;  %v4171_v59 = vmul.f32 %v4169_v40, %v4169_v40 }
0x23e0   :  { %v4175_v52 = vsel %vm514_vm3, %v4171_v59, 0.0  ;;  %v4170_v8 = vmul.f32 %v4168_v48, %v4168_v48 }
0x23e1   :  { %4176 = vadd.xlane.f32.xlu0 %v4175_v52  ;;  %v7824_v52 = vld [vmem:[%s9771_s18] sm:$0xff] }
0x23e2   :  { %v4172_v14 = vsel %vm514_vm3, %v4170_v8, 0.0 }
0x23e3   :  { %4173 = vadd.xlane.f32.xlu1 %v4172_v14 }
0x246a   :  { %v4177_v28 = vpop.xlane.xlu0 %4176 }
0x246b   :  { %v4179_v60 = vmul.f32 0.03125, %v4177_v28  ;;  %v7825_v28 = vld [vmem:[%s9774_s21 + $0x8] sm:$0xff] }
0x246c   :  { %v4174_v29 = vpop.xlane.xlu1 %4173 }
0x246d   :  { %v4181_v61 = vadd.f32 1e-05, %v4179_v60  ;;  %v4178_v34 = vmul.f32 0.03125, %v4174_v29 }
0x246f   :  { %7749 = vrsqrt.f32 %v4181_v61  ;;  %v4180_v62 = vadd.f32 1e-05, %v4178_v34  ;;  %v7826_v61 = vld [vmem:[%s9774_s21] sm:$0xff] }
0x2471   :  { %7751 = vrsqrt.f32 %v4180_v62 }
0x247c   :  { %v7750_v63 = vpop.eup %7749 }
0x247d   :  { %v4185_v0 = vmul.f32 %v7750_v63, %v4169_v40  ;;  %v7822_v40 = vld [vmem:[%s9771_s18 + $0x10] sm:$0xff] }
0x247e   :  { %v7752_v13 = vpop.eup %7751 }
0x247f   :  { %v4184_v19 = vmul.f32 %v7752_v13, %v4168_v48  ;;  %v4195_v42 = vmul.f32 %v9305_v9, %v4185_v0  ;;  %v7823_v48 = vld [vmem:[%s9771_s18 + $0x8] sm:$0xff]  ;;  %v9430_v0 = vld [vmem:[%s9796_s5 + $0xb0] sm:$0xff] }
0x2481   :  { %v4194_v23 = vmul.f32 %v9305_v9, %v4184_v19  ;;  %v4205_v24 = vadd.f32 %v9312_v36, %v4195_v42 }
0x2483   :  { %v4204_v46 = vadd.f32 %v9312_v36, %v4194_v23 }
0x2485   :  { %7354 = vmatprep.mubr.msk.f32.mxu0 %vm514_vm3, %v4204_v46 }
0x2486   :  { %7355 = vmatmul.mubr.msk.f32.vlgmr.msra.gmra.mxu0 %vm514_vm3, %v4205_v24 }
0x2487   :  { %7361 = vmatprep.mubr.msk.f32.mxu0 %vm660_vm4, %v7809_v25 }
0x2546   :  { %v7356_v47 = vpop.f32.mrf.mxu0 }
0x2547   :  { %v9328_v49 = vadd.f32 %v7356_v47, %v9325_v39 }
0x2548   :  { %v4291_v53 = vpop.f32.mrf.mxu0 }
0x2549   :  { %v4292_v43 = vadd.f32 %v9325_v39, %v4291_v53  ;;  %4304 = vrot.lane.b32.xlu1 %v9328_v49, %s7875_s1 }
0x254b   :  { %4302 = vrot.lane.b32.xlu0 %v4292_v43, %s7875_s1 }
0x25bb   :  { %v4305_v41 = vpop.permute.xlu1 %4304 }
0x25bc   :  { %7357 = vmatprep.subr.mxu0 %v4305_v41 }
0x25bd   :  { %7358 = vmatpush3.msra.mxu0 %v4305_v41  ;;  %v4303_v3 = vpop.permute.xlu0 %4302 }
0x25be   :  { %7359 = vmatprep.subr.mxu0 %v4303_v3 }
0x25bf   :  { %7360 = vmatpush3.msra.mxu0 %v4303_v3 }
0x25c0   :  { %7362 = vmatmul.mubr.msk.f32.vlgmr.msra.gmra.mxu0 %vm660_vm4, %v7810_v4 }
0x25c1   :  { %7364 = vmatprep.mubr.msk.f32.mxu0 %vm660_vm4, %v7811_v5 }
0x25c4   :  { %7365 = vmatmul.mubr.msk.f32.gmra.mxu0 %vm660_vm4, %v7812_v6 }
0x25c5   :  { %7367 = vmatprep.mubr.msk.f32.mxu0 %vm660_vm4, %v7813_v15 }
0x25c8   :  { %7368 = vmatmul.mubr.msk.f32.gmra.mxu0 %vm660_vm4, %v7814_v37 }
0x25c9   :  { %7370 = vmatprep.mubr.msk.f32.mxu0 %vm660_vm4, %v7815_v21 }
0x25cc   :  { %7371 = vmatmul.mubr.msk.f32.gmra.mxu0 %vm660_vm4, %v7816_v10 }
0x25cd   :  { %7389 = vmatprep.mubr.msk.f32.mxu0 %vm514_vm3, %v4292_v43 }
0x2680   :  { %v7363_v44 = vpop.f32.mrf.mxu0 }
0x2681   :  { %v4414_v59 = vmul.f32 %v7823_v48, %v7363_v44 }
0x2682   :  { %v4374_v17 = vpop.f32.mrf.mxu0 }
0x2683   :  { %v4413_v8 = vmul.f32 %v7824_v52, %v4374_v17 }
0x2684   :  { %v7366_v30 = vpop.f32.mrf.mxu0 }
0x2685   :  { %v4416_v38 = vmul.f32 %v7821_v35, %v7366_v30 }
0x2686   :  { %v4384_v26 = vpop.f32.mrf.mxu0 }
0x2687   :  { %v4415_v58 = vmul.f32 %v7822_v40, %v4384_v26 }
0x2688   :  { %v7369_v11 = vpop.f32.mrf.mxu0 }
0x2689   :  { %v4418_v1 = vmul.f32 %v7819_v51, %v7369_v11  ;;  %v7833_v51 = vld [vmem:[%s9769_s16 + $0x8] sm:$0xff] }
0x268a   :  { %v4394_v12 = vpop.f32.mrf.mxu0 }
0x268b   :  { %v4417_v22 = vmul.f32 %v7820_v2, %v4394_v12 }
0x268c   :  { %v7372_v31 = vpop.f32.mrf.mxu0 }
0x268d   :  { %v4420_v54 = vmul.f32 %v7817_v33, %v7372_v31 }
0x268e   :  { %v4404_v18 = vpop.f32.mrf.mxu0 }
0x268f   :  { %v4419_v16 = vmul.f32 %v7818_v55, %v4404_v18  ;;  %7373 = vmatprep.subr.msk.mxu0 %vm514_vm3, %v4420_v54  ;;  %v7829_v18 = vld [vmem:[%s9769_s16 + $0x28] sm:$0xff]  ;;  %v7831_v55 = vld [vmem:[%s9769_s16 + $0x18] sm:$0xff] }
0x2690   :  { %7374 = vmatpush3.xpose.msk.msra.mxu0 %vm514_vm3, %v4420_v54 }
0x2691   :  { %7375 = vmatprep.subr.msk.mxu0 %vm514_vm3, %v4419_v16 }
0x2694   :  { %7376 = vmatpush3.xpose.msk.msra.mxu0 %vm514_vm3, %v4419_v16 }
0x2695   :  { %7377 = vmatprep.subr.msk.mxu0 %vm514_vm3, %v4418_v1 }
0x2698   :  { %7378 = vmatpush3.xpose.msk.msra.mxu0 %vm514_vm3, %v4418_v1 }
0x2699   :  { %7379 = vmatprep.subr.msk.mxu0 %vm514_vm3, %v4417_v22 }
0x269c   :  { %7380 = vmatpush3.xpose.msk.msra.mxu0 %vm514_vm3, %v4417_v22 }
0x269d   :  { %7381 = vmatprep.subr.msk.mxu0 %vm514_vm3, %v4416_v38 }
0x26a0   :  { %7382 = vmatpush3.xpose.msk.msra.mxu0 %vm514_vm3, %v4416_v38 }
0x26a1   :  { %7383 = vmatprep.subr.msk.mxu0 %vm514_vm3, %v4415_v58 }
0x26a4   :  { %7384 = vmatpush3.xpose.msk.msra.mxu0 %vm514_vm3, %v4415_v58 }
0x26a5   :  { %7385 = vmatprep.subr.msk.mxu0 %vm514_vm3, %v4414_v59 }
0x26a8   :  { %7386 = vmatpush3.xpose.msk.msra.mxu0 %vm514_vm3, %v4414_v59 }
0x26a9   :  { %7387 = vmatprep.subr.msk.mxu0 %vm514_vm3, %v4413_v8 }
0x26ac   :  { %7388 = vmatpush3.xpose.msk.msra.mxu0 %vm514_vm3, %v4413_v8 }
0x26af   :  { %7390 = vmatmul.mubr.msk.f32.vlgmr.msra.gmra.mxu0 %vm514_vm3, %v9328_v49 }
0x276f   :  { %v7391_v14 = vpop.f32.mrf.mxu0 }
0x2770   :  { %v4521_v60 = vadd.f32 %v7825_v28, %v7391_v14 }
0x2771   :  { %v4515_v29 = vpop.f32.mrf.mxu0 }
0x2772   :  { %v4516_v34 = vadd.f32 %v7826_v61, %v4515_v29  ;;  %v4527_v62 = vsel %vm901_vm5, %v4521_v60, -inf }
0x2773   :  { %4528 = vmax.xlane.f32.xlu0 %v4527_v62 }
0x2774   :  { %v4524_v63 = vsel %vm901_vm5, %v4516_v34, -inf }
0x2775   :  { %4525 = vmax.xlane.f32.xlu1 %v4524_v63 }
0x2786   :  { %4635 = vrot.lane.b32.xlu1 %v4420_v54, %s7875_s1  ;;  %v7827_v54 = vld [vmem:[%s9769_s16 + $0x38] sm:$0xff] }
0x2789   :  { %4633 = vrot.lane.b32.xlu0 %v4419_v16, %s7875_s1  ;;  %v7832_v16 = vld [vmem:[%s9769_s16 + $0x10] sm:$0xff] }
0x278a   :  { %4631 = vrot.lane.b32.xlu1 %v4418_v1, %s7875_s1  ;;  %v7834_v1 = vld [vmem:[%s9769_s16] sm:$0xff] }
0x278d   :  { %4625 = vrot.lane.b32.xlu0 %v4415_v58, %s7875_s1 }
0x278e   :  { %4629 = vrot.lane.b32.xlu1 %v4417_v22, %s7875_s1 }
0x2791   :  { %4621 = vrot.lane.b32.xlu0 %v4413_v8, %s7875_s1 }
0x2792   :  { %4627 = vrot.lane.b32.xlu1 %v4416_v38, %s7875_s1 }
0x2795   :  { %4734 = vrot.lane.b32.xlu0 %v9282_v7, %s7876_s30  ;;  %v9439_v7 = vld [vmem:[%s9796_s5 + $0xa0] sm:$0xff] }
0x2796   :  { %4623 = vrot.lane.b32.xlu1 %v4414_v59, %s7875_s1 }
0x2799   :  { %4730 = vrot.lane.b32.xlu0 %v9296_v45, %s7876_s30 }
0x279a   :  { %4736 = vrot.lane.b32.xlu1 %v9277_v27, %s7876_s30  ;;  %v9444_v27 = vld [vmem:[%s9796_s5 + $0xb8] sm:$0xff] }
0x279d   :  { %4960 = vrot.lane.b32.xlu0 %v9430_v0, %s7875_s1 }
0x279e   :  { %4732 = vrot.lane.b32.xlu1 %v9289_v20, %s7876_s30  ;;  %v9453_v20 = vld [vmem:[%s9796_s5 + $0xa8] sm:$0xff] }
0x27a1   :  { %4956 = vrot.lane.b32.xlu0 %v9439_v7, %s7875_s1 }
0x27a2   :  { %4962 = vrot.lane.b32.xlu1 %v9444_v27, %s7875_s1 }
0x27a6   :  { %4958 = vrot.lane.b32.xlu1 %v9453_v20, %s7875_s1 }
0x27aa   :  { %4742 = vrot.lane.b32.xlu1 %v9325_v39, %s7876_s30 }
0x27fc   :  { %v4529_v45 = vpop.xlane.xlu0 %4528 }
0x27fd   :  { %v4531_v13 = vsub.f32 %v4521_v60, %v4529_v45 }
0x27fe   :  { %v4526_v19 = vpop.xlane.xlu1 %4525 }
0x27ff   :  { %v4530_v42 = vsub.f32 %v4516_v34, %v4526_v19  ;;  %v4534_v23 = vmul.f32 1.442695, %v4531_v13  ;;  %v9518_v13 = vld [vmem:[%s9797_s25 + $0x5] ss:$0 sm:$0xff]  ;;  %s7877_s25 = smov [#allocation2]  }
0x2800   :  { %v4634_v25 = vpop.permute.xlu0 %4633  ;;  %s5962_s5 = sshll.u32 %s7877_s25, 4  ;;  %s5963_s5 = int_to_ptr.vmem [resolvable:$true] %s5962_s5 }
0x2801   :  { %v4532_v46 = vmul.f32 1.442695, %v4530_v42  ;;  %p7858_p1 = scmp.lt.s32.totalorder %s5963_s5, %s5963_s5 }
0x2802   :  { %v4636_v24 = vpop.permute.xlu1 %4635 }
0x2803   :  { %7753 = vpow2.f32 %v4532_v46  ;;  %7411 = vmatprep.subr.mxu0 %v4636_v24 }
0x2804   :  { %7755 = vpow2.f32 %v4534_v23  ;;  %7412 = vmatpush3.msra.mxu0 %v4636_v24  ;;  %v4626_v39 = vpop.permute.xlu0 %4625 }
0x2805   :  { %7413 = vmatprep.subr.mxu0 %v4634_v25 }
0x2806   :  { %7414 = vmatpush3.msra.mxu0 %v4634_v25  ;;  %v4632_v47 = vpop.permute.xlu1 %4631 }
0x2807   :  { %7415 = vmatprep.subr.mxu0 %v4632_v47 }
0x2808   :  { %7416 = vmatpush3.msra.mxu0 %v4632_v47  ;;  %v4622_v4 = vpop.permute.xlu0 %4621 }
0x280a   :  { %v4630_v49 = vpop.permute.xlu1 %4629 }
0x280b   :  { %7417 = vmatprep.subr.mxu0 %v4630_v49 }
0x280c   :  { %7418 = vmatpush3.msra.mxu0 %v4630_v49  ;;  %v4735_v6 = vpop.permute.xlu0 %4734 }
0x280e   :  { %v4628_v53 = vpop.permute.xlu1 %4627 }
0x280f   :  { %7419 = vmatprep.subr.mxu0 %v4628_v53 }
0x2810   :  { %v7754_v43 = vpop.eup %7753  ;;  %7420 = vmatpush3.msra.mxu0 %v4628_v53  ;;  %v4731_v37 = vpop.permute.xlu0 %4730 }
0x2811   :  { %v7756_v41 = vpop.eup %7755  ;;  %7408 = vmatprep.mubr.msk.f32.mxu1 %vm901_vm5, %v7754_v43  ;;  %7421 = vmatprep.subr.mxu0 %v4626_v39 }
0x2812   :  { %7409 = vmatmul.mubr.msk.f32.vlgmr.msra.gmra.mxu1 %vm901_vm5, %v7756_v41  ;;  %7422 = vmatpush3.msra.mxu0 %v4626_v39  ;;  %v4624_v3 = vpop.permute.xlu1 %4623 }
0x2813   :  { %7423 = vmatprep.subr.mxu0 %v4624_v3 }
0x2814   :  { %7424 = vmatpush3.msra.mxu0 %v4624_v3  ;;  %v4961_v11 = vpop.permute.xlu0 %4960 }
0x2815   :  { %7425 = vmatprep.subr.mxu0 %v4622_v4 }
0x2816   :  { %7426 = vmatpush3.msra.mxu0 %v4622_v4  ;;  %v4737_v5 = vpop.permute.xlu1 %4736 }
0x2817   :  { %7430 = vmatprep.subr.mxu1 %v4737_v5 }
0x2818   :  { %7431 = vmatpush3.msra.mxu1 %v4737_v5  ;;  %v4957_v33 = vpop.permute.xlu0 %4956 }
0x2819   :  { %7432 = vmatprep.subr.mxu1 %v4735_v6 }
0x281a   :  { %v4733_v15 = vpop.permute.xlu1 %4732  ;;  %7433 = vmatpush3.msra.mxu1 %v4735_v6 }
0x281b   :  { %7434 = vmatprep.subr.mxu1 %v4733_v15 }
0x281c   :  { %7435 = vmatpush3.msra.mxu1 %v4733_v15 }
0x281d   :  { %7436 = vmatprep.subr.mxu1 %v4731_v37 }
0x281e   :  { %v4963_v21 = vpop.permute.xlu1 %4962  ;;  %7437 = vmatpush3.msra.mxu1 %v4731_v37 }
0x281f   :  { %7452 = vmatprep.subr.mxu0 %v4963_v21  ;;  %7441 = vmatprep.subr.mxu1 %v9444_v27 }
0x2822   :  { %v4959_v31 = vpop.permute.xlu1 %4958 }
0x2826   :  { %v4743_v35 = vpop.permute.xlu1 %4742 }
0x28d2   :  { %v7410_v10 = vpop.f32.mrf.mxu1 }
0x28d3   :  { %7757 = vrcp.f32 %v7410_v10  ;;  %v7835_v10 = vld [vmem:[%s9767_s14] sm:$0xff] }
0x28d4   :  { %v4608_v44 = vpop.f32.mrf.mxu1 }
0x28d5   :  { %7759 = vrcp.f32 %v4608_v44  ;;  %v7836_v44 = vld [vmem:[%s9767_s14 + $0x8] sm:$0xff] }
0x28e0   :  { %v7758_v17 = vpop.eup %7757 }
0x28e1   :  { %v4620_v12 = vmul.f32 %v7758_v17, %v7756_v41  ;;  %v7839_v17 = vld [vmem:[%s9767_s14 + $0x20] sm:$0xff] }
0x28e2   :  { %v7760_v30 = vpop.eup %7759 }
0x28e3   :  { %v4619_v26 = vmul.f32 %v7760_v30, %v7754_v43  ;;  %v7840_v30 = vld [vmem:[%s9767_s14 + $0x28] sm:$0xff] }
0x28e5   :  { %7427 = vmatprep.mubr.msk.f32.mxu0 %vm901_vm5, %v4619_v26  ;;  %v7841_v26 = vld [vmem:[%s9767_s14 + $0x30] sm:$0xff] }
0x28e6   :  { %7428 = vmatmul.mubr.msk.f32.vlgmr.msra.gmra.mxu0 %vm901_vm5, %v4620_v12 }
0x28e7   :  { %7453 = vmatpush3.msra.mxu0 %v4963_v21  ;;  %7460 = vmatprep.mubr.msk.f32.mxu0 %vm514_vm3, %v8980_v32  ;;  %v7828_v32 = vld [vmem:[%s9769_s16 + $0x30] sm:$0xff] }
0x28e8   :  { %7454 = vmatprep.subr.mxu0 %v4961_v11 }
0x28e9   :  { %7455 = vmatpush3.msra.mxu0 %v4961_v11  ;;  %v7842_v11 = vld [vmem:[%s9767_s14 + $0x38] sm:$0xff] }
0x28ea   :  { %7456 = vmatprep.subr.mxu0 %v4959_v31 }
0x28eb   :  { %7457 = vmatpush3.msra.mxu0 %v4959_v31 }
0x28ec   :  { %7458 = vmatprep.subr.mxu0 %v4957_v33 }
0x28ed   :  { %7459 = vmatpush3.msra.mxu0 %v4957_v33 }
0x28ee   :  { %7461 = vmatmul.mubr.msk.f32.vlgmr.msra.gmra.mxu0 %vm514_vm3, %v8987_v50  ;;  %7498 = vmatprep.subr.mxu0 %v7827_v54  ;;  %v7830_v50 = vld [vmem:[%s9769_s16 + $0x20] sm:$0xff] }
0x28ef   :  { %7499 = vmatpush3.msra.mxu0 %v7827_v54 }
0x28f0   :  { %7500 = vmatprep.subr.mxu0 %v7828_v32 }
0x28f1   :  { %7501 = vmatpush3.msra.mxu0 %v7828_v32 }
0x28f2   :  { %7502 = vmatprep.subr.mxu0 %v7829_v18 }
0x28f3   :  { %7503 = vmatpush3.msra.mxu0 %v7829_v18 }
0x28f4   :  { %7504 = vmatprep.subr.mxu0 %v7830_v50 }
0x28f5   :  { %7505 = vmatpush3.msra.mxu0 %v7830_v50 }
0x28f6   :  { %7506 = vmatprep.subr.mxu0 %v7831_v55 }
0x28f7   :  { %7507 = vmatpush3.msra.mxu0 %v7831_v55 }
0x28f8   :  { %7508 = vmatprep.subr.mxu0 %v7832_v16 }
0x28f9   :  { %7509 = vmatpush3.msra.mxu0 %v7832_v16 }
0x28fa   :  { %7510 = vmatprep.subr.mxu0 %v7833_v51 }
0x28fb   :  { %7511 = vmatpush3.msra.mxu0 %v7833_v51 }
0x28fc   :  { %7512 = vmatprep.subr.mxu0 %v7834_v1 }
0x28fd   :  { %7513 = vmatpush3.msra.mxu0 %v7834_v1  ;;  %v7843_v1 = vld [vmem:[%s9768_s15 + $0x38] sm:$0xff] }
0x29a6   :  { %v7429_v2 = vpop.f32.mrf.mxu0 }
0x29a8   :  { %v4717_v22 = vpop.f32.mrf.mxu0 }
0x29a9   :  { %7438 = vmatprep.mubr.msk.f32.mxu1 %vm514_vm3, %v4717_v22 }
0x29aa   :  { %7439 = vmatmul.mubr.msk.f32.vlgmr.msra.gmra.mxu1 %vm514_vm3, %v7429_v2 }
0x29ab   :  { %7442 = vmatpush3.msra.mxu1 %v9444_v27 }
0x29ac   :  { %7443 = vmatprep.subr.mxu1 %v9430_v0 }
0x29ad   :  { %7444 = vmatpush3.msra.mxu1 %v9430_v0 }
0x29ae   :  { %7445 = vmatprep.subr.mxu1 %v9453_v20  ;;  %v7462_v47 = vpop.f32.mrf.mxu0 }
0x29af   :  { %7446 = vmatpush3.msra.mxu1 %v9453_v20 }
0x29b0   :  { %7447 = vmatprep.subr.mxu1 %v9439_v7  ;;  %v5037_v37 = vpop.f32.mrf.mxu0 }
0x29b1   :  { %7448 = vmatpush3.msra.mxu1 %v9439_v7 }
0x2a6a   :  { %v7440_v38 = vpop.f32.mrf.mxu1 }
0x2a6b   :  { %v4823_v40 = vadd.f32 %v7440_v38, %v4743_v35 }
0x2a6c   :  { %v4817_v58 = vpop.f32.mrf.mxu1 }
0x2a6d   :  { %v9502_v48 = vadd.f32 %v4823_v40, %v9261_v56  ;;  %v4818_v59 = vadd.f32 %v4817_v58, %v4743_v35  ;;  %v7844_v35 = vld [vmem:[%s9768_s15 + $0x30] sm:$0xff]  ;;  %v7845_v40 = vld [vmem:[%s9768_s15 + $0x28] sm:$0xff] }
0x2a6f   :  { %v9505_v52 = vadd.f32 %v4818_v59, %v9264_v57  ;;  %v4831_v8 = vsel %vm514_vm3, %v9502_v48, 0.0  ;;  %v7846_v59 = vld [vmem:[%s9768_s15 + $0x20] sm:$0xff] }
0x2a70   :  { %4832 = vadd.xlane.f32.xlu1 %v4831_v8 }
0x2a71   :  { %v4828_v14 = vsel %vm514_vm3, %v9505_v52, 0.0 }
0x2a72   :  { %4829 = vadd.xlane.f32.xlu0 %v4828_v14  ;;  %v7847_v14 = vld [vmem:[%s9768_s15 + $0x10] sm:$0xff] }
0x2af9   :  { %v4833_v28 = vpop.xlane.xlu1 %4832 }
0x2afa   :  { %v4835_v60 = vmul.f32 0.03125, %v4833_v28 }
0x2afb   :  { %v4830_v29 = vpop.xlane.xlu0 %4829 }
0x2afc   :  { %v4834_v61 = vmul.f32 0.03125, %v4830_v29  ;;  %v4837_v34 = vsub.f32 %v9502_v48, %v4835_v60  ;;  %v7848_v60 = vld [vmem:[%s9768_s15] sm:$0xff] }
0x2afe   :  { %v4836_v56 = vsub.f32 %v9505_v52, %v4834_v61  ;;  %v4839_v63 = vmul.f32 %v4837_v34, %v4837_v34  ;;  %v7849_v61 = vld [vmem:[%s9768_s15 + $0x18] sm:$0xff] }
0x2b00   :  { %v4838_v62 = vmul.f32 %v4836_v56, %v4836_v56  ;;  %v4843_v45 = vsel %vm514_vm3, %v4839_v63, 0.0 }
0x2b02   :  { %v4840_v57 = vsel %vm514_vm3, %v4838_v62, 0.0 }
0x2b03   :  { %4841 = vadd.xlane.f32.xlu0 %v4840_v57 }
0x2b07   :  { %4844 = vadd.xlane.f32.xlu0 %v4843_v45  ;;  %v7851_v45 = vld [vmem:[%s9775_s22] sm:$0xff] }
0x2b1d   :  { %4968 = vrot.lane.b32.xlu0 %v9518_v13, %s7875_s1 }
0x2b8c   :  { %v4842_v19 = vpop.xlane.xlu0 %4841 }
0x2b8d   :  { %v4846_v42 = vmul.f32 0.03125, %v4842_v19 }
0x2b8f   :  { %v4848_v23 = vadd.f32 1e-05, %v4846_v42 }
0x2b90   :  { %v4845_v46 = vpop.xlane.xlu0 %4844 }
0x2b91   :  { %7761 = vrsqrt.f32 %v4848_v23  ;;  %v4847_v24 = vmul.f32 0.03125, %v4845_v46 }
0x2b93   :  { %v4849_v25 = vadd.f32 1e-05, %v4847_v24 }
0x2b94   :  { %v4969_v49 = vpop.permute.xlu0 %4968 }
0x2b95   :  { %7763 = vrsqrt.f32 %v4849_v25  ;;  %v5043_v39 = vadd.f32 %v7462_v47, %v4969_v49  ;;  %v5038_v21 = vadd.f32 %v5037_v37, %v4969_v49 }
0x2b97   :  { %7463 = vmatprep.subr.mxu1 %v5043_v39 }
0x2b9e   :  { %v7762_v53 = vpop.eup %7761 }
0x2b9f   :  { %v4852_v43 = vmul.f32 %v7762_v53, %v4836_v56  ;;  %v7850_v56 = vld [vmem:[%s9768_s15 + $0x8] sm:$0xff] }
0x2ba1   :  { %v4854_v41 = vmul.f32 %v9305_v9, %v4852_v43 }
0x2ba2   :  { %v7764_v3 = vpop.eup %7763 }
0x2ba3   :  { %v4853_v4 = vmul.f32 %v7764_v3, %v4837_v34  ;;  %v4856_v5 = vadd.f32 %v9312_v36, %v4854_v41 }
0x2ba5   :  { %7449 = vmatprep.mubr.msk.f32.mxu1 %vm514_vm3, %v4856_v5  ;;  %v4855_v6 = vmul.f32 %v9305_v9, %v4853_v4  ;;  %v7837_v9 = vld [vmem:[%s9767_s14 + $0x10] sm:$0xff] }
0x2ba7   :  { %v4857_v15 = vadd.f32 %v9312_v36, %v4855_v6  ;;  %v7838_v36 = vld [vmem:[%s9767_s14 + $0x18] sm:$0xff] }
0x2ba9   :  { %7450 = vmatmul.mubr.msk.f32.vlgmr.msra.gmra.mxu1 %vm514_vm3, %v4857_v15 }
0x2baa   :  { %7464 = vmatpush3.msra.mxu1 %v5043_v39  ;;  %7467 = vmatprep.mubr.msk.f32.mxu1 %vm660_vm4, %v7835_v10 }
0x2bab   :  { %7465 = vmatprep.subr.mxu1 %v5038_v21 }
0x2bac   :  { %7466 = vmatpush3.msra.mxu1 %v5038_v21 }
0x2bad   :  { %7468 = vmatmul.mubr.msk.f32.vlgmr.msra.gmra.mxu1 %vm660_vm4, %v7836_v44 }
0x2bae   :  { %7470 = vmatprep.mubr.msk.f32.mxu1 %vm660_vm4, %v7837_v9 }
0x2bb1   :  { %7471 = vmatmul.mubr.msk.f32.gmra.mxu1 %vm660_vm4, %v7838_v36 }
0x2bb2   :  { %7473 = vmatprep.mubr.msk.f32.mxu1 %vm660_vm4, %v7839_v17 }
0x2bb5   :  { %7474 = vmatmul.mubr.msk.f32.gmra.mxu1 %vm660_vm4, %v7840_v30 }
0x2bb6   :  { %7476 = vmatprep.mubr.msk.f32.mxu1 %vm660_vm4, %v7841_v26 }
0x2bb9   :  { %7477 = vmatmul.mubr.msk.f32.gmra.mxu1 %vm660_vm4, %v7842_v11 }
0x2c69   :  { %v7451_v12 = vpop.f32.mrf.mxu1 }
0x2c6b   :  { %v4943_v31 = vpop.f32.mrf.mxu1 }
0x2c6c   :  { %v4944_v33 = vadd.f32 %v9518_v13, %v4943_v31 }
0x2c6d   :  { %v7469_v54 = vpop.f32.mrf.mxu1 }
0x2c6e   :  { %7495 = vmatprep.mubr.msk.f32.mxu1 %vm514_vm3, %v4944_v33  ;;  %v5152_v62 = vmul.f32 %v7850_v56, %v7469_v54 }
0x2c6f   :  { %v5112_v32 = vpop.f32.mrf.mxu1 }
0x2c70   :  { %v5151_v29 = vmul.f32 %v7848_v60, %v5112_v32  ;;  %v6283_v60 = vld [vmem:[%s9798_s2 + $0x68] sm:$0xff] }
0x2c71   :  { %v7472_v18 = vpop.f32.mrf.mxu1 }
0x2c72   :  { %v5154_v34 = vmul.f32 %v7849_v61, %v7472_v18 }
0x2c73   :  { %v5122_v50 = vpop.f32.mrf.mxu1 }
0x2c74   :  { %v5153_v28 = vmul.f32 %v7847_v14, %v5122_v50  ;;  %v6285_v14 = vld [vmem:[%s9798_s2 + $0x78] sm:$0xff] }
0x2c75   :  { %v7475_v55 = vpop.f32.mrf.mxu1 }
0x2c76   :  { %v5156_v58 = vmul.f32 %v7845_v40, %v7475_v55 }
0x2c77   :  { %v5132_v16 = vpop.f32.mrf.mxu1 }
0x2c78   :  { %v5155_v8 = vmul.f32 %v7846_v59, %v5132_v16 }
0x2c79   :  { %v7478_v51 = vpop.f32.mrf.mxu1 }
0x2c7a   :  { %v5158_v2 = vmul.f32 %v7843_v1, %v7478_v51 }
0x2c7b   :  { %v5142_v22 = vpop.f32.mrf.mxu1 }
0x2c7c   :  { %v5157_v38 = vmul.f32 %v7844_v35, %v5142_v22  ;;  %7479 = vmatprep.subr.msk.mxu1 %vm514_vm3, %v5158_v2 }
0x2c7d   :  { %7480 = vmatpush3.xpose.msk.msra.mxu1 %vm514_vm3, %v5158_v2 }
0x2c7e   :  { %5373 = vrot.lane.b32.xlu0 %v5157_v38, %s7875_s1  ;;  %7481 = vmatprep.subr.msk.mxu1 %vm514_vm3, %v5157_v38 }
0x2c81   :  { %7482 = vmatpush3.xpose.msk.msra.mxu1 %vm514_vm3, %v5157_v38 }
0x2c82   :  { %5369 = vrot.lane.b32.xlu0 %v5155_v8, %s7875_s1  ;;  %7483 = vmatprep.subr.msk.mxu1 %vm514_vm3, %v5156_v58 }
0x2c85   :  { %7484 = vmatpush3.xpose.msk.msra.mxu1 %vm514_vm3, %v5156_v58 }
0x2c86   :  { %5365 = vrot.lane.b32.xlu0 %v5153_v28, %s7875_s1  ;;  %7485 = vmatprep.subr.msk.mxu1 %vm514_vm3, %v5155_v8 }
0x2c89   :  { %7486 = vmatpush3.xpose.msk.msra.mxu1 %vm514_vm3, %v5155_v8 }
0x2c8a   :  { %5361 = vrot.lane.b32.xlu0 %v5151_v29, %s7875_s1  ;;  %7487 = vmatprep.subr.msk.mxu1 %vm514_vm3, %v5154_v34 }
0x2c8d   :  { %7488 = vmatpush3.xpose.msk.msra.mxu1 %vm514_vm3, %v5154_v34 }
0x2c8e   :  { %7489 = vmatprep.subr.msk.mxu1 %vm514_vm3, %v5153_v28  ;;  %5470 = vrot.lane.b32.xlu0 %v9430_v0, %s7876_s30  ;;  %v4949_v0 = vadd.f32 %v7451_v12, %v9518_v13 }
0x2c91   :  { %7490 = vmatpush3.xpose.msk.msra.mxu1 %vm514_vm3, %v5153_v28  ;;  %v6284_v28 = vld [vmem:[%s9798_s2 + $0x70] sm:$0xff] }
0x2c92   :  { %7491 = vmatprep.subr.msk.mxu1 %vm514_vm3, %v5152_v62  ;;  %5466 = vrot.lane.b32.xlu0 %v9439_v7, %s7876_s30  ;;  %v7852_v7 = vld [vmem:[%s9775_s22 + $0x8] sm:$0xff] }
0x2c95   :  { %7492 = vmatpush3.xpose.msk.msra.mxu1 %vm514_vm3, %v5152_v62 }
0x2c96   :  { %7493 = vmatprep.subr.msk.mxu1 %vm514_vm3, %v5151_v29 }
0x2c99   :  { %7494 = vmatpush3.xpose.msk.msra.mxu1 %vm514_vm3, %v5151_v29  ;;  %v6282_v29 = vld [vmem:[%s9798_s2 + $0x60] sm:$0xff] }
0x2c9c   :  { %7496 = vmatmul.mubr.msk.f32.vlgmr.msra.gmra.mxu1 %vm514_vm3, %v4949_v0 }
0x2cf0   :  { %v5374_v3 = vpop.permute.xlu0 %5373 }
0x2d5c   :  { %v7497_v57 = vpop.f32.mrf.mxu1 }
0x2d5d   :  { %v5261_v42 = vadd.f32 %v7852_v7, %v7497_v57  ;;  %v6281_v7 = vld [vmem:[%s9765_s12 + $0x8] ss:$0 sm:$0xff] }
0x2d5e   :  { %v5255_v63 = vpop.f32.mrf.mxu1 }
0x2d5f   :  { %v5256_v19 = vadd.f32 %v7851_v45, %v5255_v63  ;;  %v5267_v46 = vsel %vm901_vm5, %v5261_v42, -inf  ;;  %v6279_v45 = vld [vmem:[%s9764_s11 + $0x8] ss:$0 sm:$0xff] }
0x2d61   :  { %v5264_v23 = vsel %vm901_vm5, %v5256_v19, -inf }
0x2d62   :  { %5265 = vmax.xlane.f32.xlu1 %v5264_v23 }
0x2d66   :  { %5268 = vmax.xlane.f32.xlu1 %v5267_v46 }
0x2d77   :  { %5375 = vrot.lane.b32.xlu1 %v5158_v2, %s7875_s1 }
0x2d7b   :  { %5371 = vrot.lane.b32.xlu1 %v5156_v58, %s7875_s1 }
0x2d7f   :  { %5367 = vrot.lane.b32.xlu1 %v5154_v34, %s7875_s1 }
0x2d83   :  { %5363 = vrot.lane.b32.xlu1 %v5152_v62, %s7875_s1 }
0x2d87   :  { %5472 = vrot.lane.b32.xlu1 %v9444_v27, %s7876_s30 }
0x2d8b   :  { %5468 = vrot.lane.b32.xlu1 %v9453_v20, %s7876_s30  ;;  %v5370_v20 = vpop.permute.xlu0 %5369 }
0x2d8f   :  { %5478 = vrot.lane.b32.xlu1 %v9518_v13, %s7876_s30  ;;  %v5366_v5 = vpop.permute.xlu0 %5365 }
0x2d93   :  { %v5362_v15 = vpop.permute.xlu0 %5361 }
0x2d97   :  { %v5471_v21 = vpop.permute.xlu0 %5470 }
0x2d9b   :  { %v5467_v11 = vpop.permute.xlu0 %5466 }
0x2deb   :  { %v5266_v24 = vpop.xlane.xlu1 %5265 }
0x2dec   :  { %v5270_v25 = vsub.f32 %v5256_v19, %v5266_v24 }
0x2dee   :  { %v5272_v47 = vmul.f32 1.442695, %v5270_v25 }
0x2def   :  { %v5269_v49 = vpop.xlane.xlu1 %5268 }
0x2df0   :  { %7765 = vpow2.f32 %v5272_v47  ;;  %v5271_v39 = vsub.f32 %v5261_v42, %v5269_v49  ;;  %v6305_v49 = vld [vmem:[%s9762_s9 + $0x1f8] sm:$0xff] }
0x2df2   :  { %v5274_v53 = vmul.f32 1.442695, %v5271_v39  ;;  %v6304_v39 = vld [vmem:[%s9762_s9 + $0x1f0] sm:$0xff] }
0x2df3   :  { %v5376_v43 = vpop.permute.xlu1 %5375 }
0x2df4   :  { %7767 = vpow2.f32 %v5274_v53  ;;  %7517 = vmatprep.subr.mxu0 %v5376_v43  ;;  %v6303_v53 = vld [vmem:[%s9762_s9 + $0x1e8] sm:$0xff] }
0x2df7   :  { %v5372_v4 = vpop.permute.xlu1 %5371 }
0x2dfb   :  { %v5368_v13 = vpop.permute.xlu1 %5367 }
0x2dfd   :  { %v7766_v41 = vpop.eup %7765 }
0x2dfe   :  { %7514 = vmatprep.mubr.msk.f32.mxu0 %vm901_vm5, %v7766_v41 }
0x2dff   :  { %v5364_v6 = vpop.permute.xlu1 %5363 }
0x2e01   :  { %v7768_v27 = vpop.eup %7767 }
0x2e02   :  { %7515 = vmatmul.mubr.msk.f32.vlgmr.msra.gmra.mxu0 %vm901_vm5, %v7768_v27 }
0x2e03   :  { %7518 = vmatpush3.msra.mxu0 %v5376_v43  ;;  %v5473_v37 = vpop.permute.xlu1 %5472  ;;  %v6302_v43 = vld [vmem:[%s9762_s9 + $0x1e0] sm:$0xff] }
0x2e04   :  { %7519 = vmatprep.subr.mxu0 %v5374_v3  ;;  %7536 = vmatprep.subr.mxu1 %v5473_v37 }
0x2e05   :  { %7520 = vmatpush3.msra.mxu0 %v5374_v3  ;;  %7537 = vmatpush3.msra.mxu1 %v5473_v37  ;;  %v6300_v3 = vld [vmem:[%s9762_s9 + $0x1d0] sm:$0xff] }
0x2e06   :  { %7521 = vmatprep.subr.mxu0 %v5372_v4  ;;  %7538 = vmatprep.subr.mxu1 %v5471_v21  ;;  %v6292_v37 = vld [vmem:[%s9762_s9 + $0x190] sm:$0xff] }
0x2e07   :  { %7522 = vmatpush3.msra.mxu0 %v5372_v4  ;;  %7539 = vmatpush3.msra.mxu1 %v5471_v21  ;;  %v5469_v10 = vpop.permute.xlu1 %5468  ;;  %v6298_v4 = vld [vmem:[%s9762_s9 + $0x1c0] sm:$0xff]  ;;  %v6291_v21 = vld [vmem:[%s9762_s9 + $0x188] sm:$0xff] }
0x2e08   :  { %7523 = vmatprep.subr.mxu0 %v5370_v20  ;;  %7540 = vmatprep.subr.mxu1 %v5469_v10 }
0x2e09   :  { %7524 = vmatpush3.msra.mxu0 %v5370_v20  ;;  %7541 = vmatpush3.msra.mxu1 %v5469_v10  ;;  %v6297_v20 = vld [vmem:[%s9762_s9 + $0x1b8] sm:$0xff]  ;;  %v6290_v10 = vld [vmem:[%s9762_s9 + $0x180] sm:$0xff] }
0x2e0a   :  { %7525 = vmatprep.subr.mxu0 %v5368_v13  ;;  %7542 = vmatprep.subr.mxu1 %v5467_v11 }
0x2e0b   :  { %7526 = vmatpush3.msra.mxu0 %v5368_v13  ;;  %7543 = vmatpush3.msra.mxu1 %v5467_v11  ;;  %v5479_v33 = vpop.permute.xlu1 %5478  ;;  %v6296_v13 = vld [vmem:[%s9762_s9 + $0x1b0] sm:$0xff] }
0x2e0c   :  { %7527 = vmatprep.subr.mxu0 %v5366_v5  ;;  %7558 = vmatprep.subr.mxu1 %v6305_v49 }
0x2e0d   :  { %7528 = vmatpush3.msra.mxu0 %v5366_v5  ;;  %v6295_v5 = vld [vmem:[%s9762_s9 + $0x1a8] sm:$0xff] }
0x2e0e   :  { %7529 = vmatprep.subr.mxu0 %v5364_v6 }
0x2e0f   :  { %7530 = vmatpush3.msra.mxu0 %v5364_v6  ;;  %v6294_v6 = vld [vmem:[%s9762_s9 + $0x1a0] sm:$0xff] }
0x2e10   :  { %7531 = vmatprep.subr.mxu0 %v5362_v15 }
0x2e11   :  { %7532 = vmatpush3.msra.mxu0 %v5362_v15  ;;  %v6293_v15 = vld [vmem:[%s9762_s9 + $0x198] sm:$0xff] }
0x2e12   :  { %7547 = vmatprep.subr.mxu0 %v6285_v14 }
0x2ec2   :  { %v7516_v44 = vpop.f32.mrf.mxu0 }
0x2ec3   :  { %7769 = vrcp.f32 %v7516_v44  ;;  %v6287_v44 = vld [vmem:[%s9761_s8 + $0x3] ss:$0 sm:$0xff] }
0x2ec4   :  { %v5348_v9 = vpop.f32.mrf.mxu0 }
0x2ec5   :  { %7771 = vrcp.f32 %v5348_v9 }
0x2ed0   :  { %v7770_v36 = vpop.eup %7769 }
0x2ed1   :  { %v5360_v26 = vmul.f32 %v7770_v36, %v7768_v27  ;;  %v6299_v27 = vld [vmem:[%s9762_s9 + $0x1c8] sm:$0xff] }
0x2ed2   :  { %v7772_v17 = vpop.eup %7771 }
0x2ed3   :  { %v5359_v30 = vmul.f32 %v7772_v17, %v7766_v41  ;;  %v6301_v41 = vld [vmem:[%s9762_s9 + $0x1d8] sm:$0xff] }
0x2ed5   :  { %7533 = vmatprep.mubr.msk.f32.mxu0 %vm901_vm5, %v5359_v30 }
0x2ed6   :  { %7534 = vmatmul.mubr.msk.f32.vlgmr.msra.gmra.mxu0 %vm901_vm5, %v5360_v26 }
0x2ed7   :  { %7548 = vmatpush3.msra.mxu0 %v6285_v14 }
0x2ed8   :  { %7549 = vmatprep.subr.mxu0 %v6284_v28 }
0x2ed9   :  { %7550 = vmatpush3.msra.mxu0 %v6284_v28 }
0x2eda   :  { %7551 = vmatprep.subr.mxu0 %v6283_v60 }
0x2edb   :  { %7552 = vmatpush3.msra.mxu0 %v6283_v60 }
0x2edc   :  { %7553 = vmatprep.subr.mxu0 %v6282_v29 }
0x2edd   :  { %7554 = vmatpush3.msra.mxu0 %v6282_v29 }
0x2f96   :  { %v7535_v12 = vpop.f32.mrf.mxu0 }
0x2f98   :  { %v5457_v31 = vpop.f32.mrf.mxu0 }
0x2f99   :  { %7544 = vmatprep.mubr.msk.f32.mxu1 %vm514_vm3, %v5457_v31 }
0x2f9a   :  { %7545 = vmatmul.mubr.msk.f32.vlgmr.msra.gmra.mxu1 %vm514_vm3, %v7535_v12 }
0x2f9b   :  { %7559 = vmatpush3.msra.mxu1 %v6305_v49 }
0x2f9c   :  { %7560 = vmatprep.subr.mxu1 %v6304_v39 }
0x2f9d   :  { %7561 = vmatpush3.msra.mxu1 %v6304_v39 }
0x2f9e   :  { %7562 = vmatprep.subr.mxu1 %v6303_v53 }
0x2f9f   :  { %7563 = vmatpush3.msra.mxu1 %v6303_v53 }
0x2fa0   :  { %7564 = vmatprep.subr.mxu1 %v6302_v43 }
0x2fa1   :  { %7565 = vmatpush3.msra.mxu1 %v6302_v43 }
0x2fa2   :  { %7566 = vmatprep.subr.mxu1 %v6301_v41 }
0x2fa3   :  { %7567 = vmatpush3.msra.mxu1 %v6301_v41 }
0x2fa4   :  { %7568 = vmatprep.subr.mxu1 %v6300_v3 }
0x2fa5   :  { %7569 = vmatpush3.msra.mxu1 %v6300_v3 }
0x2fa6   :  { %7570 = vmatprep.subr.mxu1 %v6299_v27 }
0x2fa7   :  { %7571 = vmatpush3.msra.mxu1 %v6299_v27  ;;  %v6309_v27 = vld [vmem:[%s9764_s11 + $0x9] ss:$0 sm:$0xff]  ;;  %s7853_s11 = scalar_lea.vmem %s5963_s5, 256 }
0x2fa8   :  { %7572 = vmatprep.subr.mxu1 %v6298_v4  ;;  %p7854_p0 = scmp.ne.s32.totalorder %s5963_s5, %s7853_s11  ;;  %p7859_p2 = scmp.lt.s32.totalorder %s7853_s11, %s7853_s11 }
0x2fa9   :  { %7573 = vmatpush3.msra.mxu1 %v6298_v4 }
0x2faa   :  { %7574 = vmatprep.subr.mxu1 %v6297_v20  ;;  %p7860_p3 = por %p7859_p2, %p7858_p1 }
0x2fab   :  { %7575 = vmatpush3.msra.mxu1 %v6297_v20 }
0x2fac   :  { %7576 = vmatprep.subr.mxu1 %v6296_v13  ;;  %p7861_p4 = pnand %p7860_p3, %p7854_p0 }
0x2fad   :  { %7577 = vmatpush3.msra.mxu1 %v6296_v13 }
0x2fae   :  { %7578 = vmatprep.subr.mxu1 %v6295_v5 }
0x2faf   :  { %7579 = vmatpush3.msra.mxu1 %v6295_v5 }
0x2fb0   :  { %7580 = vmatprep.subr.mxu1 %v6294_v6 }
0x2fb1   :  { %7581 = vmatpush3.msra.mxu1 %v6294_v6  ;;  %v6311_v6 = vld [vmem:[%s9765_s12 + $0x9] ss:$0 sm:$0xff] }
0x2fb2   :  { %7582 = vmatprep.subr.mxu1 %v6293_v15 }
0x2fb3   :  { %7583 = vmatpush3.msra.mxu1 %v6293_v15 }
0x2fb4   :  { %7584 = vmatprep.subr.mxu1 %v6292_v37 }
0x2fb5   :  { %7585 = vmatpush3.msra.mxu1 %v6292_v37 }
0x2fb6   :  { %7586 = vmatprep.subr.mxu1 %v6291_v21 }
0x2fb7   :  { %7587 = vmatpush3.msra.mxu1 %v6291_v21 }
0x2fb8   :  { %7588 = vmatprep.subr.mxu1 %v6290_v10 }
0x2fb9   :  { %7589 = vmatpush3.msra.mxu1 %v6290_v10 }
0x305a   :  { %v7546_v54 = vpop.f32.mrf.mxu1 }
0x305b   :  { %v5559_v32 = vadd.f32 %v7546_v54, %v5479_v33 }
0x305c   :  { %v5553_v18 = vpop.f32.mrf.mxu1 }
0x305d   :  { %v9637_v50 = vadd.f32 %v5559_v32, %v9502_v48  ;;  %v5554_v55 = vadd.f32 %v5553_v18, %v5479_v33 }
0x305f   :  { %v9640_v16 = vadd.f32 %v5554_v55, %v9505_v52  ;;  %v5567_v51 = vsel %vm514_vm3, %v9637_v50, 0.0 }
0x3060   :  { %5568 = vadd.xlane.f32.xlu1 %v5567_v51 }
0x3061   :  { %v5564_v1 = vsel %vm514_vm3, %v9640_v16, 0.0 }
0x3062   :  { %5565 = vadd.xlane.f32.xlu0 %v5564_v1 }
0x30e9   :  { %v5569_v2 = vpop.xlane.xlu1 %5568 }
0x30ea   :  { %v5571_v22 = vmul.f32 0.03125, %v5569_v2 }
0x30eb   :  { %v5566_v35 = vpop.xlane.xlu0 %5565 }
0x30ec   :  { %v5570_v38 = vmul.f32 0.03125, %v5566_v35  ;;  %v5573_v40 = vsub.f32 %v9637_v50, %v5571_v22 }
0x30ee   :  { %v5572_v48 = vsub.f32 %v9640_v16, %v5570_v38  ;;  %v5575_v59 = vmul.f32 %v5573_v40, %v5573_v40 }
0x30f0   :  { %v5574_v58 = vmul.f32 %v5572_v48, %v5572_v48  ;;  %v5579_v8 = vsel %vm514_vm3, %v5575_v59, 0.0 }
0x30f2   :  { %v5576_v52 = vsel %vm514_vm3, %v5574_v58, 0.0 }
0x30f3   :  { %5577 = vadd.xlane.f32.xlu0 %v5576_v52  ;;  %v6307_v52 = vld [vmem:[%s9763_s10 + $0x3] ss:$0 sm:$0xff] }
0x30f7   :  { %5580 = vadd.xlane.f32.xlu0 %v5579_v8 }
0x317c   :  { %v5578_v61 = vpop.xlane.xlu0 %5577 }
0x317d   :  { %v5582_v34 = vmul.f32 0.03125, %v5578_v61 }
0x317f   :  { %v5584_v56 = vadd.f32 1e-05, %v5582_v34 }
0x3180   :  { %v5581_v62 = vpop.xlane.xlu0 %5580 }
0x3181   :  { %7773 = vrsqrt.f32 %v5584_v56  ;;  %v5583_v0 = vmul.f32 0.03125, %v5581_v62 }
0x3183   :  { %v5585_v57 = vadd.f32 1e-05, %v5583_v0 }
0x3185   :  { %7775 = vrsqrt.f32 %v5585_v57 }
0x318e   :  { %v7774_v63 = vpop.eup %7773 }
0x318f   :  { %v5588_v19 = vmul.f32 %v7774_v63, %v5572_v48 }
0x3191   :  { %v5598_v42 = vmul.f32 %v6279_v45, %v5588_v19 }
0x3192   :  { %v7776_v23 = vpop.eup %7775 }
0x3193   :  { %v5589_v46 = vmul.f32 %v7776_v23, %v5573_v40  ;;  %v5608_v24 = vadd.f32 %v6281_v7, %v5598_v42  ;;  %v5872_v23 = vld [vmem:[%s9800_s28 + $0x10] sm:$0xff] }
0x3195   :  { %v5599_v25 = vmul.f32 %v6279_v45, %v5589_v46  ;;  %7555 = vmatprep.mubr.msk.f32.mxu0 %vm514_vm3, %v5608_v24  ;;  %v5871_v46 = vld [vmem:[%s9800_s28 + $0x8] sm:$0xff]  ;;  %v5870_v24 = vld [vmem:[%s9800_s28] sm:$0xff] }
0x3197   :  { %v5609_v47 = vadd.f32 %v6281_v7, %v5599_v25 }
0x3199   :  { %7556 = vmatmul.mubr.msk.f32.vlgmr.msra.gmra.mxu0 %vm514_vm3, %v5609_v47 }
0x3259   :  { %v7557_v9 = vpop.f32.mrf.mxu0 }
0x325a   :  { %v5701_v36 = vadd.f32 %v7557_v9, %v6287_v44 }
0x325b   :  { %v5695_v17 = vpop.f32.mrf.mxu0 }
0x325c   :  { %v5707_v30 = vmul.f32 0.044715, %v5701_v36  ;;  %v5696_v26 = vadd.f32 %v6287_v44, %v5695_v17  ;;  %v5705_v40 = vmul.f32 0.5, %v5701_v36 }
0x325e   :  { %v5709_v11 = vmul.f32 %v5707_v30, %v5701_v36  ;;  %v5706_v12 = vmul.f32 0.044715, %v5696_v26  ;;  %v5704_v35 = vmul.f32 0.5, %v5696_v26 }
0x3260   :  { %v5711_v31 = vmul.f32 %v5709_v11, %v5701_v36  ;;  %v5708_v33 = vmul.f32 %v5706_v12, %v5696_v26 }
0x3262   :  { %v5713_v54 = vadd.f32 %v5711_v31, %v5701_v36  ;;  %v5710_v32 = vmul.f32 %v5708_v33, %v5696_v26 }
0x3264   :  { %v5712_v18 = vadd.f32 %v5710_v32, %v5696_v26  ;;  %v5715_v55 = vmul.f32 0.7978846, %v5713_v54 }
0x3266   :  { %v5714_v51 = vmul.f32 0.7978846, %v5712_v18  ;;  %7777 = vtanh.f32 %v5715_v55 }
0x3268   :  { %7779 = vtanh.f32 %v5714_v51 }
0x3273   :  { %v7778_v1 = vpop.eup %7777 }
0x3274   :  { %v5719_v22 = vadd.f32 1.0, %v7778_v1 }
0x3275   :  { %v7780_v2 = vpop.eup %7779 }
0x3276   :  { %v5718_v38 = vadd.f32 1.0, %v7780_v2  ;;  %v5721_v58 = vmul.f32 %v5719_v22, %v5705_v40 }
0x3278   :  { %v5720_v48 = vmul.f32 %v5718_v38, %v5704_v35 }
0x327a   :  { %7590 = vmatprep.mubr.f32.mxu1 %v5720_v48 }
0x327b   :  { %7591 = vmatmul.mubr.f32.vlgmr.msra.gmra.mxu1 %v5721_v58 }
0x333b   :  { %v7592_v59 = vpop.f32.mrf.mxu1 }
0x333c   :  { %v5819_v8 = vadd.f32 %v7592_v59, %v6307_v52 }
0x333d   :  { %v5813_v14 = vpop.f32.mrf.mxu1 }
0x333e   :  { %v5823_v28 = vadd.f32 %v5819_v8, %v9637_v50  ;;  %v5814_v60 = vadd.f32 %v6307_v52, %v5813_v14 }
0x3340   :  { %v5822_v29 = vadd.f32 %v5814_v60, %v9640_v16  ;;  %v5827_v61 = vsel %vm514_vm3, %v5823_v28, 0.0  ;;  %v5873_v16 = vld [vmem:[%s9800_s28 + $0x18] sm:$0xff] }
0x3341   :  { %5828 = vadd.xlane.f32.xlu1 %v5827_v61  ;;  %7593 = vmatprep.subr.mxu0 %v5873_v16 }
0x3342   :  { %v5824_v34 = vsel %vm514_vm3, %v5822_v29, 0.0  ;;  %7594 = vmatpush3.msra.mxu0 %v5873_v16 }
0x3343   :  { %5825 = vadd.xlane.f32.xlu0 %v5824_v34  ;;  %7595 = vmatprep.subr.mxu0 %v5872_v23 }
0x3344   :  { %7596 = vmatpush3.msra.mxu0 %v5872_v23 }
0x3345   :  { %7597 = vmatprep.subr.mxu0 %v5871_v46 }
0x3346   :  { %7598 = vmatpush3.msra.mxu0 %v5871_v46 }
0x3347   :  { %7599 = vmatprep.subr.mxu0 %v5870_v24 }
0x3348   :  { %7600 = vmatpush3.msra.mxu0 %v5870_v24 }
0x33ca   :  { %v5829_v56 = vpop.xlane.xlu1 %5828 }
0x33cb   :  { %v5831_v62 = vmul.f32 0.03125, %v5829_v56 }
0x33cc   :  { %v5826_v0 = vpop.xlane.xlu0 %5825 }
0x33cd   :  { %v5833_v57 = vsub.f32 %v5823_v28, %v5831_v62  ;;  %v5830_v63 = vmul.f32 0.03125, %v5826_v0 }
0x33cf   :  { %v5832_v45 = vsub.f32 %v5822_v29, %v5830_v63  ;;  %v5835_v19 = vmul.f32 %v5833_v57, %v5833_v57 }
0x33d1   :  { %v5839_v7 = vsel %vm514_vm3, %v5835_v19, 0.0  ;;  %v5834_v42 = vmul.f32 %v5832_v45, %v5832_v45 }
0x33d2   :  { %5840 = vadd.xlane.f32.xlu1 %v5839_v7 }
0x33d3   :  { %v5836_v50 = vsel %vm514_vm3, %v5834_v42, 0.0 }
0x33d4   :  { %5837 = vadd.xlane.f32.xlu0 %v5836_v50 }
0x345b   :  { %v5841_v25 = vpop.xlane.xlu1 %5840 }
0x345c   :  { %v5843_v47 = vmul.f32 0.03125, %v5841_v25 }
0x345d   :  { %v5838_v49 = vpop.xlane.xlu0 %5837 }
0x345e   :  { %v5845_v39 = vadd.f32 1e-05, %v5843_v47  ;;  %v5842_v53 = vmul.f32 0.03125, %v5838_v49 }
0x3460   :  { %7781 = vrsqrt.f32 %v5845_v39  ;;  %v5844_v43 = vadd.f32 1e-05, %v5842_v53 }
0x3462   :  { %7783 = vrsqrt.f32 %v5844_v43 }
0x346d   :  { %v7782_v41 = vpop.eup %7781 }
0x346e   :  { %v5849_v3 = vmul.f32 %v7782_v41, %v5833_v57 }
0x346f   :  { %v7784_v4 = vpop.eup %7783 }
0x3470   :  { %v5848_v20 = vmul.f32 %v7784_v4, %v5832_v45  ;;  %v5859_v13 = vmul.f32 %v6309_v27, %v5849_v3 }
0x3472   :  { %v5858_v5 = vmul.f32 %v6309_v27, %v5848_v20  ;;  %v5869_v37 = vadd.f32 %v6311_v6, %v5859_v13 }
0x3474   :  { %v5868_v15 = vadd.f32 %v6311_v6, %v5858_v5 }
0x3476   :  { %7601 = vmatprep.mubr.msk.f32.mxu0 %vm514_vm3, %v5868_v15 }
0x3477   :  { %7602 = vmatmul.mubr.msk.f32.vlgmr.msra.gmra.mxu0 %vm514_vm3, %v5869_v37 }
0x3537   :  { %v7603_v21 = vpop.f32.mrf.mxu0 }
0x3538   :  { %5956 = vst [vmem:[#allocation2 + $0x8] sm:$0xff] %v7603_v21 }
0x3539   :  { %v5946_v10 = vpop.f32.mrf.mxu0 }
0x353a   :  { %5955 = vst [vmem:[#allocation2] sm:$0xff] %v5946_v10 }
0x353b   :  { %7864 = shalt.err (!%p7861_p4)
}
0x353c   :  { %s7878_s12 = smov 128   ;;  %s7879_s4 = smov 8  }
0x353d   :  { %5968 = dma.vmem_to_hbm [thread:$0]  %s5963_s5, 256, %s9776_s23, [#allocation3], %s7878_s12, %s7878_s12, %s7879_s4  }
0x353e   :  { %7873 = dma.done.wait [#allocation3], 256  }
0x353f   :  { %7874 = vsyncadd [#allocation3], 4294967040 }
0x3540   :  { %5972 = vsyncpa [#allocation3], 1 }

</bundles_post_ra>
